<compile_context>
chip_gen: v6e
topology: v6e:2x2x1
jax: 0.10.0
libtpu: 0.0.40
codegen_flags: <defaults>
</compile_context>

<pallas_src>
import functools

import jax
import jax.numpy as jnp
from jax.experimental import pallas as pl
from jax.experimental.pallas import tpu as pltpu

_LANE = 128  # TPU lane width; all slab segments / activations are padded to it


# ------------------------------------------------------------------ helpers

def _silu(x):
    return x * jax.nn.sigmoid(x)


# ----------------------------------------------------- weight slab layout

_MAT_SEGS = frozenset(("mW1_hi", "mW1_hj", "mW2", "tW1", "tW2",
                       "pW1h", "pW1m", "pW2"))
_SEG_ORDER = ("mW1_hi", "mW1_hj", "mW1_sq", "mb1", "mW2", "mb2",
              "tW1", "tb1", "tW2", "tb2", "tW3r",
              "pW1h", "pW1m", "pb1", "pW2", "pb2")


def _slab_layout(align=8):
    """Row offsets for each segment; matrices get 128 rows, vectors 1 row."""
    offs = {}
    r = 0
    for name in _SEG_ORDER:
        rows = _LANE if name in _MAT_SEGS else 1
        offs[name] = r
        r = -(-(r + rows) // align) * align
    return offs, r  # (offsets, total rows RW)


def _pack_layers(layers, Ds, H, offs, RW):
    """Stack every layer's weights into one lane-dense [L, RW, 128] f32 slab."""
    assert max(Ds, H) <= _LANE, "feature dims must fit a single 128-lane tile"
    slabs = []
    for lp in layers:
        pieces = dict(
            mW1_hi=lp["mW1"][:Ds],                # (Ds, H)
            mW1_hj=lp["mW1"][Ds:2 * Ds],          # (Ds, H)
            mW1_sq=lp["mW1"][2 * Ds:2 * Ds + 1],  # (1, H)
            mb1=lp["mb1"].reshape(1, H),
            mW2=lp["mW2"],                        # (H, H)
            mb2=lp["mb2"].reshape(1, H),
            tW1=lp["tW1"],
            tb1=lp["tb1"].reshape(1, H),
            tW2=lp["tW2"],
            tb2=lp["tb2"].reshape(1, H),
            tW3r=lp["tW3"].reshape(1, H),         # (H,1) -> (1,H)
            pW1h=lp["pW1"][:Ds],                  # (Ds, H)
            pW1m=lp["pW1"][Ds:],                  # (H, H)
            pb1=lp["pb1"].reshape(1, H),
            pW2=lp["pW2"],                        # (H, Ds)
            pb2=lp["pb2"].reshape(1, Ds),
        )
        slab = jnp.zeros((RW, _LANE), jnp.float32)
        for name, val in pieces.items():
            r0 = offs[name]
            rr, cc = val.shape
            assert rr <= (_LANE if name in _MAT_SEGS else 1) and cc <= _LANE
            slab = slab.at[r0:r0 + rr, :cc].set(val.astype(jnp.float32))
        slabs.append(slab)
    return jnp.stack(slabs, axis=0)  # [L, RW, 128]


# ------------------------------------------------------------------ kernel

def egnn_kernel(row_ref, col_ref, h_ref, c_ref, g_ref, b_ref, w_ref,
                h_out_ref, x_out_ref, *, offs, L, Ds, Dc, H):
    N = h_ref.shape[0]
    E = row_ref.shape[0]

    def seg(l, name):
        r0 = offs[name]
        nr = _LANE if name in _MAT_SEGS else 1
        return w_ref[l, r0:r0 + nr, :]            # static slice -> cheap view

    # ---- LayerNorm on the coordinate features (once) ----------------------
    xc = c_ref[...]
    mu = jnp.mean(xc, axis=1, keepdims=True)
    var = jnp.mean((xc - mu) ** 2, axis=1, keepdims=True)
    xn = (xc - mu) * jax.lax.rsqrt(var + 1e-5) * g_ref[...] + b_ref[...]

    # ---- 128-lane padded residents (padded lanes are exactly zero) --------
    h = jnp.concatenate(
        [h_ref[...], jnp.zeros((N, _LANE - Ds), jnp.float32)], axis=1)
    x = jnp.concatenate(
        [xn, jnp.zeros((N, _LANE - Dc), jnp.float32)], axis=1)

    # ---- stacked one-hots: rows [0,E) gather `row`, rows [E,2E) gather `col`
    # (assumes row/col in [0, N); out-of-range ids would silently drop edges)
    ids = jnp.concatenate([row_ref[...], col_ref[...]], axis=0)        # (2E,1)
    node_iota = jax.lax.broadcasted_iota(jnp.int32, (2 * E, N), 1)
    oh2 = (node_iota == ids).astype(jnp.float32)                       # (2E,N)
    oh_row = oh2[:E]                                                   # (E,N)

    # inverse in-degree, pre-broadcast across all 128 lanes
    cnt = jax.lax.dot_general(oh_row, jnp.ones((E, _LANE), jnp.float32),
                              (((0,), (0,)), ((), ())),
                              preferred_element_type=jnp.float32)      # (N,128)
    inv = 1.0 / jnp.maximum(cnt, 1.0)

    # ---- EGCL layers (static unroll, weights resident in VMEM) ------------
    for l in range(L):
        hx = jnp.concatenate([h, x], axis=1)                           # (N,256)
        gat = jnp.dot(oh2, hx, preferred_element_type=jnp.float32)     # (2E,256)
        gi, gj = gat[:E], gat[E:]
        h_i, x_i = gi[:, :_LANE], gi[:, _LANE:]
        h_j, x_j = gj[:, :_LANE], gj[:, _LANE:]

        coord_diff = x_i - x_j                                         # (E,128)
        sqr = jnp.sum(coord_diff * coord_diff, axis=1, keepdims=True)  # (E,1)

        # msg_mlp: cat([h_i, h_j, sqr]) @ W1 folded into split matmuls
        m = (jnp.dot(h_i, seg(l, "mW1_hi"), preferred_element_type=jnp.float32)
             + jnp.dot(h_j, seg(l, "mW1_hj"), preferred_element_type=jnp.float32)
             + sqr * seg(l, "mW1_sq")
             + seg(l, "mb1"))
        m = _silu(m)
        m = _silu(jnp.dot(m, seg(l, "mW2"), preferred_element_type=jnp.float32)
                  + seg(l, "mb2"))                                     # (E,128)

        # trans_mlp -> per-edge scalar; final [H,1] matmul as mul + lane reduce
        t = _silu(jnp.dot(m, seg(l, "tW1"), preferred_element_type=jnp.float32)
                  + seg(l, "tb1"))
        t = _silu(jnp.dot(t, seg(l, "tW2"), preferred_element_type=jnp.float32)
                  + seg(l, "tb2"))
        tscal = jnp.sum(t * seg(l, "tW3r"), axis=1, keepdims=True)     # (E,1)
        trans = coord_diff * tscal                                     # (E,128)

        # single segment-sum matmul for the tile-aligned [trans | msg] slab
        tm = jnp.concatenate([trans, m], axis=1)                       # (E,256)
        segd = jax.lax.dot_general(oh_row, tm, (((0,), (0,)), ((), ())),
                                   preferred_element_type=jnp.float32)  # (N,256)
        x = x + segd[:, :_LANE] * inv
        msg_sum = segd[:, _LANE:]

        # posi_mlp on cat([h, msg_sum]) folded into split matmuls
        p = _silu(jnp.dot(h, seg(l, "pW1h"), preferred_element_type=jnp.float32)
                  + jnp.dot(msg_sum, seg(l, "pW1m"),
                            preferred_element_type=jnp.float32)
                  + seg(l, "pb1"))
        p = jnp.dot(p, seg(l, "pW2"), preferred_element_type=jnp.float32) \
            + seg(l, "pb2")
        h = h + p

    h_out_ref[...] = h[:, :Ds]
    x_out_ref[...] = x[:, :Dc]


# ------------------------------------------------------------------ wrapper

@jax.jit
def egnn_forward(str_feat, coord_feat, row, col, layers, ln):
    N, Ds = str_feat.shape
    _, Dc = coord_feat.shape
    H = layers[0]["mW2"].shape[0]
    L = len(layers)
    E = row.shape[0]

    offs, RW = _slab_layout()
    w_stack = _pack_layers(layers, Ds, H, offs, RW)          # [L, RW, 128]

    row2d = row.reshape(E, 1).astype(jnp.int32)
    col2d = col.reshape(E, 1).astype(jnp.int32)
    gamma2d = ln["gamma"].reshape(1, Dc)
    beta2d = ln["beta"].reshape(1, Dc)

    c2 = lambda i: (0, 0)
    c3 = lambda i: (0, 0, 0)
    kernel = functools.partial(egnn_kernel, offs=offs, L=L, Ds=Ds, Dc=Dc, H=H)

    h_out, x_out = pl.pallas_call(
        kernel,
        out_shape=(jax.ShapeDtypeStruct((N, Ds), jnp.float32),
                   jax.ShapeDtypeStruct((N, Dc), jnp.float32)),
        grid=(1,),
        in_specs=[
            pl.BlockSpec((E, 1), c2),                        # row ids
            pl.BlockSpec((E, 1), c2),                        # col ids
            pl.BlockSpec((N, Ds), c2),                       # str_feature
            pl.BlockSpec((N, Dc), c2),                       # coord_feature
            pl.BlockSpec((1, Dc), c2),                       # LN gamma
            pl.BlockSpec((1, Dc), c2),                       # LN beta
            pl.BlockSpec((L, RW, _LANE), c3),                # all layer weights
        ],
        out_specs=(pl.BlockSpec((N, Ds), c2),
                   pl.BlockSpec((N, Dc), c2)),
        compiler_params=pltpu.CompilerParams(
            dimension_semantics=("arbitrary",)),
    )(row2d, col2d, str_feat, coord_feat, gamma2d, beta2d, w_stack)

    return h_out, x_out


# ------------------------------------------------------------------ params

def init_params(key, str_dim, in_dim, n_layers):
    H, Ds = in_dim, str_dim

    def linear(k, fan_in, fan_out, bias=True, xavier_gain=None):
        kw, kb = jax.random.split(k)
        if xavier_gain is not None:
            bound = xavier_gain * (6.0 / (fan_in + fan_out)) ** 0.5
        else:
            bound = 1.0 / fan_in ** 0.5
        W = jax.random.uniform(kw, (fan_in, fan_out), jnp.float32, -bound, bound)
        if not bias:
            return W, None
        bb = 1.0 / fan_in ** 0.5
        b = jax.random.uniform(kb, (fan_out,), jnp.float32, -bb, bb)
        return W, b

    layers = []
    for lk in jax.random.split(key, n_layers):
        k = jax.random.split(lk, 7)
        mW1, mb1 = linear(k[0], 2 * Ds + 1, H)
        mW2, mb2 = linear(k[1], H, H)
        tW1, tb1 = linear(k[2], H, H)
        tW2, tb2 = linear(k[3], H, H)
        tW3, _ = linear(k[4], H, 1, bias=False, xavier_gain=0.001)
        pW1, pb1 = linear(k[5], Ds + H, H)
        pW2, pb2 = linear(k[6], H, Ds)
        layers.append(dict(mW1=mW1, mb1=mb1, mW2=mW2, mb2=mb2,
                           tW1=tW1, tb1=tb1, tW2=tW2, tb2=tb2, tW3=tW3,
                           pW1=pW1, pb1=pb1, pW2=pW2, pb2=pb2))
    ln = dict(gamma=jnp.ones((in_dim,), jnp.float32),
              beta=jnp.zeros((in_dim,), jnp.float32))
    return layers, ln


# ------------------------------------------------------------------ plain-JAX reference

def egnn_reference(str_feat, coord_feat, row, col, layers, ln):
    x = coord_feat
    mu = x.mean(axis=1, keepdims=True)
    var = ((x - mu) ** 2).mean(axis=1, keepdims=True)
    x = (x - mu) / jnp.sqrt(var + 1e-5) * ln["gamma"] + ln["beta"]
    h = str_feat
    N = h.shape[0]
    for lp in layers:
        cd = x[row] - x[col]
        sq = jnp.sum(cd ** 2, axis=1, keepdims=True)
        inp = jnp.concatenate([h[row], h[col], sq], axis=1)
        m = jax.nn.silu(inp @ lp["mW1"] + lp["mb1"])
        m = jax.nn.silu(m @ lp["mW2"] + lp["mb2"])
        t = jax.nn.silu(m @ lp["tW1"] + lp["tb1"])
        t = jax.nn.silu(t @ lp["tW2"] + lp["tb2"])
        t = t @ lp["tW3"]
        trans = cd * t
        seg = jnp.zeros((N, trans.shape[1]), jnp.float32).at[row].add(trans)
        cnt = jnp.zeros((N, trans.shape[1]), jnp.float32).at[row].add(
            jnp.ones_like(trans))
        x = x + seg / jnp.maximum(cnt, 1.0)
        msum = jnp.zeros((N, m.shape[1]), jnp.float32).at[row].add(m)
        p = jax.nn.silu(jnp.concatenate([h, msum], axis=1) @ lp["pW1"] + lp["pb1"])
        p = p @ lp["pW2"] + lp["pb2"]
        h = h + p
    return h, x


# ------------------------------------------------------------------ main

if __name__ == "__main__":
    N_NODES, N_EDGES = 16, 48
    STR_DIM, IN_DIM, N_LAYERS = 8, 32, 2

    key = jax.random.PRNGKey(0)
    k_h, k_x, k_r, k_c, k_p = jax.random.split(key, 5)

    str_feature = jax.random.normal(k_h, (N_NODES, STR_DIM), jnp.float32)
    coord_feature = jax.random.normal(k_x, (N_NODES, IN_DIM), jnp.float32)
    row = jax.random.randint(k_r, (N_EDGES,), 0, N_NODES, jnp.int32)
    col = jax.random.randint(k_c, (N_EDGES,), 0, N_NODES, jnp.int32)

    layers, ln = init_params(k_p, STR_DIM, IN_DIM, N_LAYERS)

    h_out, x_out = egnn_forward(str_feature, coord_feature, row, col, layers, ln)
    jax.block_until_ready((h_out, x_out))

    h_ref, x_ref = egnn_reference(str_feature, coord_feature, row, col, layers, ln)
    assert jnp.allclose(h_out, h_ref, atol=1e-4, rtol=1e-4)
    assert jnp.allclose(x_out, x_ref, atol=1e-4, rtol=1e-4)

    print("KERNEL_OK")
</pallas_src>

<mosaic_0001>
module attributes {stable_mosaic.version = 11 : i64} {
  func.func @egnn_kernel(%arg0: i32, %arg1: memref<48x1xi32, #tpu.memory_space<vmem>>, %arg2: memref<48x1xi32, #tpu.memory_space<vmem>>, %arg3: memref<16x8xf32, #tpu.memory_space<vmem>>, %arg4: memref<16x32xf32, #tpu.memory_space<vmem>>, %arg5: memref<1x32xf32, #tpu.memory_space<vmem>>, %arg6: memref<1x32xf32, #tpu.memory_space<vmem>>, %arg7: memref<2x1088x128xf32, #tpu.memory_space<vmem>>, %arg8: memref<16x8xf32, #tpu.memory_space<vmem>>, %arg9: memref<16x32xf32, #tpu.memory_space<vmem>>) attributes {dimension_semantics = [#tpu.dimension_semantics<arbitrary>], iteration_bounds = array<i64: 1>, scalar_prefetch = 0 : i64, scratch_operands = 0 : i64, tpu.core_type = #tpu.core_type<tc>, window_params = [{pipeline_mode = #tpu.pipeline_mode<synchronous>, transform_indices = @transform_0, window_bounds = array<i64: 48, 1>}, {pipeline_mode = #tpu.pipeline_mode<synchronous>, transform_indices = @transform_1, window_bounds = array<i64: 48, 1>}, {pipeline_mode = #tpu.pipeline_mode<synchronous>, transform_indices = @transform_2, window_bounds = array<i64: 16, 8>}, {pipeline_mode = #tpu.pipeline_mode<synchronous>, transform_indices = @transform_3, window_bounds = array<i64: 16, 32>}, {pipeline_mode = #tpu.pipeline_mode<synchronous>, transform_indices = @transform_4, window_bounds = array<i64: 1, 32>}, {pipeline_mode = #tpu.pipeline_mode<synchronous>, transform_indices = @transform_5, window_bounds = array<i64: 1, 32>}, {pipeline_mode = #tpu.pipeline_mode<synchronous>, transform_indices = @transform_6, window_bounds = array<i64: 2, 1088, 128>}, {pipeline_mode = #tpu.pipeline_mode<synchronous>, transform_indices = @transform_7, window_bounds = array<i64: 16, 8>}, {pipeline_mode = #tpu.pipeline_mode<synchronous>, transform_indices = @transform_8, window_bounds = array<i64: 16, 32>}]} {
    %c0 = arith.constant 0 : index
    %c0_0 = arith.constant 0 : index
    %0 = vector.load %arg4[%c0, %c0_0] : memref<16x32xf32, #tpu.memory_space<vmem>>, vector<16x32xf32>
    %cst = arith.constant dense<0.000000e+00> : vector<16xf32>
    %1 = vector.multi_reduction <add>, %0, %cst [1] : vector<16x32xf32> to vector<16xf32>
    %2 = vector.shape_cast %1 : vector<16xf32> to vector<16x1xf32>
    %cst_1 = arith.constant 3.200000e+01 : f32
    %3 = vector.broadcast %cst_1 : f32 to vector<16x1xf32>
    %4 = arith.divf %2, %3 : vector<16x1xf32>
    %5 = vector.broadcast %4 : vector<16x1xf32> to vector<16x32xf32>
    %6 = arith.subf %0, %5 : vector<16x32xf32>
    %7 = arith.mulf %6, %6 : vector<16x32xf32>
    %cst_2 = arith.constant dense<0.000000e+00> : vector<16xf32>
    %8 = vector.multi_reduction <add>, %7, %cst_2 [1] : vector<16x32xf32> to vector<16xf32>
    %9 = vector.shape_cast %8 : vector<16xf32> to vector<16x1xf32>
    %cst_3 = arith.constant 3.200000e+01 : f32
    %10 = vector.broadcast %cst_3 : f32 to vector<16x1xf32>
    %11 = arith.divf %9, %10 : vector<16x1xf32>
    %12 = vector.broadcast %4 : vector<16x1xf32> to vector<16x32xf32>
    %13 = arith.subf %0, %12 : vector<16x32xf32>
    %cst_4 = arith.constant 9.99999974E-6 : f32
    %14 = vector.broadcast %cst_4 : f32 to vector<16x1xf32>
    %15 = arith.addf %11, %14 : vector<16x1xf32>
    %16 = math.rsqrt %15 : vector<16x1xf32>
    %17 = vector.broadcast %16 : vector<16x1xf32> to vector<16x32xf32>
    %18 = arith.mulf %13, %17 : vector<16x32xf32>
    %c0_5 = arith.constant 0 : index
    %c0_6 = arith.constant 0 : index
    %19 = vector.load %arg5[%c0_5, %c0_6] : memref<1x32xf32, #tpu.memory_space<vmem>>, vector<1x32xf32>
    %20 = vector.broadcast %19 : vector<1x32xf32> to vector<16x32xf32>
    %21 = arith.mulf %18, %20 : vector<16x32xf32>
    %c0_7 = arith.constant 0 : index
    %c0_8 = arith.constant 0 : index
    %22 = vector.load %arg6[%c0_7, %c0_8] : memref<1x32xf32, #tpu.memory_space<vmem>>, vector<1x32xf32>
    %23 = vector.broadcast %22 : vector<1x32xf32> to vector<16x32xf32>
    %24 = arith.addf %21, %23 : vector<16x32xf32>
    %c0_9 = arith.constant 0 : index
    %c0_10 = arith.constant 0 : index
    %25 = vector.load %arg3[%c0_9, %c0_10] : memref<16x8xf32, #tpu.memory_space<vmem>>, vector<16x8xf32>
    %cst_11 = arith.constant 0.000000e+00 : f32
    %26 = vector.broadcast %cst_11 : f32 to vector<16x120xf32>
    %27 = tpu.concatenate %25, %26 in 1 : vector<16x8xf32>, vector<16x120xf32> -> vector<16x128xf32>
    %cst_12 = arith.constant 0.000000e+00 : f32
    %28 = vector.broadcast %cst_12 : f32 to vector<16x96xf32>
    %29 = tpu.concatenate %24, %28 in 1 : vector<16x32xf32>, vector<16x96xf32> -> vector<16x128xf32>
    %c0_13 = arith.constant 0 : index
    %c0_14 = arith.constant 0 : index
    %30 = vector.load %arg1[%c0_13, %c0_14] : memref<48x1xi32, #tpu.memory_space<vmem>>, vector<48x1xi32>
    %c0_15 = arith.constant 0 : index
    %c0_16 = arith.constant 0 : index
    %31 = vector.load %arg2[%c0_15, %c0_16] : memref<48x1xi32, #tpu.memory_space<vmem>>, vector<48x1xi32>
    %32 = tpu.concatenate %30, %31 in 0 : vector<48x1xi32>, vector<48x1xi32> -> vector<96x1xi32>
    %33 = tpu.iota {dimensions = array<i32: 1>} : vector<96x16xi32>
    %34 = vector.broadcast %32 : vector<96x1xi32> to vector<96x16xi32>
    %35 = arith.cmpi eq, %33, %34 : vector<96x16xi32>
    %36 = arith.extui %35 : vector<96x16xi1> to vector<96x16xi32>
    %37 = arith.sitofp %36 : vector<96x16xi32> to vector<96x16xf32>
    %38 = vector.extract_strided_slice %37 {offsets = [0, 0], sizes = [48, 16], strides = [1, 1]} : vector<96x16xf32> to vector<48x16xf32>
    %cst_17 = arith.constant 1.000000e+00 : f32
    %39 = vector.broadcast %cst_17 : f32 to vector<48x128xf32>
    %cst_18 = arith.constant dense<0.000000e+00> : vector<16x128xf32>
    %40 = tpu.matmul %38, %39, %cst_18 {dimension_numbers = #tpu.dot_dimension_numbers<[0], [0], [1], [1], [0, 1, 1, 1], [], []>} : vector<48x16xf32>, vector<48x128xf32>, vector<16x128xf32> -> vector<16x128xf32>
    %cst_19 = arith.constant 1.000000e+00 : f32
    %41 = vector.broadcast %cst_19 : f32 to vector<16x128xf32>
    %42 = arith.maximumf %40, %41 : vector<16x128xf32>
    %cst_20 = arith.constant 1.000000e+00 : f32
    %43 = vector.broadcast %cst_20 : f32 to vector<16x128xf32>
    %44 = arith.divf %43, %42 : vector<16x128xf32>
    %45 = tpu.concatenate %27, %29 in 1 : vector<16x128xf32>, vector<16x128xf32> -> vector<16x256xf32>
    %cst_21 = arith.constant dense<0.000000e+00> : vector<96x256xf32>
    %46 = tpu.matmul %37, %45, %cst_21 {dimension_numbers = #tpu.dot_dimension_numbers<[1], [0], [0], [1], [0, 0, 1, 1], [], []>} : vector<96x16xf32>, vector<16x256xf32>, vector<96x256xf32> -> vector<96x256xf32>
    %47 = vector.extract_strided_slice %46 {offsets = [0, 0], sizes = [48, 256], strides = [1, 1]} : vector<96x256xf32> to vector<48x256xf32>
    %48 = vector.extract_strided_slice %46 {offsets = [48, 0], sizes = [48, 256], strides = [1, 1]} : vector<96x256xf32> to vector<48x256xf32>
    %49 = vector.extract_strided_slice %47 {offsets = [0, 0], sizes = [48, 128], strides = [1, 1]} : vector<48x256xf32> to vector<48x128xf32>
    %50 = vector.extract_strided_slice %47 {offsets = [0, 128], sizes = [48, 128], strides = [1, 1]} : vector<48x256xf32> to vector<48x128xf32>
    %51 = vector.extract_strided_slice %48 {offsets = [0, 0], sizes = [48, 128], strides = [1, 1]} : vector<48x256xf32> to vector<48x128xf32>
    %52 = vector.extract_strided_slice %48 {offsets = [0, 128], sizes = [48, 128], strides = [1, 1]} : vector<48x256xf32> to vector<48x128xf32>
    %53 = arith.subf %50, %52 : vector<48x128xf32>
    %54 = arith.mulf %53, %53 : vector<48x128xf32>
    %cst_22 = arith.constant dense<0.000000e+00> : vector<48xf32>
    %55 = vector.multi_reduction <add>, %54, %cst_22 [1] : vector<48x128xf32> to vector<48xf32>
    %56 = vector.shape_cast %55 : vector<48xf32> to vector<48x1xf32>
    %c0_23 = arith.constant 0 : index
    %c0_24 = arith.constant 0 : index
    %c0_25 = arith.constant 0 : index
    %57 = vector.load %arg7[%c0_23, %c0_24, %c0_25] : memref<2x1088x128xf32, #tpu.memory_space<vmem>>, vector<1x128x128xf32>
    %58 = vector.shape_cast %57 : vector<1x128x128xf32> to vector<128x128xf32>
    %cst_26 = arith.constant dense<0.000000e+00> : vector<48x128xf32>
    %59 = tpu.matmul %49, %58, %cst_26 {dimension_numbers = #tpu.dot_dimension_numbers<[1], [0], [0], [1], [0, 0, 1, 1], [], []>} : vector<48x128xf32>, vector<128x128xf32>, vector<48x128xf32> -> vector<48x128xf32>
    %c0_27 = arith.constant 0 : index
    %c128 = arith.constant 128 : index
    %c0_28 = arith.constant 0 : index
    %60 = vector.load %arg7[%c0_27, %c128, %c0_28] : memref<2x1088x128xf32, #tpu.memory_space<vmem>>, vector<1x128x128xf32>
    %61 = vector.shape_cast %60 : vector<1x128x128xf32> to vector<128x128xf32>
    %cst_29 = arith.constant dense<0.000000e+00> : vector<48x128xf32>
    %62 = tpu.matmul %51, %61, %cst_29 {dimension_numbers = #tpu.dot_dimension_numbers<[1], [0], [0], [1], [0, 0, 1, 1], [], []>} : vector<48x128xf32>, vector<128x128xf32>, vector<48x128xf32> -> vector<48x128xf32>
    %63 = arith.addf %59, %62 : vector<48x128xf32>
    %c0_30 = arith.constant 0 : index
    %c256 = arith.constant 256 : index
    %c0_31 = arith.constant 0 : index
    %64 = vector.load %arg7[%c0_30, %c256, %c0_31] : memref<2x1088x128xf32, #tpu.memory_space<vmem>>, vector<1x1x128xf32>
    %65 = vector.shape_cast %64 : vector<1x1x128xf32> to vector<1x128xf32>
    %66 = vector.broadcast %56 : vector<48x1xf32> to vector<48x128xf32>
    %67 = vector.broadcast %65 : vector<1x128xf32> to vector<48x128xf32>
    %68 = arith.mulf %66, %67 : vector<48x128xf32>
    %69 = arith.addf %63, %68 : vector<48x128xf32>
    %c0_32 = arith.constant 0 : index
    %c264 = arith.constant 264 : index
    %c0_33 = arith.constant 0 : index
    %70 = vector.load %arg7[%c0_32, %c264, %c0_33] : memref<2x1088x128xf32, #tpu.memory_space<vmem>>, vector<1x1x128xf32>
    %71 = vector.shape_cast %70 : vector<1x1x128xf32> to vector<1x128xf32>
    %72 = vector.broadcast %71 : vector<1x128xf32> to vector<48x128xf32>
    %73 = arith.addf %69, %72 : vector<48x128xf32>
    %74 = arith.negf %73 : vector<48x128xf32>
    %75 = math.exp %74 : vector<48x128xf32>
    %cst_34 = arith.constant 1.000000e+00 : f32
    %76 = vector.broadcast %cst_34 : f32 to vector<48x128xf32>
    %77 = arith.addf %76, %75 : vector<48x128xf32>
    %78 = arith.divf %76, %77 : vector<48x128xf32>
    %79 = arith.mulf %73, %78 : vector<48x128xf32>
    %c0_35 = arith.constant 0 : index
    %c272 = arith.constant 272 : index
    %c0_36 = arith.constant 0 : index
    %80 = vector.load %arg7[%c0_35, %c272, %c0_36] : memref<2x1088x128xf32, #tpu.memory_space<vmem>>, vector<1x128x128xf32>
    %81 = vector.shape_cast %80 : vector<1x128x128xf32> to vector<128x128xf32>
    %cst_37 = arith.constant dense<0.000000e+00> : vector<48x128xf32>
    %82 = tpu.matmul %79, %81, %cst_37 {dimension_numbers = #tpu.dot_dimension_numbers<[1], [0], [0], [1], [0, 0, 1, 1], [], []>} : vector<48x128xf32>, vector<128x128xf32>, vector<48x128xf32> -> vector<48x128xf32>
    %c0_38 = arith.constant 0 : index
    %c400 = arith.constant 400 : index
    %c0_39 = arith.constant 0 : index
    %83 = vector.load %arg7[%c0_38, %c400, %c0_39] : memref<2x1088x128xf32, #tpu.memory_space<vmem>>, vector<1x1x128xf32>
    %84 = vector.shape_cast %83 : vector<1x1x128xf32> to vector<1x128xf32>
    %85 = vector.broadcast %84 : vector<1x128xf32> to vector<48x128xf32>
    %86 = arith.addf %82, %85 : vector<48x128xf32>
    %87 = arith.negf %86 : vector<48x128xf32>
    %88 = math.exp %87 : vector<48x128xf32>
    %cst_40 = arith.constant 1.000000e+00 : f32
    %89 = vector.broadcast %cst_40 : f32 to vector<48x128xf32>
    %90 = arith.addf %89, %88 : vector<48x128xf32>
    %91 = arith.divf %89, %90 : vector<48x128xf32>
    %92 = arith.mulf %86, %91 : vector<48x128xf32>
    %c0_41 = arith.constant 0 : index
    %c408 = arith.constant 408 : index
    %c0_42 = arith.constant 0 : index
    %93 = vector.load %arg7[%c0_41, %c408, %c0_42] : memref<2x1088x128xf32, #tpu.memory_space<vmem>>, vector<1x128x128xf32>
    %94 = vector.shape_cast %93 : vector<1x128x128xf32> to vector<128x128xf32>
    %cst_43 = arith.constant dense<0.000000e+00> : vector<48x128xf32>
    %95 = tpu.matmul %92, %94, %cst_43 {dimension_numbers = #tpu.dot_dimension_numbers<[1], [0], [0], [1], [0, 0, 1, 1], [], []>} : vector<48x128xf32>, vector<128x128xf32>, vector<48x128xf32> -> vector<48x128xf32>
    %c0_44 = arith.constant 0 : index
    %c536 = arith.constant 536 : index
    %c0_45 = arith.constant 0 : index
    %96 = vector.load %arg7[%c0_44, %c536, %c0_45] : memref<2x1088x128xf32, #tpu.memory_space<vmem>>, vector<1x1x128xf32>
    %97 = vector.shape_cast %96 : vector<1x1x128xf32> to vector<1x128xf32>
    %98 = vector.broadcast %97 : vector<1x128xf32> to vector<48x128xf32>
    %99 = arith.addf %95, %98 : vector<48x128xf32>
    %100 = arith.negf %99 : vector<48x128xf32>
    %101 = math.exp %100 : vector<48x128xf32>
    %cst_46 = arith.constant 1.000000e+00 : f32
    %102 = vector.broadcast %cst_46 : f32 to vector<48x128xf32>
    %103 = arith.addf %102, %101 : vector<48x128xf32>
    %104 = arith.divf %102, %103 : vector<48x128xf32>
    %105 = arith.mulf %99, %104 : vector<48x128xf32>
    %c0_47 = arith.constant 0 : index
    %c544 = arith.constant 544 : index
    %c0_48 = arith.constant 0 : index
    %106 = vector.load %arg7[%c0_47, %c544, %c0_48] : memref<2x1088x128xf32, #tpu.memory_space<vmem>>, vector<1x128x128xf32>
    %107 = vector.shape_cast %106 : vector<1x128x128xf32> to vector<128x128xf32>
    %cst_49 = arith.constant dense<0.000000e+00> : vector<48x128xf32>
    %108 = tpu.matmul %105, %107, %cst_49 {dimension_numbers = #tpu.dot_dimension_numbers<[1], [0], [0], [1], [0, 0, 1, 1], [], []>} : vector<48x128xf32>, vector<128x128xf32>, vector<48x128xf32> -> vector<48x128xf32>
    %c0_50 = arith.constant 0 : index
    %c672 = arith.constant 672 : index
    %c0_51 = arith.constant 0 : index
    %109 = vector.load %arg7[%c0_50, %c672, %c0_51] : memref<2x1088x128xf32, #tpu.memory_space<vmem>>, vector<1x1x128xf32>
    %110 = vector.shape_cast %109 : vector<1x1x128xf32> to vector<1x128xf32>
    %111 = vector.broadcast %110 : vector<1x128xf32> to vector<48x128xf32>
    %112 = arith.addf %108, %111 : vector<48x128xf32>
    %113 = arith.negf %112 : vector<48x128xf32>
    %114 = math.exp %113 : vector<48x128xf32>
    %cst_52 = arith.constant 1.000000e+00 : f32
    %115 = vector.broadcast %cst_52 : f32 to vector<48x128xf32>
    %116 = arith.addf %115, %114 : vector<48x128xf32>
    %117 = arith.divf %115, %116 : vector<48x128xf32>
    %118 = arith.mulf %112, %117 : vector<48x128xf32>
    %c0_53 = arith.constant 0 : index
    %c680 = arith.constant 680 : index
    %c0_54 = arith.constant 0 : index
    %119 = vector.load %arg7[%c0_53, %c680, %c0_54] : memref<2x1088x128xf32, #tpu.memory_space<vmem>>, vector<1x1x128xf32>
    %120 = vector.shape_cast %119 : vector<1x1x128xf32> to vector<1x128xf32>
    %121 = vector.broadcast %120 : vector<1x128xf32> to vector<48x128xf32>
    %122 = arith.mulf %118, %121 : vector<48x128xf32>
    %cst_55 = arith.constant dense<0.000000e+00> : vector<48xf32>
    %123 = vector.multi_reduction <add>, %122, %cst_55 [1] : vector<48x128xf32> to vector<48xf32>
    %124 = vector.shape_cast %123 : vector<48xf32> to vector<48x1xf32>
    %125 = vector.broadcast %124 : vector<48x1xf32> to vector<48x128xf32>
    %126 = arith.mulf %53, %125 : vector<48x128xf32>
    %127 = tpu.concatenate %126, %92 in 1 : vector<48x128xf32>, vector<48x128xf32> -> vector<48x256xf32>
    %cst_56 = arith.constant dense<0.000000e+00> : vector<16x256xf32>
    %128 = tpu.matmul %38, %127, %cst_56 {dimension_numbers = #tpu.dot_dimension_numbers<[0], [0], [1], [1], [0, 1, 1, 1], [], []>} : vector<48x16xf32>, vector<48x256xf32>, vector<16x256xf32> -> vector<16x256xf32>
    %129 = vector.extract_strided_slice %128 {offsets = [0, 0], sizes = [16, 128], strides = [1, 1]} : vector<16x256xf32> to vector<16x128xf32>
    %130 = arith.mulf %129, %44 : vector<16x128xf32>
    %131 = arith.addf %29, %130 : vector<16x128xf32>
    %132 = vector.extract_strided_slice %128 {offsets = [0, 128], sizes = [16, 128], strides = [1, 1]} : vector<16x256xf32> to vector<16x128xf32>
    %c0_57 = arith.constant 0 : index
    %c688 = arith.constant 688 : index
    %c0_58 = arith.constant 0 : index
    %133 = vector.load %arg7[%c0_57, %c688, %c0_58] : memref<2x1088x128xf32, #tpu.memory_space<vmem>>, vector<1x128x128xf32>
    %134 = vector.shape_cast %133 : vector<1x128x128xf32> to vector<128x128xf32>
    %cst_59 = arith.constant dense<0.000000e+00> : vector<16x128xf32>
    %135 = tpu.matmul %27, %134, %cst_59 {dimension_numbers = #tpu.dot_dimension_numbers<[1], [0], [0], [1], [0, 0, 1, 1], [], []>} : vector<16x128xf32>, vector<128x128xf32>, vector<16x128xf32> -> vector<16x128xf32>
    %c0_60 = arith.constant 0 : index
    %c816 = arith.constant 816 : index
    %c0_61 = arith.constant 0 : index
    %136 = vector.load %arg7[%c0_60, %c816, %c0_61] : memref<2x1088x128xf32, #tpu.memory_space<vmem>>, vector<1x128x128xf32>
    %137 = vector.shape_cast %136 : vector<1x128x128xf32> to vector<128x128xf32>
    %cst_62 = arith.constant dense<0.000000e+00> : vector<16x128xf32>
    %138 = tpu.matmul %132, %137, %cst_62 {dimension_numbers = #tpu.dot_dimension_numbers<[1], [0], [0], [1], [0, 0, 1, 1], [], []>} : vector<16x128xf32>, vector<128x128xf32>, vector<16x128xf32> -> vector<16x128xf32>
    %139 = arith.addf %135, %138 : vector<16x128xf32>
    %c0_63 = arith.constant 0 : index
    %c944 = arith.constant 944 : index
    %c0_64 = arith.constant 0 : index
    %140 = vector.load %arg7[%c0_63, %c944, %c0_64] : memref<2x1088x128xf32, #tpu.memory_space<vmem>>, vector<1x1x128xf32>
    %141 = vector.shape_cast %140 : vector<1x1x128xf32> to vector<1x128xf32>
    %142 = vector.broadcast %141 : vector<1x128xf32> to vector<16x128xf32>
    %143 = arith.addf %139, %142 : vector<16x128xf32>
    %144 = arith.negf %143 : vector<16x128xf32>
    %145 = math.exp %144 : vector<16x128xf32>
    %cst_65 = arith.constant 1.000000e+00 : f32
    %146 = vector.broadcast %cst_65 : f32 to vector<16x128xf32>
    %147 = arith.addf %146, %145 : vector<16x128xf32>
    %148 = arith.divf %146, %147 : vector<16x128xf32>
    %149 = arith.mulf %143, %148 : vector<16x128xf32>
    %c0_66 = arith.constant 0 : index
    %c952 = arith.constant 952 : index
    %c0_67 = arith.constant 0 : index
    %150 = vector.load %arg7[%c0_66, %c952, %c0_67] : memref<2x1088x128xf32, #tpu.memory_space<vmem>>, vector<1x128x128xf32>
    %151 = vector.shape_cast %150 : vector<1x128x128xf32> to vector<128x128xf32>
    %cst_68 = arith.constant dense<0.000000e+00> : vector<16x128xf32>
    %152 = tpu.matmul %149, %151, %cst_68 {dimension_numbers = #tpu.dot_dimension_numbers<[1], [0], [0], [1], [0, 0, 1, 1], [], []>} : vector<16x128xf32>, vector<128x128xf32>, vector<16x128xf32> -> vector<16x128xf32>
    %c0_69 = arith.constant 0 : index
    %c1080 = arith.constant 1080 : index
    %c0_70 = arith.constant 0 : index
    %153 = vector.load %arg7[%c0_69, %c1080, %c0_70] : memref<2x1088x128xf32, #tpu.memory_space<vmem>>, vector<1x1x128xf32>
    %154 = vector.shape_cast %153 : vector<1x1x128xf32> to vector<1x128xf32>
    %155 = vector.broadcast %154 : vector<1x128xf32> to vector<16x128xf32>
    %156 = arith.addf %152, %155 : vector<16x128xf32>
    %157 = arith.addf %27, %156 : vector<16x128xf32>
    %158 = tpu.concatenate %157, %131 in 1 : vector<16x128xf32>, vector<16x128xf32> -> vector<16x256xf32>
    %cst_71 = arith.constant dense<0.000000e+00> : vector<96x256xf32>
    %159 = tpu.matmul %37, %158, %cst_71 {dimension_numbers = #tpu.dot_dimension_numbers<[1], [0], [0], [1], [0, 0, 1, 1], [], []>} : vector<96x16xf32>, vector<16x256xf32>, vector<96x256xf32> -> vector<96x256xf32>
    %160 = vector.extract_strided_slice %159 {offsets = [0, 0], sizes = [48, 256], strides = [1, 1]} : vector<96x256xf32> to vector<48x256xf32>
    %161 = vector.extract_strided_slice %159 {offsets = [48, 0], sizes = [48, 256], strides = [1, 1]} : vector<96x256xf32> to vector<48x256xf32>
    %162 = vector.extract_strided_slice %160 {offsets = [0, 0], sizes = [48, 128], strides = [1, 1]} : vector<48x256xf32> to vector<48x128xf32>
    %163 = vector.extract_strided_slice %160 {offsets = [0, 128], sizes = [48, 128], strides = [1, 1]} : vector<48x256xf32> to vector<48x128xf32>
    %164 = vector.extract_strided_slice %161 {offsets = [0, 0], sizes = [48, 128], strides = [1, 1]} : vector<48x256xf32> to vector<48x128xf32>
    %165 = vector.extract_strided_slice %161 {offsets = [0, 128], sizes = [48, 128], strides = [1, 1]} : vector<48x256xf32> to vector<48x128xf32>
    %166 = arith.subf %163, %165 : vector<48x128xf32>
    %167 = arith.mulf %166, %166 : vector<48x128xf32>
    %cst_72 = arith.constant dense<0.000000e+00> : vector<48xf32>
    %168 = vector.multi_reduction <add>, %167, %cst_72 [1] : vector<48x128xf32> to vector<48xf32>
    %169 = vector.shape_cast %168 : vector<48xf32> to vector<48x1xf32>
    %c1 = arith.constant 1 : index
    %c0_73 = arith.constant 0 : index
    %c0_74 = arith.constant 0 : index
    %170 = vector.load %arg7[%c1, %c0_73, %c0_74] : memref<2x1088x128xf32, #tpu.memory_space<vmem>>, vector<1x128x128xf32>
    %171 = vector.shape_cast %170 : vector<1x128x128xf32> to vector<128x128xf32>
    %cst_75 = arith.constant dense<0.000000e+00> : vector<48x128xf32>
    %172 = tpu.matmul %162, %171, %cst_75 {dimension_numbers = #tpu.dot_dimension_numbers<[1], [0], [0], [1], [0, 0, 1, 1], [], []>} : vector<48x128xf32>, vector<128x128xf32>, vector<48x128xf32> -> vector<48x128xf32>
    %c1_76 = arith.constant 1 : index
    %c128_77 = arith.constant 128 : index
    %c0_78 = arith.constant 0 : index
    %173 = vector.load %arg7[%c1_76, %c128_77, %c0_78] : memref<2x1088x128xf32, #tpu.memory_space<vmem>>, vector<1x128x128xf32>
    %174 = vector.shape_cast %173 : vector<1x128x128xf32> to vector<128x128xf32>
    %cst_79 = arith.constant dense<0.000000e+00> : vector<48x128xf32>
    %175 = tpu.matmul %164, %174, %cst_79 {dimension_numbers = #tpu.dot_dimension_numbers<[1], [0], [0], [1], [0, 0, 1, 1], [], []>} : vector<48x128xf32>, vector<128x128xf32>, vector<48x128xf32> -> vector<48x128xf32>
    %176 = arith.addf %172, %175 : vector<48x128xf32>
    %c1_80 = arith.constant 1 : index
    %c256_81 = arith.constant 256 : index
    %c0_82 = arith.constant 0 : index
    %177 = vector.load %arg7[%c1_80, %c256_81, %c0_82] : memref<2x1088x128xf32, #tpu.memory_space<vmem>>, vector<1x1x128xf32>
    %178 = vector.shape_cast %177 : vector<1x1x128xf32> to vector<1x128xf32>
    %179 = vector.broadcast %169 : vector<48x1xf32> to vector<48x128xf32>
    %180 = vector.broadcast %178 : vector<1x128xf32> to vector<48x128xf32>
    %181 = arith.mulf %179, %180 : vector<48x128xf32>
    %182 = arith.addf %176, %181 : vector<48x128xf32>
    %c1_83 = arith.constant 1 : index
    %c264_84 = arith.constant 264 : index
    %c0_85 = arith.constant 0 : index
    %183 = vector.load %arg7[%c1_83, %c264_84, %c0_85] : memref<2x1088x128xf32, #tpu.memory_space<vmem>>, vector<1x1x128xf32>
    %184 = vector.shape_cast %183 : vector<1x1x128xf32> to vector<1x128xf32>
    %185 = vector.broadcast %184 : vector<1x128xf32> to vector<48x128xf32>
    %186 = arith.addf %182, %185 : vector<48x128xf32>
    %187 = arith.negf %186 : vector<48x128xf32>
    %188 = math.exp %187 : vector<48x128xf32>
    %cst_86 = arith.constant 1.000000e+00 : f32
    %189 = vector.broadcast %cst_86 : f32 to vector<48x128xf32>
    %190 = arith.addf %189, %188 : vector<48x128xf32>
    %191 = arith.divf %189, %190 : vector<48x128xf32>
    %192 = arith.mulf %186, %191 : vector<48x128xf32>
    %c1_87 = arith.constant 1 : index
    %c272_88 = arith.constant 272 : index
    %c0_89 = arith.constant 0 : index
    %193 = vector.load %arg7[%c1_87, %c272_88, %c0_89] : memref<2x1088x128xf32, #tpu.memory_space<vmem>>, vector<1x128x128xf32>
    %194 = vector.shape_cast %193 : vector<1x128x128xf32> to vector<128x128xf32>
    %cst_90 = arith.constant dense<0.000000e+00> : vector<48x128xf32>
    %195 = tpu.matmul %192, %194, %cst_90 {dimension_numbers = #tpu.dot_dimension_numbers<[1], [0], [0], [1], [0, 0, 1, 1], [], []>} : vector<48x128xf32>, vector<128x128xf32>, vector<48x128xf32> -> vector<48x128xf32>
    %c1_91 = arith.constant 1 : index
    %c400_92 = arith.constant 400 : index
    %c0_93 = arith.constant 0 : index
    %196 = vector.load %arg7[%c1_91, %c400_92, %c0_93] : memref<2x1088x128xf32, #tpu.memory_space<vmem>>, vector<1x1x128xf32>
    %197 = vector.shape_cast %196 : vector<1x1x128xf32> to vector<1x128xf32>
    %198 = vector.broadcast %197 : vector<1x128xf32> to vector<48x128xf32>
    %199 = arith.addf %195, %198 : vector<48x128xf32>
    %200 = arith.negf %199 : vector<48x128xf32>
    %201 = math.exp %200 : vector<48x128xf32>
    %cst_94 = arith.constant 1.000000e+00 : f32
    %202 = vector.broadcast %cst_94 : f32 to vector<48x128xf32>
    %203 = arith.addf %202, %201 : vector<48x128xf32>
    %204 = arith.divf %202, %203 : vector<48x128xf32>
    %205 = arith.mulf %199, %204 : vector<48x128xf32>
    %c1_95 = arith.constant 1 : index
    %c408_96 = arith.constant 408 : index
    %c0_97 = arith.constant 0 : index
    %206 = vector.load %arg7[%c1_95, %c408_96, %c0_97] : memref<2x1088x128xf32, #tpu.memory_space<vmem>>, vector<1x128x128xf32>
    %207 = vector.shape_cast %206 : vector<1x128x128xf32> to vector<128x128xf32>
    %cst_98 = arith.constant dense<0.000000e+00> : vector<48x128xf32>
    %208 = tpu.matmul %205, %207, %cst_98 {dimension_numbers = #tpu.dot_dimension_numbers<[1], [0], [0], [1], [0, 0, 1, 1], [], []>} : vector<48x128xf32>, vector<128x128xf32>, vector<48x128xf32> -> vector<48x128xf32>
    %c1_99 = arith.constant 1 : index
    %c536_100 = arith.constant 536 : index
    %c0_101 = arith.constant 0 : index
    %209 = vector.load %arg7[%c1_99, %c536_100, %c0_101] : memref<2x1088x128xf32, #tpu.memory_space<vmem>>, vector<1x1x128xf32>
    %210 = vector.shape_cast %209 : vector<1x1x128xf32> to vector<1x128xf32>
    %211 = vector.broadcast %210 : vector<1x128xf32> to vector<48x128xf32>
    %212 = arith.addf %208, %211 : vector<48x128xf32>
    %213 = arith.negf %212 : vector<48x128xf32>
    %214 = math.exp %213 : vector<48x128xf32>
    %cst_102 = arith.constant 1.000000e+00 : f32
    %215 = vector.broadcast %cst_102 : f32 to vector<48x128xf32>
    %216 = arith.addf %215, %214 : vector<48x128xf32>
    %217 = arith.divf %215, %216 : vector<48x128xf32>
    %218 = arith.mulf %212, %217 : vector<48x128xf32>
    %c1_103 = arith.constant 1 : index
    %c544_104 = arith.constant 544 : index
    %c0_105 = arith.constant 0 : index
    %219 = vector.load %arg7[%c1_103, %c544_104, %c0_105] : memref<2x1088x128xf32, #tpu.memory_space<vmem>>, vector<1x128x128xf32>
    %220 = vector.shape_cast %219 : vector<1x128x128xf32> to vector<128x128xf32>
    %cst_106 = arith.constant dense<0.000000e+00> : vector<48x128xf32>
    %221 = tpu.matmul %218, %220, %cst_106 {dimension_numbers = #tpu.dot_dimension_numbers<[1], [0], [0], [1], [0, 0, 1, 1], [], []>} : vector<48x128xf32>, vector<128x128xf32>, vector<48x128xf32> -> vector<48x128xf32>
    %c1_107 = arith.constant 1 : index
    %c672_108 = arith.constant 672 : index
    %c0_109 = arith.constant 0 : index
    %222 = vector.load %arg7[%c1_107, %c672_108, %c0_109] : memref<2x1088x128xf32, #tpu.memory_space<vmem>>, vector<1x1x128xf32>
    %223 = vector.shape_cast %222 : vector<1x1x128xf32> to vector<1x128xf32>
    %224 = vector.broadcast %223 : vector<1x128xf32> to vector<48x128xf32>
    %225 = arith.addf %221, %224 : vector<48x128xf32>
    %226 = arith.negf %225 : vector<48x128xf32>
    %227 = math.exp %226 : vector<48x128xf32>
    %cst_110 = arith.constant 1.000000e+00 : f32
    %228 = vector.broadcast %cst_110 : f32 to vector<48x128xf32>
    %229 = arith.addf %228, %227 : vector<48x128xf32>
    %230 = arith.divf %228, %229 : vector<48x128xf32>
    %231 = arith.mulf %225, %230 : vector<48x128xf32>
    %c1_111 = arith.constant 1 : index
    %c680_112 = arith.constant 680 : index
    %c0_113 = arith.constant 0 : index
    %232 = vector.load %arg7[%c1_111, %c680_112, %c0_113] : memref<2x1088x128xf32, #tpu.memory_space<vmem>>, vector<1x1x128xf32>
    %233 = vector.shape_cast %232 : vector<1x1x128xf32> to vector<1x128xf32>
    %234 = vector.broadcast %233 : vector<1x128xf32> to vector<48x128xf32>
    %235 = arith.mulf %231, %234 : vector<48x128xf32>
    %cst_114 = arith.constant dense<0.000000e+00> : vector<48xf32>
    %236 = vector.multi_reduction <add>, %235, %cst_114 [1] : vector<48x128xf32> to vector<48xf32>
    %237 = vector.shape_cast %236 : vector<48xf32> to vector<48x1xf32>
    %238 = vector.broadcast %237 : vector<48x1xf32> to vector<48x128xf32>
    %239 = arith.mulf %166, %238 : vector<48x128xf32>
    %240 = tpu.concatenate %239, %205 in 1 : vector<48x128xf32>, vector<48x128xf32> -> vector<48x256xf32>
    %cst_115 = arith.constant dense<0.000000e+00> : vector<16x256xf32>
    %241 = tpu.matmul %38, %240, %cst_115 {dimension_numbers = #tpu.dot_dimension_numbers<[0], [0], [1], [1], [0, 1, 1, 1], [], []>} : vector<48x16xf32>, vector<48x256xf32>, vector<16x256xf32> -> vector<16x256xf32>
    %242 = vector.extract_strided_slice %241 {offsets = [0, 0], sizes = [16, 128], strides = [1, 1]} : vector<16x256xf32> to vector<16x128xf32>
    %243 = arith.mulf %242, %44 : vector<16x128xf32>
    %244 = arith.addf %131, %243 : vector<16x128xf32>
    %245 = vector.extract_strided_slice %241 {offsets = [0, 128], sizes = [16, 128], strides = [1, 1]} : vector<16x256xf32> to vector<16x128xf32>
    %c1_116 = arith.constant 1 : index
    %c688_117 = arith.constant 688 : index
    %c0_118 = arith.constant 0 : index
    %246 = vector.load %arg7[%c1_116, %c688_117, %c0_118] : memref<2x1088x128xf32, #tpu.memory_space<vmem>>, vector<1x128x128xf32>
    %247 = vector.shape_cast %246 : vector<1x128x128xf32> to vector<128x128xf32>
    %cst_119 = arith.constant dense<0.000000e+00> : vector<16x128xf32>
    %248 = tpu.matmul %157, %247, %cst_119 {dimension_numbers = #tpu.dot_dimension_numbers<[1], [0], [0], [1], [0, 0, 1, 1], [], []>} : vector<16x128xf32>, vector<128x128xf32>, vector<16x128xf32> -> vector<16x128xf32>
    %c1_120 = arith.constant 1 : index
    %c816_121 = arith.constant 816 : index
    %c0_122 = arith.constant 0 : index
    %249 = vector.load %arg7[%c1_120, %c816_121, %c0_122] : memref<2x1088x128xf32, #tpu.memory_space<vmem>>, vector<1x128x128xf32>
    %250 = vector.shape_cast %249 : vector<1x128x128xf32> to vector<128x128xf32>
    %cst_123 = arith.constant dense<0.000000e+00> : vector<16x128xf32>
    %251 = tpu.matmul %245, %250, %cst_123 {dimension_numbers = #tpu.dot_dimension_numbers<[1], [0], [0], [1], [0, 0, 1, 1], [], []>} : vector<16x128xf32>, vector<128x128xf32>, vector<16x128xf32> -> vector<16x128xf32>
    %252 = arith.addf %248, %251 : vector<16x128xf32>
    %c1_124 = arith.constant 1 : index
    %c944_125 = arith.constant 944 : index
    %c0_126 = arith.constant 0 : index
    %253 = vector.load %arg7[%c1_124, %c944_125, %c0_126] : memref<2x1088x128xf32, #tpu.memory_space<vmem>>, vector<1x1x128xf32>
    %254 = vector.shape_cast %253 : vector<1x1x128xf32> to vector<1x128xf32>
    %255 = vector.broadcast %254 : vector<1x128xf32> to vector<16x128xf32>
    %256 = arith.addf %252, %255 : vector<16x128xf32>
    %257 = arith.negf %256 : vector<16x128xf32>
    %258 = math.exp %257 : vector<16x128xf32>
    %cst_127 = arith.constant 1.000000e+00 : f32
    %259 = vector.broadcast %cst_127 : f32 to vector<16x128xf32>
    %260 = arith.addf %259, %258 : vector<16x128xf32>
    %261 = arith.divf %259, %260 : vector<16x128xf32>
    %262 = arith.mulf %256, %261 : vector<16x128xf32>
    %c1_128 = arith.constant 1 : index
    %c952_129 = arith.constant 952 : index
    %c0_130 = arith.constant 0 : index
    %263 = vector.load %arg7[%c1_128, %c952_129, %c0_130] : memref<2x1088x128xf32, #tpu.memory_space<vmem>>, vector<1x128x128xf32>
    %264 = vector.shape_cast %263 : vector<1x128x128xf32> to vector<128x128xf32>
    %cst_131 = arith.constant dense<0.000000e+00> : vector<16x128xf32>
    %265 = tpu.matmul %262, %264, %cst_131 {dimension_numbers = #tpu.dot_dimension_numbers<[1], [0], [0], [1], [0, 0, 1, 1], [], []>} : vector<16x128xf32>, vector<128x128xf32>, vector<16x128xf32> -> vector<16x128xf32>
    %c1_132 = arith.constant 1 : index
    %c1080_133 = arith.constant 1080 : index
    %c0_134 = arith.constant 0 : index
    %266 = vector.load %arg7[%c1_132, %c1080_133, %c0_134] : memref<2x1088x128xf32, #tpu.memory_space<vmem>>, vector<1x1x128xf32>
    %267 = vector.shape_cast %266 : vector<1x1x128xf32> to vector<1x128xf32>
    %268 = vector.broadcast %267 : vector<1x128xf32> to vector<16x128xf32>
    %269 = arith.addf %265, %268 : vector<16x128xf32>
    %270 = arith.addf %157, %269 : vector<16x128xf32>
    %271 = vector.extract_strided_slice %270 {offsets = [0, 0], sizes = [16, 8], strides = [1, 1]} : vector<16x128xf32> to vector<16x8xf32>
    %c0_135 = arith.constant 0 : index
    %c0_136 = arith.constant 0 : index
    %272 = vector.load %arg8[%c0_135, %c0_136] : memref<16x8xf32, #tpu.memory_space<vmem>>, vector<16x8xf32>
    tpu.vector_store %arg8[%c0_135, %c0_136], %271 {strides = array<i32>} : memref<16x8xf32, #tpu.memory_space<vmem>>, vector<16x8xf32>,
    %273 = vector.extract_strided_slice %244 {offsets = [0, 0], sizes = [16, 32], strides = [1, 1]} : vector<16x128xf32> to vector<16x32xf32>
    %c0_137 = arith.constant 0 : index
    %c0_138 = arith.constant 0 : index
    %274 = vector.load %arg9[%c0_137, %c0_138] : memref<16x32xf32, #tpu.memory_space<vmem>>, vector<16x32xf32>
    tpu.vector_store %arg9[%c0_137, %c0_138], %273 {strides = array<i32>} : memref<16x32xf32, #tpu.memory_space<vmem>>, vector<16x32xf32>,
    return
  }
  func.func @transform_0(%arg0: i32) -> (i32, i32) {
    %c0_i32 = arith.constant 0 : i32
    %c0_i32_0 = arith.constant 0 : i32
    %c0_i32_1 = arith.constant 0 : i32
    return %c0_i32, %c0_i32_0 : i32, i32
  }
  func.func @transform_1(%arg0: i32) -> (i32, i32) {
    %c0_i32 = arith.constant 0 : i32
    %c0_i32_0 = arith.constant 0 : i32
    %c0_i32_1 = arith.constant 0 : i32
    return %c0_i32, %c0_i32_0 : i32, i32
  }
  func.func @transform_2(%arg0: i32) -> (i32, i32) {
    %c0_i32 = arith.constant 0 : i32
    %c0_i32_0 = arith.constant 0 : i32
    %c0_i32_1 = arith.constant 0 : i32
    return %c0_i32, %c0_i32_0 : i32, i32
  }
  func.func @transform_3(%arg0: i32) -> (i32, i32) {
    %c0_i32 = arith.constant 0 : i32
    %c0_i32_0 = arith.constant 0 : i32
    %c0_i32_1 = arith.constant 0 : i32
    return %c0_i32, %c0_i32_0 : i32, i32
  }
  func.func @transform_4(%arg0: i32) -> (i32, i32) {
    %c0_i32 = arith.constant 0 : i32
    %c0_i32_0 = arith.constant 0 : i32
    %c0_i32_1 = arith.constant 0 : i32
    return %c0_i32, %c0_i32_0 : i32, i32
  }
  func.func @transform_5(%arg0: i32) -> (i32, i32) {
    %c0_i32 = arith.constant 0 : i32
    %c0_i32_0 = arith.constant 0 : i32
    %c0_i32_1 = arith.constant 0 : i32
    return %c0_i32, %c0_i32_0 : i32, i32
  }
  func.func @transform_6(%arg0: i32) -> (i32, i32, i32) {
    %c0_i32 = arith.constant 0 : i32
    %c0_i32_0 = arith.constant 0 : i32
    %c0_i32_1 = arith.constant 0 : i32
    %c0_i32_2 = arith.constant 0 : i32
    return %c0_i32, %c0_i32_0, %c0_i32_1 : i32, i32, i32
  }
  func.func @transform_7(%arg0: i32) -> (i32, i32) {
    %c0_i32 = arith.constant 0 : i32
    %c0_i32_0 = arith.constant 0 : i32
    %c0_i32_1 = arith.constant 0 : i32
    return %c0_i32, %c0_i32_0 : i32, i32
  }
  func.func @transform_8(%arg0: i32) -> (i32, i32) {
    %c0_i32 = arith.constant 0 : i32
    %c0_i32_0 = arith.constant 0 : i32
    %c0_i32_1 = arith.constant 0 : i32
    return %c0_i32, %c0_i32_0 : i32, i32
  }
}

</mosaic_0001>

<bundles_post_ra>
// kernel: egnn_forward.1
= control target key start
LH: loop header
LB: loop body
LE: loop exit
PB: predicated region body
PF: predicated region fallthrough
CT: control target
= control target key end

     0   :  { %vm31_vm0 = vcmask 261120   ;;  %v4509_v4 = vmov 0   ;;  %s5772_s0 = inlined_call_operand.vmem [shape: s32[48,1], index: 0, kind: input, shape index: {}]   ;;  %s5773_s1 = inlined_call_operand.vmem [shape: s32[48,1], index: 1, kind: input, shape index: {}]   ;;  %s5774_s2 = inlined_call_operand.vmem [shape: f32[16,8], index: 2, kind: input, shape index: {}]   ;;  %s5775_s3 = inlined_call_operand.vmem [shape: f32[16,32], index: 3, kind: input, shape index: {}]   ;;  %s5776_s4 = inlined_call_operand.vmem [shape: f32[1,32], index: 4, kind: input, shape index: {}]   ;;  %s5777_s5 = inlined_call_operand.vmem [shape: f32[1,32], index: 5, kind: input, shape index: {}]   ;;  %s5778_s6 = inlined_call_operand.vmem [shape: f32[2,1088,128], index: 6, kind: input, shape index: {}]   ;;  %s5779_s7 = inlined_call_operand.vmem [shape: f32[16,8], index: 7, kind: output, shape index: {0}]   ;;  %s5780_s8 = inlined_call_operand.hbm [shape: f32[16,32], index: 8, kind: output, shape index: {1}]  }
   0x1   :  { %v30_v0 = vld [vmem:[%s5775_s3 + $0x8] sm:$0xff]  ;;  %v29_v1 = vld [vmem:[%s5775_s3] sm:$0xff]  ;;  %4267 = vset.pattern.permute.xlu1 %v4509_v4  ;;  %4268 = vset.pattern.permute.xlu0 %v4509_v4 }
   0x2   :  { %v84_v2 = vld [vmem:[%s5772_s0] sm:$0xff]  ;;  %v35_v3 = vsel %vm31_vm0, %v30_v0, 0.0 }
   0x3   :  { %36 = vadd.xlane.f32.xlu0 %v35_v3  ;;  %99 = vperm.xlu1 %4267, %v84_v2  }
   0x4   :  { %14 = vsyncpa [#allocation3], 0  ;;  %v32_v5 = vsel %vm31_vm0, %v29_v1, 0.0  ;;  %v85_v6 = vld [vmem:[%s5772_s0 + $0x8] sm:$0xff]  ;;  %v86_v7 = vld [vmem:[%s5772_s0 + $0x10] sm:$0xff]  ;;  %v4510_v16 = vmov 0.0   ;;  %v96_v17 = vlaneseq }
   0x5   :  { %v87_v8 = vld [vmem:[%s5772_s0 + $0x18] sm:$0xff]  ;;  %v89_v9 = vld [vmem:[%s5772_s0 + $0x28] sm:$0xff]  ;;  %v90_v10 = vld [vmem:[%s5773_s1] sm:$0xff]  ;;  %415 = vmatprep.mubr.f32.mxu1 %v4510_v16  ;;  %v4511_v37 = vmov 1.0   ;;  %vm79_vm7 = vcmask 64512   ;;  %vm290_vm8 = vcmask 130048  }
   0x6   :  { %v91_v11 = vld [vmem:[%s5773_s1 + $0x8] sm:$0xff]  ;;  %v92_v12 = vld [vmem:[%s5773_s1 + $0x10] sm:$0xff]  ;;  %v93_v13 = vld [vmem:[%s5773_s1 + $0x18] sm:$0xff]  ;;  %v4602_v18 = vand.u32 127, %v96_v17  ;;  %3618 = vmatprep.subr.mxu0 %v4511_v37  ;;  %vm202_vm15 = vcmask 392192   ;;  %s4512_s11 = smov [#allocation2]  }
   0x7   :  { %33 = vadd.xlane.f32.xlu0 %v32_v5  ;;  %102 = vperm.xlu1 %4267, %v85_v6   ;;  %v94_v14 = vld [vmem:[%s5773_s1 + $0x20] sm:$0xff]  ;;  %v95_v15 = vld [vmem:[%s5773_s1 + $0x28] sm:$0xff]  ;;  %s3015_s12 = sshll.u32 %s4512_s11, 4  ;;  %s3016_s12 = int_to_ptr.vmem [resolvable:$true] %s3015_s12 }
   0x8   :  { %v88_v38 = vld [vmem:[%s5772_s0 + $0x20] sm:$0xff]  ;;  %3619 = vmatpush3.msra.mxu0 %v4511_v37  ;;  %v78_v57 = vld [vmem:[%s5774_s2 + $0x8] sm:$0xff]  ;;  %s4487_s3 = scalar_lea.vmem %s3016_s12, 256  ;;  %p4492_p1 = scmp.lt.s32.totalorder %s3016_s12, %s3016_s12 }
   0x9   :  { %3620 = vmatprep.subr.mxu0 %v4511_v37  ;;  %v3028_v50 = vld [vmem:[%s5776_s4] ss:$0 sm:$0xff]  ;;  %p4488_p0 = scmp.ne.s32.totalorder %s3016_s12, %s4487_s3  ;;  %p4493_p2 = scmp.lt.s32.totalorder %s4487_s3, %s4487_s3 }
   0xa   :  { %3621 = vmatpush3.msra.mxu0 %v4511_v37  ;;  %v3029_v52 = vld [vmem:[%s5777_s5] ss:$0 sm:$0xff] }
   0xb   :  { %105 = vperm.xlu1 %4267, %v86_v7   ;;  %3622 = vmatprep.subr.mxu0 %v4511_v37  ;;  %v77_v61 = vld [vmem:[%s5774_s2] sm:$0xff]  ;;  %p4494_p3 = por %p4493_p2, %p4492_p1 }
   0xc   :  { %3623 = vmatpush3.msra.mxu0 %v4511_v37  ;;  %v516_v17 = vld [vmem:[%s5778_s6 + $0xe0] sm:$0xff] }
   0xd   :  { %3624 = vmatprep.subr.mxu0 %v4511_v37  ;;  %p4495_p4 = pnand %p4494_p3, %p4488_p0 }
   0xe   :  { %3625 = vmatpush3.msra.mxu0 %v4511_v37 }
   0xf   :  { %108 = vperm.xlu1 %4267, %v87_v8   ;;  %3626 = vmatprep.subr.mxu0 %v4511_v37 }
  0x10   :  { %3627 = vmatpush3.msra.mxu0 %v4511_v37 }
  0x11   :  { %3628 = vmatprep.subr.mxu0 %v4511_v37 }
  0x12   :  { %3629 = vmatpush3.msra.mxu0 %v4511_v37  ;;  %v507_v37 = vld [vmem:[%s5778_s6 + $0x98] sm:$0xff] }
  0x13   :  { %114 = vperm.xlu1 %4267, %v89_v9  }
  0x17   :  { %117 = vperm.xlu1 %4267, %v90_v10  }
  0x1b   :  { %120 = vperm.xlu1 %4267, %v91_v11   ;;  %v519_v11 = vld [vmem:[%s5778_s6 + $0xf8] sm:$0xff] }
  0x1f   :  { %123 = vperm.xlu1 %4267, %v92_v12   ;;  %v503_v12 = vld [vmem:[%s5778_s6 + $0x78] sm:$0xff] }
  0x23   :  { %126 = vperm.xlu1 %4267, %v93_v13   ;;  %v518_v13 = vld [vmem:[%s5778_s6 + $0xf0] sm:$0xff] }
  0x27   :  { %129 = vperm.xlu1 %4267, %v94_v14   ;;  %v502_v14 = vld [vmem:[%s5778_s6 + $0x70] sm:$0xff] }
  0x2b   :  { %132 = vperm.xlu1 %4267, %v95_v15   ;;  %v517_v15 = vld [vmem:[%s5778_s6 + $0xe8] sm:$0xff] }
  0x7e   :  { %v100_v19 = vpop.permute.xlu1 %99 }
  0x7f   :  { %vm134_vm1 = vcmp.eq.s32.totalorder %v4602_v18, %v100_v19  ;;  %v515_v19 = vld [vmem:[%s5778_s6 + $0xd8] sm:$0xff] }
  0x80   :  { %v4606_v20 = vsel %vm134_vm1, 1.0, %v4510_v16 }
  0x81   :  { %170 = vxpose.xlu1.b32.start [1/6] (short) (narrow) %v4606_v20, 16 }
  0x82   :  { %v103_v21 = vpop.permute.xlu1 %102 }
  0x83   :  { %vm135_vm2 = vcmp.eq.s32.totalorder %v4602_v18, %v103_v21  ;;  %v514_v21 = vld [vmem:[%s5778_s6 + $0xd0] sm:$0xff] }
  0x84   :  { %v4611_v22 = vsel %vm135_vm2, 1.0, %v4510_v16 }
  0x85   :  { %171 = vxpose.xlu1.b32.cont [2/6] (short) (narrow) %v4611_v22, 16 }
  0x86   :  { %v106_v23 = vpop.permute.xlu1 %105 }
  0x87   :  { %vm136_vm3 = vcmp.eq.s32.totalorder %v4602_v18, %v106_v23  ;;  %v500_v23 = vld [vmem:[%s5778_s6 + $0x60] sm:$0xff] }
  0x88   :  { %v4616_v24 = vsel %vm136_vm3, 1.0, %v4510_v16 }
  0x89   :  { %172 = vxpose.xlu1.b32.cont [3/6] (short) (narrow) %v4616_v24, 16 }
  0x8a   :  { %v109_v25 = vpop.permute.xlu1 %108 }
  0x8b   :  { %vm137_vm4 = vcmp.eq.s32.totalorder %v4602_v18, %v109_v25  ;;  %v513_v25 = vld [vmem:[%s5778_s6 + $0xc8] sm:$0xff] }
  0x8c   :  { %v37_v26 = vpop.xlane.xlu0 %36  ;;  %v4621_v27 = vsel %vm137_vm4, 1.0, %v4510_v16 }
  0x8d   :  { %v40_v28 = vmul.f32 0.03125, %v37_v26  ;;  %173 = vxpose.xlu1.b32.cont [4/6] (short) (narrow) %v4621_v27, 16  ;;  %v512_v26 = vld [vmem:[%s5778_s6 + $0xc0] sm:$0xff] }
  0x8e   :  { %v115_v46 = vpop.permute.xlu1 %114 }
  0x8f   :  { %v42_v29 = vsub.f32 %v30_v0, %v40_v28  ;;  %vm139_vm6 = vcmp.eq.s32.totalorder %v4602_v18, %v115_v46  ;;  %v499_v28 = vld [vmem:[%s5778_s6 + $0x58] sm:$0xff]  ;;  %v489_v46 = vld [vmem:[%s5778_s6 + $0x8] sm:$0xff] }
  0x90   :  { %v34_v30 = vpop.xlane.xlu0 %33  ;;  %v4636_v49 = vsel %vm139_vm6, 1.0, %v4510_v16 }
  0x91   :  { %v39_v31 = vmul.f32 0.03125, %v34_v30  ;;  %v44_v32 = vmul.f32 %v42_v29, %v42_v29  ;;  %v498_v30 = vld [vmem:[%s5778_s6 + $0x50] sm:$0xff] }
  0x92   :  { %v118_v55 = vpop.permute.xlu1 %117 }
  0x93   :  { %v41_v33 = vsub.f32 %v29_v1, %v39_v31  ;;  %v48_v34 = vsel %vm31_vm0, %v44_v32, 0.0  ;;  %vm140_vm9 = vcmp.eq.s32.totalorder %v4602_v18, %v118_v55  ;;  %v510_v31 = vld [vmem:[%s5778_s6 + $0xb0] sm:$0xff]  ;;  %v497_v32 = vld [vmem:[%s5778_s6 + $0x48] sm:$0xff] }
  0x94   :  { %49 = vadd.xlane.f32.xlu0 %v48_v34  ;;  %v4671_v0 = vsel %vm140_vm9, 1.0, %v4510_v16  ;;  %v496_v34 = vld [vmem:[%s5778_s6 + $0x40] sm:$0xff] }
  0x95   :  { %v43_v35 = vmul.f32 %v41_v33, %v41_v33 }
  0x96   :  { %v121_v62 = vpop.permute.xlu1 %120 }
  0x97   :  { %v45_v36 = vsel %vm31_vm0, %v43_v35, 0.0  ;;  %vm141_vm10 = vcmp.eq.s32.totalorder %v4602_v18, %v121_v62  ;;  %v508_v35 = vld [vmem:[%s5778_s6 + $0xa0] sm:$0xff] }
  0x98   :  { %46 = vadd.xlane.f32.xlu0 %v45_v36  ;;  %v4678_v2 = vsel %vm141_vm10, 1.0, %v4510_v16  ;;  %v495_v36 = vld [vmem:[%s5778_s6 + $0x38] sm:$0xff] }
  0x9a   :  { %v124_v63 = vpop.permute.xlu1 %123 }
  0x9b   :  { %vm142_vm11 = vcmp.eq.s32.totalorder %v4602_v18, %v124_v63 }
  0x9c   :  { %v4685_v3 = vsel %vm142_vm11, 1.0, %v4510_v16 }
  0x9e   :  { %v127_v1 = vpop.permute.xlu1 %126 }
  0x9f   :  { %vm143_vm12 = vcmp.eq.s32.totalorder %v4602_v18, %v127_v1 }
  0xa0   :  { %v4692_v5 = vsel %vm143_vm12, 1.0, %v4510_v16 }
  0xa2   :  { %v130_v4 = vpop.permute.xlu1 %129 }
  0xa3   :  { %vm144_vm13 = vcmp.eq.s32.totalorder %v4602_v18, %v130_v4 }
  0xa4   :  { %v4699_v7 = vsel %vm144_vm13, 1.0, %v4510_v16 }
  0xa6   :  { %v133_v6 = vpop.permute.xlu1 %132 }
  0xa7   :  { %vm145_vm14 = vcmp.eq.s32.totalorder %v4602_v18, %v133_v6 }
  0xa8   :  { %v4706_v8 = vsel %vm145_vm14, 1.0, %v4510_v16 }
  0xae   :  { %111 = vperm.xlu0 %4268, %v88_v38   ;;  %v494_v38 = vld [vmem:[%s5778_s6 + $0x30] sm:$0xff] }
 0x11d   :  { %v50_v39 = vpop.xlane.xlu0 %49 }
 0x11e   :  { %v52_v40 = vmul.f32 0.03125, %v50_v39  ;;  %v506_v39 = vld [vmem:[%s5778_s6 + $0x90] sm:$0xff] }
 0x120   :  { %v54_v41 = vadd.f32 1e-05, %v52_v40  ;;  %v493_v40 = vld [vmem:[%s5778_s6 + $0x28] sm:$0xff] }
 0x121   :  { %v47_v42 = vpop.xlane.xlu0 %46 }
 0x122   :  { %4269 = vrsqrt.f32 %v54_v41  ;;  %v51_v43 = vmul.f32 0.03125, %v47_v42  ;;  %v505_v41 = vld [vmem:[%s5778_s6 + $0x88] sm:$0xff]  ;;  %v492_v42 = vld [vmem:[%s5778_s6 + $0x20] sm:$0xff] }
 0x124   :  { %v53_v44 = vadd.f32 1e-05, %v51_v43  ;;  %v504_v43 = vld [vmem:[%s5778_s6 + $0x80] sm:$0xff] }
 0x126   :  { %4271 = vrsqrt.f32 %v53_v44  ;;  %v491_v44 = vld [vmem:[%s5778_s6 + $0x18] sm:$0xff] }
 0x129   :  { %v112_v45 = vpop.permute.xlu0 %111 }
 0x12a   :  { %vm138_vm5 = vcmp.eq.s32.totalorder %v4602_v18, %v112_v45  ;;  %v501_v18 = vld [vmem:[%s5778_s6 + $0x68] sm:$0xff]  ;;  %v490_v45 = vld [vmem:[%s5778_s6 + $0x10] sm:$0xff] }
 0x12b   :  { %v4631_v47 = vsel %vm138_vm5, 1.0, %v4510_v16 }
 0x12c   :  { %174 = vxpose.xlu1.b32.cont [5/6] (short) (narrow) %v4631_v47, 16 }
 0x12f   :  { %v4270_v48 = vpop.eup %4269 }
 0x130   :  { %175 = vxpose.xlu1.b32.end [6/6] (short) (narrow) %v4636_v49, 16  ;;  %v58_v51 = vmul.f32 %v4270_v48, %v42_v29  ;;  %v511_v29 = vld [vmem:[%s5778_s6 + $0xb8] sm:$0xff]  ;;  %v488_v48 = vld [vmem:[%s5778_s6] sm:$0xff] }
 0x132   :  { %v67_v53 = vmul.f32 %v3028_v50, %v58_v51 }
 0x133   :  { %v4272_v54 = vpop.eup %4271 }
 0x134   :  { %v4645_v56 = vadd.f32 %v3029_v52, %v67_v53  ;;  %v57_v58 = vmul.f32 %v4272_v54, %v41_v33  ;;  %v509_v33 = vld [vmem:[%s5778_s6 + $0xa8] sm:$0xff] }
 0x136   :  { %3044 = vmatprep.subr.msk.mxu0 %vm31_vm0, %v4645_v56  ;;  %4253 = vmatprep.subr.msk.mxu1 %vm31_vm0, %v4645_v56  ;;  %v66_v59 = vmul.f32 %v3028_v50, %v57_v58 }
 0x137   :  { %4255 = vmatpush1.msk.msra.mxu1 %vm79_vm7, %v78_v57 }
 0x138   :  { %v4655_v60 = vadd.f32 %v3029_v52, %v66_v59 }
 0x13a   :  { %4254 = vmatprep.subr.msk.mxu1 %vm31_vm0, %v4655_v60 }
 0x13b   :  { %4256 = vmatpush1.msk.msra.mxu1 %vm79_vm7, %v77_v61 }
 0x13c   :  { %3052 = vmatmul.mubr.msk.f32.vlgmr.msra.gmra.mxu1 %vm290_vm8, %v4631_v47  ;;  %3674 = vmatprep.subr.mxu1 %v503_v12 }
 0x13d   :  { %421 = vmatprep.mubr.f32.mxu1 %v4510_v16  ;;  %3675 = vmatpush3.msra.mxu1 %v503_v12 }
 0x13e   :  { %3676 = vmatprep.subr.mxu1 %v502_v14 }
 0x13f   :  { %3677 = vmatpush3.msra.mxu1 %v502_v14 }
 0x140   :  { %3053 = vmatmul.mubr.msk.f32.gmra.mxu1 %vm290_vm8, %v4636_v49  ;;  %3678 = vmatprep.subr.mxu1 %v501_v18 }
 0x141   :  { %427 = vmatprep.mubr.f32.mxu1 %v4510_v16  ;;  %3679 = vmatpush3.msra.mxu1 %v501_v18 }
 0x142   :  { %3680 = vmatprep.subr.mxu1 %v500_v23 }
 0x143   :  { %3681 = vmatpush3.msra.mxu1 %v500_v23 }
 0x144   :  { %3054 = vmatmul.mubr.msk.f32.gmra.mxu1 %vm290_vm8, %v4671_v0  ;;  %3682 = vmatprep.subr.mxu1 %v499_v28 }
 0x145   :  { %433 = vmatprep.mubr.f32.mxu1 %v4510_v16  ;;  %3683 = vmatpush3.msra.mxu1 %v499_v28 }
 0x146   :  { %3684 = vmatprep.subr.mxu1 %v498_v30 }
 0x147   :  { %3685 = vmatpush3.msra.mxu1 %v498_v30 }
 0x148   :  { %3055 = vmatmul.mubr.msk.f32.gmra.mxu1 %vm290_vm8, %v4678_v2  ;;  %3686 = vmatprep.subr.mxu1 %v497_v32 }
 0x149   :  { %439 = vmatprep.mubr.f32.mxu1 %v4510_v16  ;;  %3687 = vmatpush3.msra.mxu1 %v497_v32 }
 0x14a   :  { %3688 = vmatprep.subr.mxu1 %v496_v34 }
 0x14b   :  { %3689 = vmatpush3.msra.mxu1 %v496_v34 }
 0x14c   :  { %3056 = vmatmul.mubr.msk.f32.gmra.mxu1 %vm290_vm8, %v4685_v3  ;;  %3690 = vmatprep.subr.mxu1 %v495_v36 }
 0x14d   :  { %445 = vmatprep.mubr.f32.mxu1 %v4510_v16  ;;  %3691 = vmatpush3.msra.mxu1 %v495_v36 }
 0x14e   :  { %3692 = vmatprep.subr.mxu1 %v494_v38 }
 0x14f   :  { %3693 = vmatpush3.msra.mxu1 %v494_v38 }
 0x150   :  { %3057 = vmatmul.mubr.msk.f32.gmra.mxu1 %vm290_vm8, %v4692_v5  ;;  %3694 = vmatprep.subr.mxu1 %v493_v40 }
 0x151   :  { %451 = vmatprep.mubr.f32.mxu1 %v4510_v16  ;;  %3695 = vmatpush3.msra.mxu1 %v493_v40  ;;  %v794_v40 = vld [vmem:[%s5778_s6 + $0x180] sm:$0xff] }
 0x152   :  { %3696 = vmatprep.subr.mxu1 %v492_v42 }
 0x153   :  { %3697 = vmatpush3.msra.mxu1 %v492_v42  ;;  %v792_v42 = vld [vmem:[%s5778_s6 + $0x170] sm:$0xff] }
 0x154   :  { %3058 = vmatmul.mubr.msk.f32.gmra.mxu1 %vm290_vm8, %v4699_v7  ;;  %3698 = vmatprep.subr.mxu1 %v491_v44 }
 0x155   :  { %457 = vmatprep.mubr.f32.mxu1 %v4510_v16  ;;  %3699 = vmatpush3.msra.mxu1 %v491_v44  ;;  %v790_v44 = vld [vmem:[%s5778_s6 + $0x160] sm:$0xff] }
 0x156   :  { %3700 = vmatprep.subr.mxu1 %v490_v45 }
 0x157   :  { %3701 = vmatpush3.msra.mxu1 %v490_v45  ;;  %v789_v45 = vld [vmem:[%s5778_s6 + $0x158] sm:$0xff] }
 0x158   :  { %3059 = vmatmul.mubr.msk.f32.gmra.mxu1 %vm290_vm8, %v4706_v8  ;;  %3702 = vmatprep.subr.mxu1 %v489_v46 }
 0x159   :  { %3703 = vmatpush3.msra.mxu1 %v489_v46  ;;  %v788_v46 = vld [vmem:[%s5778_s6 + $0x150] sm:$0xff] }
 0x15a   :  { %3704 = vmatprep.subr.mxu1 %v488_v48 }
 0x15b   :  { %3705 = vmatpush3.msra.mxu1 %v488_v48  ;;  %v787_v48 = vld [vmem:[%s5778_s6 + $0x148] sm:$0xff] }
 0x198   :  { %v4710_v9 = vpop.trf.xlu1 }
 0x199   :  { %3630 = vmatprep.mubr.msk.f32.mxu0 %vm202_vm15, %v4710_v9 }
 0x19c   :  { %v4714_v10 = vpop.trf.xlu1 }
 0x19d   :  { %3631 = vmatmul.mubr.msk.f32.vlgmr.msra.gmra.mxu0 %vm202_vm15, %v4714_v10 }
 0x19e   :  { %3045 = vmatpush1.msk.msra.mxu0 %vm79_vm7, %v78_v57  ;;  %391 = vmatprep.mubr.f32.mxu0 %v4510_v16 }
 0x19f   :  { %3046 = vmatprep.subr.msk.mxu0 %vm31_vm0, %v4655_v60 }
 0x1a0   :  { %3047 = vmatpush1.msk.msra.mxu0 %vm79_vm7, %v77_v61 }
 0x1a1   :  { %3048 = vmatmul.mubr.msk.f32.vlgmr.msra.gmra.mxu0 %vm290_vm8, %v4606_v20  ;;  %3633 = vmatprep.subr.mxu0 %v519_v11 }
 0x1a2   :  { %397 = vmatprep.mubr.f32.mxu0 %v4510_v16  ;;  %3634 = vmatpush3.msra.mxu0 %v519_v11 }
 0x1a3   :  { %3635 = vmatprep.subr.mxu0 %v518_v13 }
 0x1a4   :  { %3636 = vmatpush3.msra.mxu0 %v518_v13 }
 0x1a5   :  { %3049 = vmatmul.mubr.msk.f32.gmra.mxu0 %vm290_vm8, %v4611_v22  ;;  %3637 = vmatprep.subr.mxu0 %v517_v15 }
 0x1a6   :  { %403 = vmatprep.mubr.f32.mxu0 %v4510_v16  ;;  %3638 = vmatpush3.msra.mxu0 %v517_v15 }
 0x1a7   :  { %3639 = vmatprep.subr.mxu0 %v516_v17 }
 0x1a8   :  { %3640 = vmatpush3.msra.mxu0 %v516_v17 }
 0x1a9   :  { %3050 = vmatmul.mubr.msk.f32.gmra.mxu0 %vm290_vm8, %v4616_v24  ;;  %3641 = vmatprep.subr.mxu0 %v515_v19 }
 0x1aa   :  { %409 = vmatprep.mubr.f32.mxu0 %v4510_v16  ;;  %3642 = vmatpush3.msra.mxu0 %v515_v19 }
 0x1ab   :  { %3643 = vmatprep.subr.mxu0 %v514_v21 }
 0x1ac   :  { %3644 = vmatpush3.msra.mxu0 %v514_v21 }
 0x1ad   :  { %3051 = vmatmul.mubr.msk.f32.gmra.mxu0 %vm290_vm8, %v4621_v27  ;;  %3645 = vmatprep.subr.mxu0 %v513_v25 }
 0x1ae   :  { %3646 = vmatpush3.msra.mxu0 %v513_v25 }
 0x1af   :  { %3647 = vmatprep.subr.mxu0 %v512_v26 }
 0x1b0   :  { %3648 = vmatpush3.msra.mxu0 %v512_v26 }
 0x1b1   :  { %3649 = vmatprep.subr.mxu0 %v511_v29 }
 0x1b2   :  { %3650 = vmatpush3.msra.mxu0 %v511_v29 }
 0x1b3   :  { %3651 = vmatprep.subr.mxu0 %v510_v31 }
 0x1b4   :  { %3652 = vmatpush3.msra.mxu0 %v510_v31 }
 0x1b5   :  { %3653 = vmatprep.subr.mxu0 %v509_v33 }
 0x1b6   :  { %3654 = vmatpush3.msra.mxu0 %v509_v33 }
 0x1b7   :  { %3655 = vmatprep.subr.mxu0 %v508_v35 }
 0x1b8   :  { %3656 = vmatpush3.msra.mxu0 %v508_v35 }
 0x1b9   :  { %3657 = vmatprep.subr.mxu0 %v507_v37 }
 0x1ba   :  { %3658 = vmatpush3.msra.mxu0 %v507_v37 }
 0x1bb   :  { %3659 = vmatprep.subr.mxu0 %v506_v39 }
 0x1bc   :  { %3660 = vmatpush3.msra.mxu0 %v506_v39  ;;  %v795_v39 = vld [vmem:[%s5778_s6 + $0x188] sm:$0xff] }
 0x1bd   :  { %3661 = vmatprep.subr.mxu0 %v505_v41 }
 0x1be   :  { %3662 = vmatpush3.msra.mxu0 %v505_v41  ;;  %v793_v41 = vld [vmem:[%s5778_s6 + $0x178] sm:$0xff] }
 0x1bf   :  { %3663 = vmatprep.subr.mxu0 %v504_v43 }
 0x1c0   :  { %3664 = vmatpush3.msra.mxu0 %v504_v43  ;;  %v791_v43 = vld [vmem:[%s5778_s6 + $0x168] sm:$0xff] }
 0x1c1   :  { %3715 = vmatprep.subr.mxu0 %v795_v39 }
 0x1fc   :  { %v417_v50 = vpop.f32.mrf.mxu1 }
 0x1fe   :  { %v419_v51 = vpop.f32.mrf.mxu1 }
 0x200   :  { %v423_v52 = vpop.f32.mrf.mxu1 }
 0x202   :  { %v425_v53 = vpop.f32.mrf.mxu1 }
 0x204   :  { %v429_v54 = vpop.f32.mrf.mxu1 }
 0x205   :  { %3665 = vmatprep.mubr.f32.mxu0 %v429_v54  ;;  %v782_v54 = vld [vmem:[%s5778_s6 + $0x120] sm:$0xff] }
 0x206   :  { %v431_v55 = vpop.f32.mrf.mxu1 }
 0x208   :  { %v435_v57 = vpop.f32.mrf.mxu1 }
 0x209   :  { %3666 = vmatmul.mubr.f32.vlgmr.msra.gmra.mxu0 %v435_v57  ;;  %v780_v57 = vld [vmem:[%s5778_s6 + $0x110] sm:$0xff] }
 0x20a   :  { %v437_v58 = vpop.f32.mrf.mxu1  ;;  %3716 = vmatpush3.msra.mxu0 %v795_v39 }
 0x20b   :  { %3717 = vmatprep.subr.mxu0 %v794_v40 }
 0x20c   :  { %v441_v59 = vpop.f32.mrf.mxu1  ;;  %3718 = vmatpush3.msra.mxu0 %v794_v40 }
 0x20d   :  { %3668 = vmatprep.mubr.f32.mxu0 %v441_v59  ;;  %3719 = vmatprep.subr.mxu0 %v793_v41 }
 0x20e   :  { %v443_v61 = vpop.f32.mrf.mxu1  ;;  %3720 = vmatpush3.msra.mxu0 %v793_v41 }
 0x20f   :  { %3721 = vmatprep.subr.mxu0 %v792_v42 }
 0x210   :  { %v447_v62 = vpop.f32.mrf.mxu1  ;;  %3722 = vmatpush3.msra.mxu0 %v792_v42 }
 0x211   :  { %3669 = vmatmul.mubr.f32.gmra.mxu0 %v447_v62  ;;  %3723 = vmatprep.subr.mxu0 %v791_v43 }
 0x212   :  { %v449_v63 = vpop.f32.mrf.mxu1  ;;  %3724 = vmatpush3.msra.mxu0 %v791_v43 }
 0x213   :  { %3725 = vmatprep.subr.mxu0 %v790_v44 }
 0x214   :  { %v453_v1 = vpop.f32.mrf.mxu1  ;;  %3726 = vmatpush3.msra.mxu0 %v790_v44 }
 0x215   :  { %3671 = vmatprep.mubr.f32.mxu0 %v453_v1  ;;  %3727 = vmatprep.subr.mxu0 %v789_v45 }
 0x216   :  { %v455_v4 = vpop.f32.mrf.mxu1  ;;  %3728 = vmatpush3.msra.mxu0 %v789_v45 }
 0x217   :  { %v4830_v6 = vsub.f32 %v419_v51, %v455_v4  ;;  %3729 = vmatprep.subr.mxu0 %v788_v46  ;;  %v785_v51 = vld [vmem:[%s5778_s6 + $0x138] sm:$0xff] }
 0x218   :  { %v459_v11 = vpop.f32.mrf.mxu1  ;;  %3730 = vmatpush3.msra.mxu0 %v788_v46 }
 0x219   :  { %3672 = vmatmul.mubr.f32.gmra.mxu0 %v459_v11  ;;  %v474_v38 = vmul.f32 %v4830_v6, %v4830_v6  ;;  %3731 = vmatprep.subr.mxu0 %v787_v48 }
 0x21a   :  { %v461_v12 = vpop.f32.mrf.mxu1  ;;  %3732 = vmatpush3.msra.mxu0 %v787_v48 }
 0x21b   :  { %v4832_v13 = vsub.f32 %v425_v53, %v461_v12  ;;  %v783_v53 = vld [vmem:[%s5778_s6 + $0x128] sm:$0xff] }
 0x21d   :  { %v475_v14 = vmul.f32 %v4832_v13, %v4832_v13 }
 0x21f   :  { %486 = vadd.xlane.f32.xlu1 %v475_v14  ;;  %v3061_v14 = vld [vmem:[%s5778_s6 + $0x108] ss:$0 sm:$0xff] }
 0x25d   :  { %v4836_v15 = vpop.f32.mrf.mxu0 }
 0x25f   :  { %v4838_v17 = vpop.f32.mrf.mxu0 }
 0x261   :  { %v393_v18 = vpop.f32.mrf.mxu0 }
 0x262   :  { %3706 = vmatprep.mubr.f32.mxu1 %v393_v18 }
 0x263   :  { %v395_v19 = vpop.f32.mrf.mxu0 }
 0x264   :  { %v4840_v21 = vsub.f32 %v395_v19, %v431_v55  ;;  %v781_v55 = vld [vmem:[%s5778_s6 + $0x118] sm:$0xff] }
 0x265   :  { %v399_v23 = vpop.f32.mrf.mxu0 }
 0x266   :  { %3707 = vmatmul.mubr.f32.vlgmr.msra.gmra.mxu1 %v399_v23  ;;  %v470_v25 = vmul.f32 %v4840_v21, %v4840_v21 }
 0x267   :  { %v401_v26 = vpop.f32.mrf.mxu0 }
 0x268   :  { %v4844_v28 = vsub.f32 %v401_v26, %v437_v58  ;;  %476 = vadd.xlane.f32.xlu0 %v470_v25 }
 0x269   :  { %v405_v29 = vpop.f32.mrf.mxu0 }
 0x26a   :  { %3709 = vmatprep.mubr.f32.mxu1 %v405_v29  ;;  %v471_v30 = vmul.f32 %v4844_v28, %v4844_v28 }
 0x26b   :  { %v407_v31 = vpop.f32.mrf.mxu0 }
 0x26c   :  { %v4848_v32 = vsub.f32 %v407_v31, %v443_v61  ;;  %478 = vadd.xlane.f32.xlu0 %v471_v30 }
 0x26d   :  { %v411_v33 = vpop.f32.mrf.mxu0 }
 0x26e   :  { %3710 = vmatmul.mubr.f32.gmra.mxu1 %v411_v33  ;;  %v472_v34 = vmul.f32 %v4848_v32, %v4848_v32 }
 0x26f   :  { %v413_v35 = vpop.f32.mrf.mxu0  ;;  %3712 = vmatprep.mubr.f32.mxu1 %v417_v50  ;;  %v786_v50 = vld [vmem:[%s5778_s6 + $0x140] sm:$0xff] }
 0x270   :  { %v4852_v36 = vsub.f32 %v413_v35, %v449_v63  ;;  %480 = vadd.xlane.f32.xlu0 %v472_v34  ;;  %3733 = vmatprep.subr.mxu0 %v786_v50  ;;  %v3060_v63 = vld [vmem:[%s5778_s6 + $0x100] ss:$0 sm:$0xff] }
 0x271   :  { %3734 = vmatpush3.msra.mxu0 %v786_v50 }
 0x272   :  { %3713 = vmatmul.mubr.f32.gmra.mxu1 %v423_v52  ;;  %v473_v37 = vmul.f32 %v4852_v36, %v4852_v36  ;;  %3735 = vmatprep.subr.mxu0 %v785_v51  ;;  %v784_v52 = vld [vmem:[%s5778_s6 + $0x130] sm:$0xff] }
 0x273   :  { %3736 = vmatpush3.msra.mxu0 %v785_v51 }
 0x274   :  { %482 = vadd.xlane.f32.xlu0 %v473_v37  ;;  %3737 = vmatprep.subr.mxu0 %v784_v52 }
 0x275   :  { %3738 = vmatpush3.msra.mxu0 %v784_v52 }
 0x276   :  { %3739 = vmatprep.subr.mxu0 %v783_v53 }
 0x277   :  { %3740 = vmatpush3.msra.mxu0 %v783_v53 }
 0x278   :  { %484 = vadd.xlane.f32.xlu0 %v474_v38  ;;  %3741 = vmatprep.subr.mxu0 %v782_v54 }
 0x279   :  { %3742 = vmatpush3.msra.mxu0 %v782_v54 }
 0x27a   :  { %3743 = vmatprep.subr.mxu0 %v781_v55 }
 0x27b   :  { %3744 = vmatpush3.msra.mxu0 %v781_v55 }
 0x27c   :  { %3745 = vmatprep.subr.mxu0 %v780_v57 }
 0x27d   :  { %3746 = vmatpush3.msra.mxu0 %v780_v57 }
 0x2a8   :  { %v487_v38 = vpop.xlane.xlu1 %486 }
 0x2a9   :  { %v720_v51 = vmul.f32 %v3060_v63, %v487_v38 }
 0x2c9   :  { %v3667_v61 = vpop.f32.mrf.mxu0 }
 0x2cb   :  { %v586_v12 = vpop.f32.mrf.mxu0 }
 0x2d1   :  { %v3670_v26 = vpop.f32.mrf.mxu0 }
 0x2d3   :  { %v596_v35 = vpop.f32.mrf.mxu0 }
 0x2d9   :  { %v3673_v42 = vpop.f32.mrf.mxu0 }
 0x2db   :  { %v606_v55 = vpop.f32.mrf.mxu0 }
 0x2f1   :  { %v477_v58 = vpop.xlane.xlu0 %476 }
 0x2f2   :  { %v715_v19 = vmul.f32 %v3060_v63, %v477_v58 }
 0x2f5   :  { %v479_v59 = vpop.xlane.xlu0 %478 }
 0x2f6   :  { %v716_v4 = vmul.f32 %v3060_v63, %v479_v59 }
 0x2f9   :  { %v481_v62 = vpop.xlane.xlu0 %480 }
 0x2fa   :  { %v717_v44 = vmul.f32 %v3060_v63, %v481_v62 }
 0x2fd   :  { %v483_v29 = vpop.xlane.xlu0 %482 }
 0x2fe   :  { %v718_v39 = vmul.f32 %v3060_v63, %v483_v29 }
 0x301   :  { %v485_v45 = vpop.xlane.xlu0 %484 }
 0x302   :  { %v719_v57 = vmul.f32 %v3060_v63, %v485_v45 }
 0x326   :  { %v3708_v1 = vpop.f32.mrf.mxu1 }
 0x327   :  { %v687_v11 = vadd.f32 %v3708_v1, %v3667_v61 }
 0x328   :  { %v681_v18 = vpop.f32.mrf.mxu1 }
 0x329   :  { %v722_v23 = vadd.f32 %v716_v4, %v687_v11  ;;  %v682_v25 = vadd.f32 %v681_v18, %v586_v12 }
 0x32b   :  { %v733_v30 = vadd.f32 %v3061_v14, %v722_v23  ;;  %v721_v31 = vadd.f32 %v715_v19, %v682_v25 }
 0x32d   :  { %v3063_v33 = vmul.f32 -1.442695, %v733_v30  ;;  %v732_v34 = vadd.f32 %v3061_v14, %v721_v31 }
 0x32e   :  { %v3711_v37 = vpop.f32.mrf.mxu1 }
 0x32f   :  { %4273 = vpow2.f32 %v3063_v33  ;;  %v3062_v40 = vmul.f32 -1.442695, %v732_v34  ;;  %v697_v41 = vadd.f32 %v3711_v37, %v3670_v26 }
 0x330   :  { %v691_v43 = vpop.f32.mrf.mxu1 }
 0x331   :  { %4275 = vpow2.f32 %v3062_v40  ;;  %v724_v46 = vadd.f32 %v718_v39, %v697_v41  ;;  %v692_v48 = vadd.f32 %v691_v43, %v596_v35 }
 0x332   :  { %v3714_v50 = vpop.f32.mrf.mxu1 }
 0x333   :  { %v735_v52 = vadd.f32 %v3061_v14, %v724_v46  ;;  %v723_v53 = vadd.f32 %v717_v44, %v692_v48  ;;  %v707_v54 = vadd.f32 %v3714_v50, %v3673_v42 }
 0x334   :  { %v701_v58 = vpop.f32.mrf.mxu1 }
 0x335   :  { %v3065_v59 = vmul.f32 -1.442695, %v735_v52  ;;  %v734_v61 = vadd.f32 %v3061_v14, %v723_v53  ;;  %v726_v1 = vadd.f32 %v720_v51, %v707_v54  ;;  %v702_v4 = vadd.f32 %v701_v58, %v606_v55  ;;  %v949_v58 = vld [vmem:[%s5778_s6 + $0x1f0] sm:$0xff] }
 0x337   :  { %4277 = vpow2.f32 %v3065_v59  ;;  %v3064_v11 = vmul.f32 -1.442695, %v734_v61  ;;  %v737_v12 = vadd.f32 %v3061_v14, %v726_v1  ;;  %v725_v62 = vadd.f32 %v719_v57, %v702_v4  ;;  %v953_v57 = vld [vmem:[%s5778_s6 + $0x210] sm:$0xff]  ;;  %v948_v59 = vld [vmem:[%s5778_s6 + $0x1e8] sm:$0xff]  ;;  %v946_v1 = vld [vmem:[%s5778_s6 + $0x1d8] sm:$0xff] }
 0x338   :  { %3756 = vmatprep.subr.mxu1 %v953_v57  ;;  %v945_v4 = vld [vmem:[%s5778_s6 + $0x1d0] sm:$0xff] }
 0x339   :  { %4279 = vpow2.f32 %v3064_v11  ;;  %v3067_v18 = vmul.f32 -1.442695, %v737_v12  ;;  %v736_v19 = vadd.f32 %v3061_v14, %v725_v62  ;;  %3757 = vmatpush3.msra.mxu1 %v953_v57  ;;  %v944_v11 = vld [vmem:[%s5778_s6 + $0x1c8] sm:$0xff]  ;;  %v942_v62 = vld [vmem:[%s5778_s6 + $0x1b8] sm:$0xff] }
 0x33b   :  { %4281 = vpow2.f32 %v3067_v18  ;;  %v3066_v23 = vmul.f32 -1.442695, %v736_v19  ;;  %v941_v18 = vld [vmem:[%s5778_s6 + $0x1b0] sm:$0xff] }
 0x33c   :  { %v4274_v25 = vpop.eup %4273 }
 0x33d   :  { %v757_v26 = vadd.f32 1.0, %v4274_v25  ;;  %4283 = vpow2.f32 %v3066_v23  ;;  %v939_v23 = vld [vmem:[%s5778_s6 + $0x1a0] sm:$0xff]  ;;  %v938_v25 = vld [vmem:[%s5778_s6 + $0x198] sm:$0xff] }
 0x33e   :  { %v4276_v29 = vpop.eup %4275 }
 0x33f   :  { %v756_v31 = vadd.f32 1.0, %v4276_v29  ;;  %4285 = vrcp.f32 %v757_v26  ;;  %v3068_v26 = vld [vmem:[%s5778_s6 + $0x190] ss:$0 sm:$0xff] }
 0x341   :  { %4287 = vrcp.f32 %v756_v31 }
 0x344   :  { %v4278_v63 = vpop.eup %4277 }
 0x345   :  { %v759_v33 = vadd.f32 1.0, %v4278_v63 }
 0x346   :  { %v4280_v35 = vpop.eup %4279 }
 0x347   :  { %v758_v37 = vadd.f32 1.0, %v4280_v35  ;;  %4289 = vrcp.f32 %v759_v33 }
 0x348   :  { %v4282_v38 = vpop.eup %4281 }
 0x349   :  { %4291 = vrcp.f32 %v758_v37  ;;  %v761_v39 = vadd.f32 1.0, %v4282_v38 }
 0x34a   :  { %v4284_v40 = vpop.eup %4283 }
 0x34b   :  { %v760_v41 = vadd.f32 1.0, %v4284_v40  ;;  %4293 = vrcp.f32 %v761_v39 }
 0x34c   :  { %v4286_v14 = vpop.eup %4285 }
 0x34d   :  { %4295 = vrcp.f32 %v760_v41  ;;  %v775_v44 = vmul.f32 %v4286_v14, %v733_v30  ;;  %v952_v30 = vld [vmem:[%s5778_s6 + $0x208] sm:$0xff] }
 0x34e   :  { %v4288_v42 = vpop.eup %4287  ;;  %3758 = vmatprep.subr.mxu1 %v952_v30 }
 0x34f   :  { %v774_v43 = vmul.f32 %v4288_v42, %v732_v34  ;;  %3759 = vmatpush3.msra.mxu1 %v952_v30  ;;  %v951_v34 = vld [vmem:[%s5778_s6 + $0x200] sm:$0xff] }
 0x350   :  { %3760 = vmatprep.subr.mxu1 %v951_v34 }
 0x351   :  { %3747 = vmatprep.mubr.f32.mxu0 %v774_v43  ;;  %3761 = vmatpush3.msra.mxu1 %v951_v34 }
 0x352   :  { %3748 = vmatmul.mubr.f32.vlgmr.msra.gmra.mxu0 %v775_v44 }
 0x354   :  { %v4290_v45 = vpop.eup %4289 }
 0x355   :  { %v777_v50 = vmul.f32 %v4290_v45, %v735_v52  ;;  %v950_v52 = vld [vmem:[%s5778_s6 + $0x1f8] sm:$0xff] }
 0x356   :  { %v4292_v46 = vpop.eup %4291  ;;  %3762 = vmatprep.subr.mxu1 %v950_v52 }
 0x357   :  { %v776_v48 = vmul.f32 %v4292_v46, %v734_v61  ;;  %3763 = vmatpush3.msra.mxu1 %v950_v52  ;;  %v947_v61 = vld [vmem:[%s5778_s6 + $0x1e0] sm:$0xff] }
 0x358   :  { %v4294_v51 = vpop.eup %4293  ;;  %3764 = vmatprep.subr.mxu1 %v949_v58 }
 0x359   :  { %3750 = vmatprep.mubr.f32.mxu0 %v776_v48  ;;  %v779_v55 = vmul.f32 %v4294_v51, %v737_v12  ;;  %3765 = vmatpush3.msra.mxu1 %v949_v58  ;;  %v943_v12 = vld [vmem:[%s5778_s6 + $0x1c0] sm:$0xff] }
 0x35a   :  { %v4296_v53 = vpop.eup %4295  ;;  %3751 = vmatmul.mubr.f32.gmra.mxu0 %v777_v50  ;;  %3766 = vmatprep.subr.mxu1 %v948_v59 }
 0x35b   :  { %v778_v54 = vmul.f32 %v4296_v53, %v736_v19  ;;  %3767 = vmatpush3.msra.mxu1 %v948_v59  ;;  %v940_v19 = vld [vmem:[%s5778_s6 + $0x1a8] sm:$0xff] }
 0x35c   :  { %3768 = vmatprep.subr.mxu1 %v947_v61 }
 0x35d   :  { %3753 = vmatprep.mubr.f32.mxu0 %v778_v54  ;;  %3769 = vmatpush3.msra.mxu1 %v947_v61 }
 0x35e   :  { %3754 = vmatmul.mubr.f32.gmra.mxu0 %v779_v55  ;;  %3770 = vmatprep.subr.mxu1 %v946_v1 }
 0x35f   :  { %3771 = vmatpush3.msra.mxu1 %v946_v1 }
 0x360   :  { %3772 = vmatprep.subr.mxu1 %v945_v4 }
 0x361   :  { %3773 = vmatpush3.msra.mxu1 %v945_v4 }
 0x362   :  { %3774 = vmatprep.subr.mxu1 %v944_v11 }
 0x363   :  { %3775 = vmatpush3.msra.mxu1 %v944_v11 }
 0x364   :  { %3776 = vmatprep.subr.mxu1 %v943_v12 }
 0x365   :  { %3777 = vmatpush3.msra.mxu1 %v943_v12 }
 0x366   :  { %3778 = vmatprep.subr.mxu1 %v942_v62 }
 0x367   :  { %3779 = vmatpush3.msra.mxu1 %v942_v62 }
 0x368   :  { %3780 = vmatprep.subr.mxu1 %v941_v18 }
 0x369   :  { %3781 = vmatpush3.msra.mxu1 %v941_v18 }
 0x36a   :  { %3782 = vmatprep.subr.mxu1 %v940_v19 }
 0x36b   :  { %3783 = vmatpush3.msra.mxu1 %v940_v19 }
 0x36c   :  { %3784 = vmatprep.subr.mxu1 %v939_v23 }
 0x36d   :  { %3785 = vmatpush3.msra.mxu1 %v939_v23 }
 0x36e   :  { %3786 = vmatprep.subr.mxu1 %v938_v25 }
 0x36f   :  { %3787 = vmatpush3.msra.mxu1 %v938_v25 }
 0x412   :  { %v3749_v29 = vpop.f32.mrf.mxu0 }
 0x413   :  { %v873_v31 = vadd.f32 %v3749_v29, %v3068_v26 }
 0x414   :  { %v867_v63 = vpop.f32.mrf.mxu0 }
 0x415   :  { %v3070_v33 = vmul.f32 -1.442695, %v873_v31  ;;  %v868_v35 = vadd.f32 %v3068_v26, %v867_v63 }
 0x417   :  { %4297 = vpow2.f32 %v3070_v33  ;;  %v3069_v37 = vmul.f32 -1.442695, %v868_v35 }
 0x419   :  { %4299 = vpow2.f32 %v3069_v37  ;;  %v1109_v37 = vld [vmem:[%s5778_s6 + $0x288] sm:$0xff] }
 0x41a   :  { %v3752_v38 = vpop.f32.mrf.mxu0 }
 0x41b   :  { %v883_v39 = vadd.f32 %v3752_v38, %v3068_v26  ;;  %v1108_v38 = vld [vmem:[%s5778_s6 + $0x280] sm:$0xff] }
 0x41c   :  { %v877_v40 = vpop.f32.mrf.mxu0 }
 0x41d   :  { %v3072_v41 = vmul.f32 -1.442695, %v883_v39  ;;  %v878_v14 = vadd.f32 %v3068_v26, %v877_v40  ;;  %v1106_v40 = vld [vmem:[%s5778_s6 + $0x270] sm:$0xff] }
 0x41e   :  { %v3755_v42 = vpop.f32.mrf.mxu0 }
 0x41f   :  { %4301 = vpow2.f32 %v3072_v41  ;;  %v3071_v43 = vmul.f32 -1.442695, %v878_v14  ;;  %v893_v44 = vadd.f32 %v3755_v42, %v3068_v26  ;;  %v1105_v41 = vld [vmem:[%s5778_s6 + $0x268] sm:$0xff]  ;;  %v1103_v42 = vld [vmem:[%s5778_s6 + $0x258] sm:$0xff] }
 0x420   :  { %v887_v45 = vpop.f32.mrf.mxu0 }
 0x421   :  { %4303 = vpow2.f32 %v3071_v43  ;;  %v3074_v46 = vmul.f32 -1.442695, %v893_v44  ;;  %v888_v48 = vadd.f32 %v3068_v26, %v887_v45  ;;  %v1102_v43 = vld [vmem:[%s5778_s6 + $0x250] sm:$0xff]  ;;  %v1100_v45 = vld [vmem:[%s5778_s6 + $0x240] sm:$0xff] }
 0x423   :  { %4305 = vpow2.f32 %v3074_v46  ;;  %v3073_v50 = vmul.f32 -1.442695, %v888_v48  ;;  %v1099_v46 = vld [vmem:[%s5778_s6 + $0x238] sm:$0xff] }
 0x424   :  { %v4298_v51 = vpop.eup %4297 }
 0x425   :  { %v915_v53 = vadd.f32 1.0, %v4298_v51  ;;  %4307 = vpow2.f32 %v3073_v50  ;;  %v1097_v50 = vld [vmem:[%s5778_s6 + $0x228] sm:$0xff]  ;;  %v1096_v51 = vld [vmem:[%s5778_s6 + $0x220] sm:$0xff] }
 0x426   :  { %v4300_v54 = vpop.eup %4299 }
 0x427   :  { %v914_v55 = vadd.f32 1.0, %v4300_v54  ;;  %4309 = vrcp.f32 %v915_v53  ;;  %v3075_v53 = vld [vmem:[%s5778_s6 + $0x218] ss:$0 sm:$0xff] }
 0x429   :  { %4311 = vrcp.f32 %v914_v55 }
 0x42c   :  { %v4302_v57 = vpop.eup %4301 }
 0x42d   :  { %v917_v30 = vadd.f32 1.0, %v4302_v57 }
 0x42e   :  { %v4304_v34 = vpop.eup %4303 }
 0x42f   :  { %v916_v52 = vadd.f32 1.0, %v4304_v34  ;;  %4313 = vrcp.f32 %v917_v30 }
 0x430   :  { %v4306_v58 = vpop.eup %4305 }
 0x431   :  { %4315 = vrcp.f32 %v916_v52  ;;  %v919_v59 = vadd.f32 1.0, %v4306_v58 }
 0x432   :  { %v4308_v61 = vpop.eup %4307 }
 0x433   :  { %4317 = vrcp.f32 %v919_v59  ;;  %v918_v1 = vadd.f32 1.0, %v4308_v61 }
 0x434   :  { %v4310_v4 = vpop.eup %4309 }
 0x435   :  { %4319 = vrcp.f32 %v918_v1  ;;  %v4965_v62 = vmul.f32 %v4310_v4, %v873_v31  ;;  %v1111_v31 = vld [vmem:[%s5778_s6 + $0x298] sm:$0xff] }
 0x436   :  { %v4312_v11 = vpop.eup %4311  ;;  %3797 = vmatprep.subr.mxu0 %v1111_v31 }
 0x437   :  { %v4963_v12 = vmul.f32 %v4312_v11, %v868_v35  ;;  %3798 = vmatpush3.msra.mxu0 %v1111_v31  ;;  %v1110_v35 = vld [vmem:[%s5778_s6 + $0x290] sm:$0xff] }
 0x438   :  { %3799 = vmatprep.subr.mxu0 %v1110_v35 }
 0x439   :  { %3788 = vmatprep.mubr.f32.mxu1 %v4963_v12  ;;  %3800 = vmatpush3.msra.mxu0 %v1110_v35 }
 0x43a   :  { %3789 = vmatmul.mubr.f32.vlgmr.msra.gmra.mxu1 %v4965_v62  ;;  %3801 = vmatprep.subr.mxu0 %v1109_v37 }
 0x43b   :  { %3802 = vmatpush3.msra.mxu0 %v1109_v37 }
 0x43c   :  { %v4314_v18 = vpop.eup %4313  ;;  %3803 = vmatprep.subr.mxu0 %v1108_v38 }
 0x43d   :  { %v4971_v26 = vmul.f32 %v4314_v18, %v883_v39  ;;  %3804 = vmatpush3.msra.mxu0 %v1108_v38  ;;  %v1107_v39 = vld [vmem:[%s5778_s6 + $0x278] sm:$0xff] }
 0x43e   :  { %v4316_v19 = vpop.eup %4315  ;;  %3805 = vmatprep.subr.mxu0 %v1107_v39 }
 0x43f   :  { %v4969_v23 = vmul.f32 %v4316_v19, %v878_v14  ;;  %3806 = vmatpush3.msra.mxu0 %v1107_v39  ;;  %v1104_v14 = vld [vmem:[%s5778_s6 + $0x260] sm:$0xff] }
 0x440   :  { %v4318_v25 = vpop.eup %4317  ;;  %3807 = vmatprep.subr.mxu0 %v1106_v40 }
 0x441   :  { %v937_v29 = vmul.f32 %v4318_v25, %v893_v44  ;;  %3791 = vmatprep.mubr.f32.mxu1 %v4969_v23  ;;  %3808 = vmatpush3.msra.mxu0 %v1106_v40  ;;  %v1101_v44 = vld [vmem:[%s5778_s6 + $0x248] sm:$0xff] }
 0x442   :  { %v4320_v63 = vpop.eup %4319  ;;  %3792 = vmatmul.mubr.f32.gmra.mxu1 %v4971_v26  ;;  %3809 = vmatprep.subr.mxu0 %v1105_v41 }
 0x443   :  { %v4975_v33 = vmul.f32 %v4320_v63, %v888_v48  ;;  %1303 = vmatprep.subr.mxu1 %v937_v29  ;;  %3810 = vmatpush3.msra.mxu0 %v1105_v41  ;;  %v1098_v48 = vld [vmem:[%s5778_s6 + $0x230] sm:$0xff] }
 0x444   :  { %3811 = vmatprep.subr.mxu0 %v1104_v14 }
 0x445   :  { %3794 = vmatprep.mubr.f32.mxu1 %v4975_v33  ;;  %3812 = vmatpush3.msra.mxu0 %v1104_v14 }
 0x446   :  { %3795 = vmatmul.mubr.f32.gmra.mxu1 %v937_v29  ;;  %3813 = vmatprep.subr.mxu0 %v1103_v42 }
 0x447   :  { %1347 = vmatprep.mubr.f32.mxu1 %v4510_v16  ;;  %3814 = vmatpush3.msra.mxu0 %v1103_v42 }
 0x448   :  { %3815 = vmatprep.subr.mxu0 %v1102_v43 }
 0x449   :  { %3816 = vmatpush3.msra.mxu0 %v1102_v43 }
 0x44a   :  { %3817 = vmatprep.subr.mxu0 %v1101_v44 }
 0x44b   :  { %3818 = vmatpush3.msra.mxu0 %v1101_v44 }
 0x44c   :  { %3819 = vmatprep.subr.mxu0 %v1100_v45 }
 0x44d   :  { %3820 = vmatpush3.msra.mxu0 %v1100_v45 }
 0x44e   :  { %3821 = vmatprep.subr.mxu0 %v1099_v46 }
 0x44f   :  { %3822 = vmatpush3.msra.mxu0 %v1099_v46 }
 0x450   :  { %3823 = vmatprep.subr.mxu0 %v1098_v48 }
 0x451   :  { %3824 = vmatpush3.msra.mxu0 %v1098_v48 }
 0x452   :  { %3825 = vmatprep.subr.mxu0 %v1097_v50 }
 0x453   :  { %3826 = vmatpush3.msra.mxu0 %v1097_v50 }
 0x454   :  { %3827 = vmatprep.subr.mxu0 %v1096_v51 }
 0x455   :  { %3828 = vmatpush3.msra.mxu0 %v1096_v51 }
 0x4fa   :  { %v3790_v54 = vpop.f32.mrf.mxu1 }
 0x4fb   :  { %v1031_v55 = vadd.f32 %v3790_v54, %v3075_v53 }
 0x4fc   :  { %v1025_v57 = vpop.f32.mrf.mxu1 }
 0x4fd   :  { %v3077_v30 = vmul.f32 -1.442695, %v1031_v55  ;;  %v1026_v34 = vadd.f32 %v3075_v53, %v1025_v57 }
 0x4ff   :  { %4321 = vpow2.f32 %v3077_v30  ;;  %v3076_v52 = vmul.f32 -1.442695, %v1026_v34 }
 0x501   :  { %4323 = vpow2.f32 %v3076_v52 }
 0x502   :  { %v3793_v58 = vpop.f32.mrf.mxu1 }
 0x503   :  { %v1041_v59 = vadd.f32 %v3793_v58, %v3075_v53 }
 0x504   :  { %v1035_v61 = vpop.f32.mrf.mxu1 }
 0x505   :  { %v3079_v1 = vmul.f32 -1.442695, %v1041_v59  ;;  %v1036_v4 = vadd.f32 %v3075_v53, %v1035_v61 }
 0x506   :  { %v3796_v11 = vpop.f32.mrf.mxu1 }
 0x507   :  { %4325 = vpow2.f32 %v3079_v1  ;;  %v3078_v18 = vmul.f32 -1.442695, %v1036_v4  ;;  %v1051_v19 = vadd.f32 %v3796_v11, %v3075_v53 }
 0x508   :  { %v1045_v25 = vpop.f32.mrf.mxu1 }
 0x509   :  { %4327 = vpow2.f32 %v3078_v18  ;;  %v3081_v29 = vmul.f32 -1.442695, %v1051_v19  ;;  %v1046_v63 = vadd.f32 %v3075_v53, %v1045_v25  ;;  %v5033_v18 = vld [vmem:[%s5774_s2] sm:$0xff] }
 0x50b   :  { %4329 = vpow2.f32 %v3081_v29  ;;  %v3080_v31 = vmul.f32 -1.442695, %v1046_v63 }
 0x50c   :  { %v4322_v35 = vpop.eup %4321 }
 0x50d   :  { %v1073_v37 = vadd.f32 1.0, %v4322_v35  ;;  %4331 = vpow2.f32 %v3080_v31 }
 0x50e   :  { %v4324_v38 = vpop.eup %4323 }
 0x50f   :  { %v1072_v39 = vadd.f32 1.0, %v4324_v38  ;;  %4333 = vrcp.f32 %v1073_v37 }
 0x511   :  { %4335 = vrcp.f32 %v1072_v39 }
 0x514   :  { %v4326_v40 = vpop.eup %4325 }
 0x515   :  { %v1075_v41 = vadd.f32 1.0, %v4326_v40 }
 0x516   :  { %v4328_v14 = vpop.eup %4327 }
 0x517   :  { %v1074_v42 = vadd.f32 1.0, %v4328_v14  ;;  %4337 = vrcp.f32 %v1075_v41 }
 0x518   :  { %v4330_v43 = vpop.eup %4329 }
 0x519   :  { %4339 = vrcp.f32 %v1074_v42  ;;  %v1077_v44 = vadd.f32 1.0, %v4330_v43 }
 0x51a   :  { %v4332_v45 = vpop.eup %4331 }
 0x51b   :  { %v1076_v46 = vadd.f32 1.0, %v4332_v45  ;;  %4341 = vrcp.f32 %v1077_v44 }
 0x51c   :  { %v4334_v48 = vpop.eup %4333 }
 0x51d   :  { %4343 = vrcp.f32 %v1076_v46  ;;  %v1091_v53 = vmul.f32 %v4334_v48, %v1031_v55 }
 0x51e   :  { %v4336_v50 = vpop.eup %4335 }
 0x51f   :  { %v1090_v51 = vmul.f32 %v4336_v50, %v1026_v34 }
 0x521   :  { %3829 = vmatprep.mubr.f32.mxu0 %v1090_v51 }
 0x522   :  { %3830 = vmatmul.mubr.f32.vlgmr.msra.gmra.mxu0 %v1091_v53 }
 0x524   :  { %v4338_v54 = vpop.eup %4337 }
 0x525   :  { %v1093_v52 = vmul.f32 %v4338_v54, %v1041_v59  ;;  %v3082_v59 = vld [vmem:[%s5778_s6 + $0x2a0] ss:$0 sm:$0xff] }
 0x526   :  { %v4340_v57 = vpop.eup %4339 }
 0x527   :  { %v1092_v30 = vmul.f32 %v4340_v57, %v1036_v4 }
 0x528   :  { %v4342_v58 = vpop.eup %4341 }
 0x529   :  { %3832 = vmatprep.mubr.f32.mxu0 %v1092_v30  ;;  %v1095_v11 = vmul.f32 %v4342_v58, %v1051_v19 }
 0x52a   :  { %v4344_v61 = vpop.eup %4343  ;;  %3833 = vmatmul.mubr.f32.gmra.mxu0 %v1093_v52 }
 0x52b   :  { %v1094_v1 = vmul.f32 %v4344_v61, %v1046_v63 }
 0x52d   :  { %3835 = vmatprep.mubr.f32.mxu0 %v1094_v1 }
 0x52e   :  { %3836 = vmatmul.mubr.f32.gmra.mxu0 %v1095_v11 }
 0x52f   :  { %3905 = vmatprep.mubr.msk.f32.mxu0 %vm79_vm7, %v5033_v18 }
 0x5e2   :  { %v3831_v55 = vpop.f32.mrf.mxu0 }
 0x5e3   :  { %v1189_v35 = vadd.f32 %v3831_v55, %v3082_v59 }
 0x5e4   :  { %v1183_v34 = vpop.f32.mrf.mxu0 }
 0x5e5   :  { %v3084_v14 = vmul.f32 -1.442695, %v1189_v35  ;;  %v1184_v42 = vadd.f32 %v3082_v59, %v1183_v34  ;;  %v3089_v34 = vld [vmem:[%s5778_s6 + $0x2a8] ss:$0 sm:$0xff] }
 0x5e7   :  { %v3083_v44 = vmul.f32 -1.442695, %v1184_v42 }
 0x5ea   :  { %v3834_v4 = vpop.f32.mrf.mxu0 }
 0x5eb   :  { %v1199_v25 = vadd.f32 %v3834_v4, %v3082_v59 }
 0x5ec   :  { %v1193_v29 = vpop.f32.mrf.mxu0 }
 0x5ed   :  { %v3086_v19 = vmul.f32 -1.442695, %v1199_v25  ;;  %v1194_v63 = vadd.f32 %v3082_v59, %v1193_v29 }
 0x5ee   :  { %v3837_v31 = vpop.f32.mrf.mxu0 }
 0x5ef   :  { %4345 = vpow2.f32 %v3086_v19  ;;  %v3085_v37 = vmul.f32 -1.442695, %v1194_v63  ;;  %v1209_v38 = vadd.f32 %v3837_v31, %v3082_v59 }
 0x5f0   :  { %v1203_v39 = vpop.f32.mrf.mxu0 }
 0x5f1   :  { %4347 = vpow2.f32 %v3085_v37  ;;  %v3088_v40 = vmul.f32 -1.442695, %v1209_v38  ;;  %v1204_v41 = vadd.f32 %v3082_v59, %v1203_v39 }
 0x5f3   :  { %4349 = vpow2.f32 %v3088_v40  ;;  %v3087_v43 = vmul.f32 -1.442695, %v1204_v41 }
 0x5f5   :  { %4351 = vpow2.f32 %v3087_v43 }
 0x5f6   :  { %4353 = vpow2.f32 %v3084_v14 }
 0x5f7   :  { %4355 = vpow2.f32 %v3083_v44 }
 0x5fc   :  { %v4346_v45 = vpop.eup %4345 }
 0x5fd   :  { %v1233_v46 = vadd.f32 1.0, %v4346_v45 }
 0x5fe   :  { %v4348_v48 = vpop.eup %4347 }
 0x5ff   :  { %4357 = vrcp.f32 %v1233_v46  ;;  %v1232_v50 = vadd.f32 1.0, %v4348_v48 }
 0x600   :  { %v4350_v51 = vpop.eup %4349 }
 0x601   :  { %4359 = vrcp.f32 %v1232_v50  ;;  %v1235_v53 = vadd.f32 1.0, %v4350_v51  ;;  %v1374_v50 = vld [vmem:[%s5778_s6 + $0x300] sm:$0xff]  ;;  %v1373_v51 = vld [vmem:[%s5778_s6 + $0x2f8] sm:$0xff] }
 0x602   :  { %v4352_v54 = vpop.eup %4351 }
 0x603   :  { %4361 = vrcp.f32 %v1235_v53  ;;  %v1234_v57 = vadd.f32 1.0, %v4352_v54  ;;  %v4354_v30 = vpop.eup %4353  ;;  %v1372_v53 = vld [vmem:[%s5778_s6 + $0x2f0] sm:$0xff]  ;;  %v1371_v54 = vld [vmem:[%s5778_s6 + $0x2e8] sm:$0xff] }
 0x604   :  { %v1231_v52 = vadd.f32 1.0, %v4354_v30  ;;  %v4356_v58 = vpop.eup %4355  ;;  %v1369_v30 = vld [vmem:[%s5778_s6 + $0x2d8] sm:$0xff] }
 0x605   :  { %4363 = vrcp.f32 %v1234_v57  ;;  %v1230_v61 = vadd.f32 1.0, %v4356_v58  ;;  %v1370_v57 = vld [vmem:[%s5778_s6 + $0x2e0] sm:$0xff]  ;;  %v1367_v58 = vld [vmem:[%s5778_s6 + $0x2c8] sm:$0xff] }
 0x606   :  { %4365 = vrcp.f32 %v1231_v52  ;;  %v1368_v52 = vld [vmem:[%s5778_s6 + $0x2d0] sm:$0xff] }
 0x607   :  { %4367 = vrcp.f32 %v1230_v61  ;;  %v1366_v61 = vld [vmem:[%s5778_s6 + $0x2c0] sm:$0xff] }
 0x60c   :  { %v4358_v1 = vpop.eup %4357 }
 0x60d   :  { %v1251_v11 = vmul.f32 %v4358_v1, %v1199_v25 }
 0x60e   :  { %v4360_v55 = vpop.eup %4359 }
 0x60f   :  { %v1250_v59 = vmul.f32 %v4360_v55, %v1194_v63  ;;  %v1262_v4 = vmul.f32 %v3089_v34, %v1251_v11  ;;  %v1379_v63 = vld [vmem:[%s5778_s6 + $0x328] sm:$0xff] }
 0x610   :  { %v4362_v29 = vpop.eup %4361  ;;  %3873 = vmatprep.subr.mxu0 %v1379_v63 }
 0x611   :  { %1271 = vadd.xlane.f32.xlu0 %v1262_v4  ;;  %v1253_v19 = vmul.f32 %v4362_v29, %v1209_v38  ;;  %v1261_v31 = vmul.f32 %v3089_v34, %v1250_v59  ;;  %v1378_v38 = vld [vmem:[%s5778_s6 + $0x320] sm:$0xff]  ;;  %3874 = vmatpush3.msra.mxu0 %v1379_v63  ;;  %v5158_v63 = vld [vmem:[%s5774_s2 + $0x8] sm:$0xff] }
 0x612   :  { %v4364_v37 = vpop.eup %4363  ;;  %3875 = vmatprep.subr.mxu0 %v1378_v38 }
 0x613   :  { %v1252_v39 = vmul.f32 %v4364_v37, %v1204_v41  ;;  %v1264_v40 = vmul.f32 %v3089_v34, %v1253_v19  ;;  %v4366_v14 = vpop.eup %4365  ;;  %3876 = vmatpush3.msra.mxu0 %v1378_v38  ;;  %v1376_v41 = vld [vmem:[%s5778_s6 + $0x310] sm:$0xff] }
 0x614   :  { %v1249_v43 = vmul.f32 %v4366_v14, %v1189_v35  ;;  %v4368_v44 = vpop.eup %4367  ;;  %v1377_v35 = vld [vmem:[%s5778_s6 + $0x318] sm:$0xff]  ;;  %v1384_v14 = vld [vmem:[%s5778_s6 + $0x350] sm:$0xff] }
 0x615   :  { %1269 = vadd.xlane.f32.xlu0 %v1261_v31  ;;  %v1263_v25 = vmul.f32 %v3089_v34, %v1252_v39  ;;  %v1248_v45 = vmul.f32 %v4368_v44, %v1184_v42  ;;  %3877 = vmatprep.subr.mxu0 %v1377_v35  ;;  %v1375_v42 = vld [vmem:[%s5778_s6 + $0x308] sm:$0xff]  ;;  %v1386_v39 = vld [vmem:[%s5778_s6 + $0x360] sm:$0xff]  ;;  %v1365_v44 = vld [vmem:[%s5778_s6 + $0x2b8] sm:$0xff] }
 0x616   :  { %v1260_v46 = vmul.f32 %v3089_v34, %v1249_v43  ;;  %3878 = vmatpush3.msra.mxu0 %v1377_v35  ;;  %v1383_v43 = vld [vmem:[%s5778_s6 + $0x348] sm:$0xff]  ;;  %v1582_v38 = vld [vmem:[%s5778_s6 + $0x430] sm:$0xff]  ;;  %v285_v35 = vmax.f32 %v4836_v15, 1.0  ;;  %v1580_v15 = vld [vmem:[%s5778_s6 + $0x420] sm:$0xff] }
 0x617   :  { %v1259_v48 = vmul.f32 %v3089_v34, %v1248_v45  ;;  %3879 = vmatprep.subr.mxu0 %v1376_v41  ;;  %v1381_v45 = vld [vmem:[%s5778_s6 + $0x338] sm:$0xff] }
 0x618   :  { %3880 = vmatpush3.msra.mxu0 %v1376_v41  ;;  %4369 = vrcp.f32 %v285_v35 }
 0x619   :  { %1275 = vadd.xlane.f32.xlu0 %v1264_v40  ;;  %3881 = vmatprep.subr.mxu0 %v1375_v42  ;;  %v1385_v40 = vld [vmem:[%s5778_s6 + $0x358] sm:$0xff] }
 0x61a   :  { %3882 = vmatpush3.msra.mxu0 %v1375_v42 }
 0x61b   :  { %3883 = vmatprep.subr.mxu0 %v1374_v50 }
 0x61c   :  { %3884 = vmatpush3.msra.mxu0 %v1374_v50 }
 0x61d   :  { %1273 = vadd.xlane.f32.xlu0 %v1263_v25  ;;  %3885 = vmatprep.subr.mxu0 %v1373_v51  ;;  %v1382_v25 = vld [vmem:[%s5778_s6 + $0x340] sm:$0xff] }
 0x61e   :  { %3886 = vmatpush3.msra.mxu0 %v1373_v51 }
 0x61f   :  { %3887 = vmatprep.subr.mxu0 %v1372_v53 }
 0x620   :  { %3888 = vmatpush3.msra.mxu0 %v1372_v53 }
 0x621   :  { %1267 = vadd.xlane.f32.xlu0 %v1260_v46  ;;  %3889 = vmatprep.subr.mxu0 %v1371_v54  ;;  %v1364_v46 = vld [vmem:[%s5778_s6 + $0x2b0] sm:$0xff] }
 0x622   :  { %3890 = vmatpush3.msra.mxu0 %v1371_v54  ;;  %v83_v54 = vsel %vm31_vm0, %v4645_v56, 0.0  ;;  %v1579_v56 = vld [vmem:[%s5778_s6 + $0x418] sm:$0xff] }
 0x623   :  { %3891 = vmatprep.subr.mxu0 %v1370_v57 }
 0x624   :  { %3892 = vmatpush3.msra.mxu0 %v1370_v57 }
 0x625   :  { %1265 = vadd.xlane.f32.xlu0 %v1259_v48  ;;  %3893 = vmatprep.subr.mxu0 %v1369_v30  ;;  %v1380_v48 = vld [vmem:[%s5778_s6 + $0x330] sm:$0xff]  ;;  %v5169_v50 = vpop.eup %4369 }
 0x626   :  { %3894 = vmatpush3.msra.mxu0 %v1369_v30  ;;  %v1581_v30 = vld [vmem:[%s5778_s6 + $0x428] sm:$0xff] }
 0x627   :  { %3895 = vmatprep.subr.mxu0 %v1368_v52 }
 0x628   :  { %3896 = vmatpush3.msra.mxu0 %v1368_v52 }
 0x629   :  { %3897 = vmatprep.subr.mxu0 %v1367_v58 }
 0x62a   :  { %3898 = vmatpush3.msra.mxu0 %v1367_v58  ;;  %v1578_v58 = vld [vmem:[%s5778_s6 + $0x410] sm:$0xff] }
 0x62b   :  { %3899 = vmatprep.subr.mxu0 %v1366_v61 }
 0x62c   :  { %3900 = vmatpush3.msra.mxu0 %v1366_v61  ;;  %v1577_v61 = vld [vmem:[%s5778_s6 + $0x408] sm:$0xff] }
 0x62d   :  { %3901 = vmatprep.subr.mxu0 %v1365_v44 }
 0x62e   :  { %3902 = vmatpush3.msra.mxu0 %v1365_v44 }
 0x62f   :  { %3903 = vmatprep.subr.mxu0 %v1364_v46 }
 0x630   :  { %3904 = vmatpush3.msra.mxu0 %v1364_v46 }
 0x631   :  { %3906 = vmatmul.mubr.msk.f32.vlgmr.msra.gmra.mxu0 %vm79_vm7, %v5158_v63 }
 0x632   :  { %1729 = vmatprep.mubr.f32.mxu0 %v4510_v16 }
 0x69a   :  { %v1272_v1 = vpop.xlane.xlu0 %1271 }
 0x69b   :  { %v1280_v29 = vmul.f32 %v1272_v1, %v4852_v36  ;;  %v1391_v36 = vld [vmem:[%s5778_s6 + $0x388] sm:$0xff]  ;;  %v1576_v1 = vld [vmem:[%s5778_s6 + $0x400] sm:$0xff] }
 0x69e   :  { %v1270_v11 = vpop.xlane.xlu0 %1269 }
 0x69f   :  { %v1279_v31 = vmul.f32 %v1270_v11, %v4848_v32  ;;  %v1394_v32 = vld [vmem:[%s5778_s6 + $0x3a0] sm:$0xff]  ;;  %v1575_v11 = vld [vmem:[%s5778_s6 + $0x3f8] sm:$0xff] }
 0x6a2   :  { %v1276_v55 = vpop.xlane.xlu0 %1275 }
 0x6a3   :  { %v1282_v34 = vmul.f32 %v1276_v55, %v4832_v13  ;;  %v1574_v55 = vld [vmem:[%s5778_s6 + $0x3f0] sm:$0xff] }
 0x6a5   :  { %1304 = vmatpush1.msra.mxu1 %v1282_v34  ;;  %v1573_v34 = vld [vmem:[%s5778_s6 + $0x3e8] sm:$0xff] }
 0x6a6   :  { %1305 = vmatprep.subr.mxu1 %v4975_v33  ;;  %v1274_v59 = vpop.xlane.xlu0 %1273 }
 0x6a7   :  { %v1281_v4 = vmul.f32 %v1274_v59, %v4830_v6  ;;  %v1395_v6 = vld [vmem:[%s5778_s6 + $0x3a8] sm:$0xff]  ;;  %v1572_v59 = vld [vmem:[%s5778_s6 + $0x3e0] sm:$0xff] }
 0x6a9   :  { %1306 = vmatpush1.msra.mxu1 %v1281_v4  ;;  %v1571_v4 = vld [vmem:[%s5778_s6 + $0x3d8] sm:$0xff] }
 0x6aa   :  { %1307 = vmatprep.subr.mxu1 %v4971_v26  ;;  %v1268_v19 = vpop.xlane.xlu0 %1267  ;;  %v1387_v26 = vld [vmem:[%s5778_s6 + $0x368] sm:$0xff] }
 0x6ab   :  { %1308 = vmatpush1.msra.mxu1 %v1280_v29  ;;  %v1278_v37 = vmul.f32 %v1268_v19, %v4844_v28  ;;  %v1392_v28 = vld [vmem:[%s5778_s6 + $0x390] sm:$0xff]  ;;  %v1569_v19 = vld [vmem:[%s5778_s6 + $0x3c8] sm:$0xff] }
 0x6ac   :  { %1309 = vmatprep.subr.mxu1 %v4969_v23  ;;  %v1388_v23 = vld [vmem:[%s5778_s6 + $0x370] sm:$0xff] }
 0x6ad   :  { %1310 = vmatpush1.msra.mxu1 %v1279_v31  ;;  %v1570_v29 = vld [vmem:[%s5778_s6 + $0x3d0] sm:$0xff]  ;;  %v1568_v31 = vld [vmem:[%s5778_s6 + $0x3c0] sm:$0xff] }
 0x6ae   :  { %1311 = vmatprep.subr.mxu1 %v4965_v62  ;;  %v1266_v13 = vpop.xlane.xlu0 %1265  ;;  %v1389_v62 = vld [vmem:[%s5778_s6 + $0x378] sm:$0xff] }
 0x6af   :  { %v1277_v33 = vmul.f32 %v1266_v13, %v4840_v21  ;;  %1312 = vmatpush1.msra.mxu1 %v1278_v37  ;;  %v1393_v21 = vld [vmem:[%s5778_s6 + $0x398] sm:$0xff] }
 0x6b0   :  { %1313 = vmatprep.subr.mxu1 %v4963_v12  ;;  %v1390_v12 = vld [vmem:[%s5778_s6 + $0x380] sm:$0xff]  ;;  %v1567_v37 = vld [vmem:[%s5778_s6 + $0x3b8] sm:$0xff] }
 0x6b1   :  { %1314 = vmatpush1.msra.mxu1 %v1277_v33 }
 0x6b2   :  { %3090 = vmatmul.mubr.msk.f32.vlgmr.msra.gmra.mxu1 %vm202_vm15, %v4710_v9  ;;  %3838 = vmatprep.subr.mxu1 %v1395_v6 }
 0x6b3   :  { %1353 = vmatprep.mubr.f32.mxu1 %v4510_v16  ;;  %3839 = vmatpush3.msra.mxu1 %v1395_v6  ;;  %v3094_v6 = vld [vmem:[%s5778_s6 + $0x3b0] ss:$0 sm:$0xff] }
 0x6b4   :  { %3840 = vmatprep.subr.mxu1 %v1394_v32 }
 0x6b5   :  { %3841 = vmatpush3.msra.mxu1 %v1394_v32 }
 0x6b6   :  { %3091 = vmatmul.mubr.msk.f32.gmra.mxu1 %vm202_vm15, %v4714_v10  ;;  %3842 = vmatprep.subr.mxu1 %v1393_v21 }
 0x6b7   :  { %3843 = vmatpush3.msra.mxu1 %v1393_v21 }
 0x6b8   :  { %3844 = vmatprep.subr.mxu1 %v1392_v28 }
 0x6b9   :  { %3845 = vmatpush3.msra.mxu1 %v1392_v28 }
 0x6ba   :  { %3846 = vmatprep.subr.mxu1 %v1391_v36 }
 0x6bb   :  { %3847 = vmatpush3.msra.mxu1 %v1391_v36 }
 0x6bc   :  { %3848 = vmatprep.subr.mxu1 %v1390_v12 }
 0x6bd   :  { %3849 = vmatpush3.msra.mxu1 %v1390_v12 }
 0x6be   :  { %3850 = vmatprep.subr.mxu1 %v1389_v62 }
 0x6bf   :  { %3851 = vmatpush3.msra.mxu1 %v1389_v62 }
 0x6c0   :  { %3852 = vmatprep.subr.mxu1 %v1388_v23 }
 0x6c1   :  { %3853 = vmatpush3.msra.mxu1 %v1388_v23 }
 0x6c2   :  { %3854 = vmatprep.subr.mxu1 %v1387_v26 }
 0x6c3   :  { %3855 = vmatpush3.msra.mxu1 %v1387_v26 }
 0x6c4   :  { %3856 = vmatprep.subr.mxu1 %v1386_v39 }
 0x6c5   :  { %3857 = vmatpush3.msra.mxu1 %v1386_v39 }
 0x6c6   :  { %3858 = vmatprep.subr.mxu1 %v1385_v40 }
 0x6c7   :  { %3859 = vmatpush3.msra.mxu1 %v1385_v40 }
 0x6c8   :  { %3860 = vmatprep.subr.mxu1 %v1384_v14 }
 0x6c9   :  { %3861 = vmatpush3.msra.mxu1 %v1384_v14 }
 0x6ca   :  { %3862 = vmatprep.subr.mxu1 %v1383_v43 }
 0x6cb   :  { %3863 = vmatpush3.msra.mxu1 %v1383_v43 }
 0x6cc   :  { %3864 = vmatprep.subr.mxu1 %v1382_v25 }
 0x6cd   :  { %3865 = vmatpush3.msra.mxu1 %v1382_v25 }
 0x6ce   :  { %3866 = vmatprep.subr.mxu1 %v1381_v45 }
 0x6cf   :  { %3867 = vmatpush3.msra.mxu1 %v1381_v45 }
 0x6d0   :  { %3868 = vmatprep.subr.mxu1 %v1380_v48 }
 0x6d1   :  { %3869 = vmatpush3.msra.mxu1 %v1380_v48  ;;  %v284_v48 = vmax.f32 %v4838_v17, 1.0  ;;  %v82_v17 = vsel %vm31_vm0, %v4655_v60, 0.0  ;;  %v3125_v60 = vld [vmem:[%s5778_s6 + $0x4b8] sm:$0xff] }
 0x6d2   :  { %3908 = vmatprep.subr.mxu1 %v1582_v38 }
 0x6f1   :  { %v3907_v13 = vpop.f32.mrf.mxu0 }
 0x6f3   :  { %v1537_v21 = vpop.f32.mrf.mxu0 }
 0x772   :  { %v5167_v41 = vpop.f32.mrf.mxu1 }
 0x774   :  { %v1351_v42 = vpop.f32.mrf.mxu1 }
 0x775   :  { %3870 = vmatprep.mubr.f32.mxu1 %v1351_v42 }
 0x776   :  { %v1355_v51 = vpop.f32.mrf.mxu1 }
 0x777   :  { %v1361_v53 = vmul.f32 %v5169_v50, %v1355_v51  ;;  %v81_v51 = vsel %vm79_vm7, %v5158_v63, 0.0  ;;  %v3124_v63 = vld [vmem:[%s5778_s6 + $0x4b0] sm:$0xff] }
 0x778   :  { %v1357_v57 = vpop.f32.mrf.mxu1 }
 0x779   :  { %v5177_v52 = vadd.f32 %v1361_v53, %v83_v54  ;;  %3871 = vmatmul.mubr.f32.vlgmr.msra.gmra.mxu1 %v1357_v57  ;;  %v80_v57 = vsel %vm79_vm7, %v5033_v18, 0.0  ;;  %v3141_v18 = vld [vmem:[%s5778_s6 + $0x538] sm:$0xff] }
 0x77a   :  { %3909 = vmatpush3.msra.mxu1 %v1582_v38  ;;  %v3097_v38 = vld [vmem:[%s5778_s6 + $0x438] ss:$0 sm:$0xff] }
 0x77b   :  { %3910 = vmatprep.subr.mxu1 %v1581_v30  ;;  %1693 = vmatprep.subr.mxu0 %v5177_v52 }
 0x77c   :  { %3911 = vmatpush3.msra.mxu1 %v1581_v30 }
 0x77d   :  { %3912 = vmatprep.subr.mxu1 %v1580_v15 }
 0x77e   :  { %3913 = vmatpush3.msra.mxu1 %v1580_v15 }
 0x77f   :  { %3914 = vmatprep.subr.mxu1 %v1579_v56 }
 0x780   :  { %3915 = vmatpush3.msra.mxu1 %v1579_v56 }
 0x781   :  { %3916 = vmatprep.subr.mxu1 %v1578_v58 }
 0x782   :  { %3917 = vmatpush3.msra.mxu1 %v1578_v58 }
 0x783   :  { %3918 = vmatprep.subr.mxu1 %v1577_v61 }
 0x784   :  { %3919 = vmatpush3.msra.mxu1 %v1577_v61 }
 0x785   :  { %3920 = vmatprep.subr.mxu1 %v1576_v1 }
 0x786   :  { %3921 = vmatpush3.msra.mxu1 %v1576_v1  ;;  %v3112_v1 = vld [vmem:[%s5778_s6 + $0x450] sm:$0xff] }
 0x787   :  { %3922 = vmatprep.subr.mxu1 %v1575_v11 }
 0x788   :  { %3923 = vmatpush3.msra.mxu1 %v1575_v11  ;;  %v3139_v11 = vld [vmem:[%s5778_s6 + $0x528] sm:$0xff] }
 0x789   :  { %3924 = vmatprep.subr.mxu1 %v1574_v55 }
 0x78a   :  { %3925 = vmatpush3.msra.mxu1 %v1574_v55  ;;  %v3138_v55 = vld [vmem:[%s5778_s6 + $0x520] sm:$0xff] }
 0x78b   :  { %3926 = vmatprep.subr.mxu1 %v1573_v34 }
 0x78c   :  { %3927 = vmatpush3.msra.mxu1 %v1573_v34  ;;  %v3110_v34 = vld [vmem:[%s5778_s6 + $0x440] sm:$0xff] }
 0x78d   :  { %3928 = vmatprep.subr.mxu1 %v1572_v59 }
 0x78e   :  { %3929 = vmatpush3.msra.mxu1 %v1572_v59  ;;  %v3137_v59 = vld [vmem:[%s5778_s6 + $0x518] sm:$0xff] }
 0x78f   :  { %3930 = vmatprep.subr.mxu1 %v1571_v4 }
 0x790   :  { %3931 = vmatpush3.msra.mxu1 %v1571_v4  ;;  %v3136_v4 = vld [vmem:[%s5778_s6 + $0x510] sm:$0xff] }
 0x791   :  { %3932 = vmatprep.subr.mxu1 %v1570_v29 }
 0x792   :  { %3933 = vmatpush3.msra.mxu1 %v1570_v29  ;;  %v3135_v29 = vld [vmem:[%s5778_s6 + $0x508] sm:$0xff] }
 0x793   :  { %3934 = vmatprep.subr.mxu1 %v1569_v19 }
 0x794   :  { %3935 = vmatpush3.msra.mxu1 %v1569_v19  ;;  %v3134_v19 = vld [vmem:[%s5778_s6 + $0x500] sm:$0xff] }
 0x795   :  { %3936 = vmatprep.subr.mxu1 %v1568_v31 }
 0x796   :  { %3937 = vmatpush3.msra.mxu1 %v1568_v31  ;;  %v3133_v31 = vld [vmem:[%s5778_s6 + $0x4f8] sm:$0xff] }
 0x797   :  { %3938 = vmatprep.subr.mxu1 %v1567_v37 }
 0x798   :  { %3939 = vmatpush3.msra.mxu1 %v1567_v37  ;;  %v3132_v37 = vld [vmem:[%s5778_s6 + $0x4f0] sm:$0xff] }
 0x799   :  { %4257 = vmatprep.subr.mxu1 %v5177_v52 }
 0x839   :  { %v3872_v33 = vpop.f32.mrf.mxu1 }
 0x83a   :  { %v1543_v32 = vadd.f32 %v3907_v13, %v3872_v33  ;;  %v3131_v13 = vld [vmem:[%s5778_s6 + $0x4e8] sm:$0xff]  ;;  %v3130_v33 = vld [vmem:[%s5778_s6 + $0x4e0] sm:$0xff] }
 0x83b   :  { %v1462_v28 = vpop.f32.mrf.mxu1 }
 0x83c   :  { %v1552_v36 = vadd.f32 %v3094_v6, %v1543_v32  ;;  %v1538_v12 = vadd.f32 %v1537_v21, %v1462_v28  ;;  %v3128_v32 = vld [vmem:[%s5778_s6 + $0x4d0] sm:$0xff]  ;;  %v3127_v21 = vld [vmem:[%s5778_s6 + $0x4c8] sm:$0xff]  ;;  %v3126_v28 = vld [vmem:[%s5778_s6 + $0x4c0] sm:$0xff] }
 0x83e   :  { %v3096_v62 = vmul.f32 -1.442695, %v1552_v36  ;;  %v1551_v23 = vadd.f32 %v3094_v6, %v1538_v12  ;;  %v3129_v6 = vld [vmem:[%s5778_s6 + $0x4d8] sm:$0xff] }
 0x840   :  { %4371 = vpow2.f32 %v3096_v62  ;;  %v3095_v26 = vmul.f32 -1.442695, %v1551_v23 }
 0x842   :  { %4373 = vpow2.f32 %v3095_v26 }
 0x84d   :  { %v4372_v39 = vpop.eup %4371 }
 0x84e   :  { %v1560_v40 = vadd.f32 1.0, %v4372_v39 }
 0x84f   :  { %v4374_v14 = vpop.eup %4373 }
 0x850   :  { %v1559_v43 = vadd.f32 1.0, %v4374_v14  ;;  %4375 = vrcp.f32 %v1560_v40 }
 0x852   :  { %4377 = vrcp.f32 %v1559_v43 }
 0x853   :  { %4379 = vrcp.f32 %v284_v48 }
 0x85d   :  { %v4376_v25 = vpop.eup %4375 }
 0x85e   :  { %v1566_v46 = vmul.f32 %v4376_v25, %v1552_v36 }
 0x85f   :  { %v4378_v44 = vpop.eup %4377 }
 0x860   :  { %v1565_v45 = vmul.f32 %v4378_v44, %v1551_v23  ;;  %v5231_v35 = vpop.eup %4379 }
 0x861   :  { %v1360_v42 = vmul.f32 %v5231_v35, %v5167_v41  ;;  %v3140_v41 = vld [vmem:[%s5778_s6 + $0x530] sm:$0xff] }
 0x862   :  { %3940 = vmatprep.mubr.f32.mxu1 %v1565_v45 }
 0x863   :  { %3941 = vmatmul.mubr.f32.vlgmr.msra.gmra.mxu1 %v1566_v46  ;;  %v5243_v58 = vadd.f32 %v1360_v42, %v82_v17 }
 0x864   :  { %1777 = vmatprep.mubr.f32.mxu1 %v4510_v16 }
 0x923   :  { %v3942_v53 = vpop.f32.mrf.mxu1 }
 0x924   :  { %v1660_v54 = vadd.f32 %v3942_v53, %v3097_v38 }
 0x925   :  { %v1654_v30 = vpop.f32.mrf.mxu1 }
 0x926   :  { %v5241_v15 = vadd.f32 %v1660_v54, %v81_v51  ;;  %v1655_v56 = vadd.f32 %v3097_v38, %v1654_v30 }
 0x928   :  { %v5245_v61 = vadd.f32 %v1655_v56, %v80_v57  ;;  %1694 = vmatpush1.msra.mxu0 %v5241_v15  ;;  %4259 = vmatpush1.msra.mxu1 %v5241_v15 }
 0x929   :  { %1695 = vmatprep.subr.mxu0 %v5243_v58  ;;  %4258 = vmatprep.subr.mxu1 %v5243_v58 }
 0x92a   :  { %1696 = vmatpush1.msra.mxu0 %v5245_v61  ;;  %4260 = vmatpush1.msra.mxu1 %v5245_v61 }
 0x92b   :  { %3098 = vmatmul.mubr.msk.f32.vlgmr.msra.gmra.mxu0 %vm290_vm8, %v4606_v20  ;;  %3106 = vmatmul.mubr.msk.f32.vlgmr.msra.gmra.mxu1 %vm290_vm8, %v4685_v3  ;;  %v3123_v20 = vld [vmem:[%s5778_s6 + $0x4a8] sm:$0xff]  ;;  %v3120_v3 = vld [vmem:[%s5778_s6 + $0x490] sm:$0xff] }
 0x92c   :  { %1735 = vmatprep.mubr.f32.mxu0 %v4510_v16  ;;  %1783 = vmatprep.mubr.f32.mxu1 %v4510_v16 }
 0x92d   :  { %3984 = vmatprep.subr.mxu1 %v3125_v60  ;;  %3943 = vmatprep.subr.mxu0 %v3141_v18 }
 0x92e   :  { %3985 = vmatpush3.msra.mxu1 %v3125_v60  ;;  %3944 = vmatpush3.msra.mxu0 %v3141_v18 }
 0x92f   :  { %3099 = vmatmul.mubr.msk.f32.gmra.mxu0 %vm290_vm8, %v4611_v22  ;;  %3107 = vmatmul.mubr.msk.f32.gmra.mxu1 %vm290_vm8, %v4692_v5  ;;  %v3122_v22 = vld [vmem:[%s5778_s6 + $0x4a0] sm:$0xff] }
 0x930   :  { %1741 = vmatprep.mubr.f32.mxu0 %v4510_v16  ;;  %1789 = vmatprep.mubr.f32.mxu1 %v4510_v16  ;;  %v3118_v5 = vld [vmem:[%s5778_s6 + $0x480] sm:$0xff] }
 0x931   :  { %3986 = vmatprep.subr.mxu1 %v3124_v63  ;;  %3945 = vmatprep.subr.mxu0 %v3140_v41 }
 0x932   :  { %3987 = vmatpush3.msra.mxu1 %v3124_v63  ;;  %3946 = vmatpush3.msra.mxu0 %v3140_v41 }
 0x933   :  { %3100 = vmatmul.mubr.msk.f32.gmra.mxu0 %vm290_vm8, %v4616_v24  ;;  %3108 = vmatmul.mubr.msk.f32.gmra.mxu1 %vm290_vm8, %v4699_v7  ;;  %v3121_v24 = vld [vmem:[%s5778_s6 + $0x498] sm:$0xff]  ;;  %v3116_v7 = vld [vmem:[%s5778_s6 + $0x470] sm:$0xff] }
 0x934   :  { %1747 = vmatprep.mubr.f32.mxu0 %v4510_v16  ;;  %1795 = vmatprep.mubr.f32.mxu1 %v4510_v16 }
 0x935   :  { %3988 = vmatprep.subr.mxu1 %v3123_v20  ;;  %3947 = vmatprep.subr.mxu0 %v3139_v11 }
 0x936   :  { %3989 = vmatpush3.msra.mxu1 %v3123_v20  ;;  %3948 = vmatpush3.msra.mxu0 %v3139_v11  ;;  %v3164_v11 = vld [vmem:[%s5778_s6 + $0x5b0] sm:$0xff] }
 0x937   :  { %3101 = vmatmul.mubr.msk.f32.gmra.mxu0 %vm290_vm8, %v4621_v27  ;;  %3109 = vmatmul.mubr.msk.f32.gmra.mxu1 %vm290_vm8, %v4706_v8  ;;  %v3119_v27 = vld [vmem:[%s5778_s6 + $0x488] sm:$0xff]  ;;  %v3114_v8 = vld [vmem:[%s5778_s6 + $0x460] sm:$0xff] }
 0x938   :  { %1753 = vmatprep.mubr.f32.mxu0 %v4510_v16  ;;  %3990 = vmatprep.subr.mxu1 %v3122_v22 }
 0x939   :  { %3991 = vmatpush3.msra.mxu1 %v3122_v22  ;;  %3949 = vmatprep.subr.mxu0 %v3138_v55 }
 0x93a   :  { %3992 = vmatprep.subr.mxu1 %v3121_v24  ;;  %3950 = vmatpush3.msra.mxu0 %v3138_v55  ;;  %v3162_v55 = vld [vmem:[%s5778_s6 + $0x5a0] sm:$0xff] }
 0x93b   :  { %3102 = vmatmul.mubr.msk.f32.gmra.mxu0 %vm290_vm8, %v4631_v47  ;;  %3993 = vmatpush3.msra.mxu1 %v3121_v24  ;;  %v3117_v47 = vld [vmem:[%s5778_s6 + $0x478] sm:$0xff] }
 0x93c   :  { %1759 = vmatprep.mubr.f32.mxu0 %v4510_v16  ;;  %3994 = vmatprep.subr.mxu1 %v3120_v3 }
 0x93d   :  { %3995 = vmatpush3.msra.mxu1 %v3120_v3  ;;  %3951 = vmatprep.subr.mxu0 %v3137_v59 }
 0x93e   :  { %3996 = vmatprep.subr.mxu1 %v3119_v27  ;;  %3952 = vmatpush3.msra.mxu0 %v3137_v59  ;;  %v3160_v59 = vld [vmem:[%s5778_s6 + $0x590] sm:$0xff] }
 0x93f   :  { %3103 = vmatmul.mubr.msk.f32.gmra.mxu0 %vm290_vm8, %v4636_v49  ;;  %3997 = vmatpush3.msra.mxu1 %v3119_v27  ;;  %v3115_v49 = vld [vmem:[%s5778_s6 + $0x468] sm:$0xff] }
 0x940   :  { %1765 = vmatprep.mubr.f32.mxu0 %v4510_v16  ;;  %3998 = vmatprep.subr.mxu1 %v3118_v5 }
 0x941   :  { %3999 = vmatpush3.msra.mxu1 %v3118_v5  ;;  %3953 = vmatprep.subr.mxu0 %v3136_v4 }
 0x942   :  { %4000 = vmatprep.subr.mxu1 %v3117_v47  ;;  %3954 = vmatpush3.msra.mxu0 %v3136_v4  ;;  %v3159_v4 = vld [vmem:[%s5778_s6 + $0x588] sm:$0xff] }
 0x943   :  { %3104 = vmatmul.mubr.msk.f32.gmra.mxu0 %vm290_vm8, %v4671_v0  ;;  %4001 = vmatpush3.msra.mxu1 %v3117_v47  ;;  %v3113_v0 = vld [vmem:[%s5778_s6 + $0x458] sm:$0xff] }
 0x944   :  { %1771 = vmatprep.mubr.f32.mxu0 %v4510_v16  ;;  %4002 = vmatprep.subr.mxu1 %v3116_v7 }
 0x945   :  { %4003 = vmatpush3.msra.mxu1 %v3116_v7  ;;  %3955 = vmatprep.subr.mxu0 %v3135_v29 }
 0x946   :  { %4004 = vmatprep.subr.mxu1 %v3115_v49  ;;  %3956 = vmatpush3.msra.mxu0 %v3135_v29  ;;  %v3158_v29 = vld [vmem:[%s5778_s6 + $0x580] sm:$0xff] }
 0x947   :  { %3105 = vmatmul.mubr.msk.f32.gmra.mxu0 %vm290_vm8, %v4678_v2  ;;  %4005 = vmatpush3.msra.mxu1 %v3115_v49  ;;  %v3111_v2 = vld [vmem:[%s5778_s6 + $0x448] sm:$0xff] }
 0x948   :  { %4006 = vmatprep.subr.mxu1 %v3114_v8  ;;  %3957 = vmatprep.subr.mxu0 %v3134_v19 }
 0x949   :  { %4007 = vmatpush3.msra.mxu1 %v3114_v8  ;;  %3958 = vmatpush3.msra.mxu0 %v3134_v19  ;;  %v3167_v8 = vld [vmem:[%s5778_s6 + $0x5c8] sm:$0xff]  ;;  %v3157_v19 = vld [vmem:[%s5778_s6 + $0x578] sm:$0xff] }
 0x94a   :  { %4008 = vmatprep.subr.mxu1 %v3113_v0  ;;  %3959 = vmatprep.subr.mxu0 %v3133_v31 }
 0x94b   :  { %4009 = vmatpush3.msra.mxu1 %v3113_v0  ;;  %3960 = vmatpush3.msra.mxu0 %v3133_v31  ;;  %v3166_v0 = vld [vmem:[%s5778_s6 + $0x5c0] sm:$0xff]  ;;  %v3156_v31 = vld [vmem:[%s5778_s6 + $0x570] sm:$0xff] }
 0x94c   :  { %4010 = vmatprep.subr.mxu1 %v3112_v1  ;;  %3961 = vmatprep.subr.mxu0 %v3132_v37 }
 0x94d   :  { %4011 = vmatpush3.msra.mxu1 %v3112_v1  ;;  %3962 = vmatpush3.msra.mxu0 %v3132_v37  ;;  %v3165_v1 = vld [vmem:[%s5778_s6 + $0x5b8] sm:$0xff]  ;;  %v3155_v37 = vld [vmem:[%s5778_s6 + $0x568] sm:$0xff] }
 0x94e   :  { %4012 = vmatprep.subr.mxu1 %v3111_v2  ;;  %3963 = vmatprep.subr.mxu0 %v3131_v13 }
 0x94f   :  { %4013 = vmatpush3.msra.mxu1 %v3111_v2  ;;  %3964 = vmatpush3.msra.mxu0 %v3131_v13  ;;  %v3163_v2 = vld [vmem:[%s5778_s6 + $0x5a8] sm:$0xff]  ;;  %v3154_v13 = vld [vmem:[%s5778_s6 + $0x560] sm:$0xff] }
 0x950   :  { %4014 = vmatprep.subr.mxu1 %v3110_v34  ;;  %3965 = vmatprep.subr.mxu0 %v3130_v33 }
 0x951   :  { %4015 = vmatpush3.msra.mxu1 %v3110_v34  ;;  %3966 = vmatpush3.msra.mxu0 %v3130_v33  ;;  %v3161_v34 = vld [vmem:[%s5778_s6 + $0x598] sm:$0xff] }
 0x952   :  { %3967 = vmatprep.subr.mxu0 %v3129_v6  ;;  %v3153_v33 = vld [vmem:[%s5778_s6 + $0x558] sm:$0xff] }
 0x953   :  { %3968 = vmatpush3.msra.mxu0 %v3129_v6  ;;  %v3152_v6 = vld [vmem:[%s5778_s6 + $0x550] sm:$0xff] }
 0x954   :  { %3969 = vmatprep.subr.mxu0 %v3128_v32 }
 0x955   :  { %3970 = vmatpush3.msra.mxu0 %v3128_v32 }
 0x956   :  { %3971 = vmatprep.subr.mxu0 %v3127_v21 }
 0x957   :  { %3972 = vmatpush3.msra.mxu0 %v3127_v21 }
 0x958   :  { %3973 = vmatprep.subr.mxu0 %v3126_v28 }
 0x959   :  { %3974 = vmatpush3.msra.mxu0 %v3126_v28 }
 0x95a   :  { %4025 = vmatprep.subr.mxu0 %v3167_v8 }
 0x9eb   :  { %v1731_v36 = vpop.f32.mrf.mxu0  ;;  %v1779_v12 = vpop.f32.mrf.mxu1 }
 0x9ec   :  { %4016 = vmatprep.mubr.f32.mxu1 %v1731_v36 }
 0x9ed   :  { %v1733_v62 = vpop.f32.mrf.mxu0  ;;  %v1781_v23 = vpop.f32.mrf.mxu1 }
 0x9ef   :  { %v1737_v26 = vpop.f32.mrf.mxu0  ;;  %v1785_v39 = vpop.f32.mrf.mxu1 }
 0x9f0   :  { %4017 = vmatmul.mubr.f32.vlgmr.msra.gmra.mxu1 %v1737_v26 }
 0x9f1   :  { %v1739_v40 = vpop.f32.mrf.mxu0  ;;  %v1787_v43 = vpop.f32.mrf.mxu1 }
 0x9f3   :  { %v1743_v14 = vpop.f32.mrf.mxu0  ;;  %v1791_v48 = vpop.f32.mrf.mxu1 }
 0x9f4   :  { %4019 = vmatprep.mubr.f32.mxu1 %v1743_v14 }
 0x9f5   :  { %v1745_v25 = vpop.f32.mrf.mxu0  ;;  %v1793_v51 = vpop.f32.mrf.mxu1 }
 0x9f6   :  { %v5383_v44 = vsub.f32 %v1745_v25, %v1781_v23 }
 0x9f7   :  { %v1749_v45 = vpop.f32.mrf.mxu0  ;;  %v1797_v24 = vpop.f32.mrf.mxu1 }
 0x9f8   :  { %4020 = vmatmul.mubr.f32.gmra.mxu1 %v1749_v45  ;;  %v1810_v46 = vmul.f32 %v5383_v44, %v5383_v44 }
 0x9f9   :  { %v1751_v38 = vpop.f32.mrf.mxu0  ;;  %v1799_v5 = vpop.f32.mrf.mxu1 }
 0x9fa   :  { %1818 = vadd.xlane.f32.xlu0 %v1810_v46  ;;  %v5397_v3 = vsub.f32 %v1751_v38, %v1787_v43  ;;  %v3145_v43 = vld [vmem:[%s5778_s6 + $0x548] ss:$0 sm:$0xff] }
 0x9fb   :  { %v1755_v42 = vpop.f32.mrf.mxu0 }
 0x9fc   :  { %4022 = vmatprep.mubr.f32.mxu1 %v1755_v42  ;;  %v1811_v7 = vmul.f32 %v5397_v3, %v5397_v3 }
 0x9fd   :  { %v1757_v53 = vpop.f32.mrf.mxu0 }
 0x9fe   :  { %v5387_v54 = vsub.f32 %v1757_v53, %v1793_v51 }
 0x9ff   :  { %v1761_v57 = vpop.f32.mrf.mxu0 }
 0xa00   :  { %4023 = vmatmul.mubr.f32.gmra.mxu1 %v1761_v57  ;;  %v1812_v30 = vmul.f32 %v5387_v54, %v5387_v54 }
 0xa01   :  { %v1763_v17 = vpop.f32.mrf.mxu0 }
 0xa02   :  { %1822 = vadd.xlane.f32.xlu1 %v1812_v30  ;;  %v5401_v47 = vsub.f32 %v1763_v17, %v1799_v5 }
 0xa03   :  { %v1767_v56 = vpop.f32.mrf.mxu0 }
 0xa04   :  { %3975 = vmatprep.mubr.f32.mxu0 %v1767_v56  ;;  %v1813_v49 = vmul.f32 %v5401_v47, %v5401_v47 }
 0xa05   :  { %v1769_v60 = vpop.f32.mrf.mxu0 }
 0xa06   :  { %v5391_v18 = vsub.f32 %v1733_v62, %v1769_v60  ;;  %v3143_v62 = vld [vmem:[%s5778_s6 + $0x540] ss:$0 sm:$0xff] }
 0xa07   :  { %v1773_v63 = vpop.f32.mrf.mxu0 }
 0xa08   :  { %3976 = vmatmul.mubr.f32.vlgmr.msra.gmra.mxu0 %v1773_v63  ;;  %v1808_v41 = vmul.f32 %v5391_v18, %v5391_v18 }
 0xa09   :  { %v1775_v20 = vpop.f32.mrf.mxu0  ;;  %3978 = vmatprep.mubr.f32.mxu0 %v1779_v12  ;;  %4026 = vmatpush3.msra.mxu0 %v3167_v8 }
 0xa0a   :  { %v5395_v22 = vsub.f32 %v1739_v40, %v1775_v20  ;;  %1814 = vadd.xlane.f32.xlu0 %v1808_v41  ;;  %4027 = vmatprep.subr.mxu0 %v3166_v0 }
 0xa0b   :  { %4028 = vmatpush3.msra.mxu0 %v3166_v0 }
 0xa0c   :  { %3979 = vmatmul.mubr.f32.gmra.mxu0 %v1785_v39  ;;  %v1809_v27 = vmul.f32 %v5395_v22, %v5395_v22  ;;  %4029 = vmatprep.subr.mxu0 %v3165_v1 }
 0xa0d   :  { %3981 = vmatprep.mubr.f32.mxu0 %v1791_v48  ;;  %4030 = vmatpush3.msra.mxu0 %v3165_v1 }
 0xa0e   :  { %1816 = vadd.xlane.f32.xlu0 %v1809_v27  ;;  %4031 = vmatprep.subr.mxu0 %v3164_v11 }
 0xa0f   :  { %4032 = vmatpush3.msra.mxu0 %v3164_v11 }
 0xa10   :  { %3982 = vmatmul.mubr.f32.gmra.mxu0 %v1797_v24  ;;  %4033 = vmatprep.subr.mxu0 %v3163_v2 }
 0xa11   :  { %4034 = vmatpush3.msra.mxu0 %v3163_v2 }
 0xa12   :  { %1820 = vadd.xlane.f32.xlu0 %v1811_v7  ;;  %4035 = vmatprep.subr.mxu0 %v3162_v55 }
 0xa13   :  { %4036 = vmatpush3.msra.mxu0 %v3162_v55 }
 0xa14   :  { %4037 = vmatprep.subr.mxu0 %v3161_v34 }
 0xa15   :  { %4038 = vmatpush3.msra.mxu0 %v3161_v34 }
 0xa16   :  { %1824 = vadd.xlane.f32.xlu0 %v1813_v49  ;;  %4039 = vmatprep.subr.mxu0 %v3160_v59 }
 0xa17   :  { %4040 = vmatpush3.msra.mxu0 %v3160_v59 }
 0xa18   :  { %4041 = vmatprep.subr.mxu0 %v3159_v4 }
 0xa19   :  { %4042 = vmatpush3.msra.mxu0 %v3159_v4 }
 0xa1a   :  { %4043 = vmatprep.subr.mxu0 %v3158_v29 }
 0xa1b   :  { %4044 = vmatpush3.msra.mxu0 %v3158_v29 }
 0xa1c   :  { %4045 = vmatprep.subr.mxu0 %v3157_v19 }
 0xa1d   :  { %4046 = vmatpush3.msra.mxu0 %v3157_v19 }
 0xa1e   :  { %4047 = vmatprep.subr.mxu0 %v3156_v31 }
 0xa1f   :  { %4048 = vmatpush3.msra.mxu0 %v3156_v31 }
 0xa20   :  { %4049 = vmatprep.subr.mxu0 %v3155_v37 }
 0xa21   :  { %4050 = vmatpush3.msra.mxu0 %v3155_v37 }
 0xa22   :  { %4051 = vmatprep.subr.mxu0 %v3154_v13 }
 0xa23   :  { %4052 = vmatpush3.msra.mxu0 %v3154_v13 }
 0xa24   :  { %4053 = vmatprep.subr.mxu0 %v3153_v33 }
 0xa25   :  { %4054 = vmatpush3.msra.mxu0 %v3153_v33 }
 0xa26   :  { %4055 = vmatprep.subr.mxu0 %v3152_v6 }
 0xa27   :  { %4056 = vmatpush3.msra.mxu0 %v3152_v6 }
 0xa83   :  { %v1819_v32 = vpop.xlane.xlu0 %1818 }
 0xa84   :  { %v2056_v17 = vmul.f32 %v3143_v62, %v1819_v32 }
 0xa8b   :  { %v1823_v63 = vpop.xlane.xlu1 %1822 }
 0xa8c   :  { %v2058_v1 = vmul.f32 %v3143_v62, %v1823_v63 }
 0xa93   :  { %v1815_v21 = vpop.xlane.xlu0 %1814 }
 0xa94   :  { %v2054_v45 = vmul.f32 %v3143_v62, %v1815_v21 }
 0xa97   :  { %v1817_v36 = vpop.xlane.xlu0 %1816 }
 0xa98   :  { %v2055_v39 = vmul.f32 %v3143_v62, %v1817_v36 }
 0xa9b   :  { %v1821_v40 = vpop.xlane.xlu0 %1820 }
 0xa9c   :  { %v2057_v51 = vmul.f32 %v3143_v62, %v1821_v40 }
 0xa9f   :  { %v1825_v41 = vpop.xlane.xlu0 %1824 }
 0xaa0   :  { %v2059_v11 = vmul.f32 %v3143_v62, %v1825_v41  ;;  %v3191_v41 = vld [vmem:[%s5778_s6 + $0x650] sm:$0xff] }
 0xaa1   :  { %4066 = vmatprep.subr.mxu1 %v3191_v41 }
 0xaa2   :  { %4067 = vmatpush3.msra.mxu1 %v3191_v41 }
 0xab0   :  { %v4018_v28 = vpop.f32.mrf.mxu1 }
 0xab2   :  { %v2020_v12 = vpop.f32.mrf.mxu1 }
 0xab8   :  { %v4021_v23 = vpop.f32.mrf.mxu1 }
 0xaba   :  { %v2030_v38 = vpop.f32.mrf.mxu1 }
 0xac0   :  { %v4024_v56 = vpop.f32.mrf.mxu1 }
 0xac2   :  { %v2040_v2 = vpop.f32.mrf.mxu1 }
 0xac8   :  { %v3977_v26 = vpop.f32.mrf.mxu0 }
 0xac9   :  { %v2026_v14 = vadd.f32 %v4018_v28, %v3977_v26 }
 0xaca   :  { %v1925_v25 = vpop.f32.mrf.mxu0 }
 0xacb   :  { %v2061_v46 = vadd.f32 %v2055_v39, %v2026_v14  ;;  %v2021_v48 = vadd.f32 %v2020_v12, %v1925_v25 }
 0xacc   :  { %v3980_v42 = vpop.f32.mrf.mxu0 }
 0xacd   :  { %v2072_v53 = vadd.f32 %v3145_v43, %v2061_v46  ;;  %v2060_v57 = vadd.f32 %v2054_v45, %v2021_v48  ;;  %v2036_v30 = vadd.f32 %v4021_v23, %v3980_v42 }
 0xace   :  { %v1935_v60 = vpop.f32.mrf.mxu0 }
 0xacf   :  { %v3147_v20 = vmul.f32 -1.442695, %v2072_v53  ;;  %v2071_v24 = vadd.f32 %v3145_v43, %v2060_v57  ;;  %v2063_v27 = vadd.f32 %v2057_v51, %v2036_v30  ;;  %v2031_v5 = vadd.f32 %v2030_v38, %v1935_v60 }
 0xad0   :  { %v3983_v7 = vpop.f32.mrf.mxu0 }
 0xad1   :  { %4381 = vpow2.f32 %v3147_v20  ;;  %v3146_v49 = vmul.f32 -1.442695, %v2071_v24  ;;  %v2074_v8 = vadd.f32 %v3145_v43, %v2063_v27  ;;  %v2062_v0 = vadd.f32 %v2056_v17, %v2031_v5  ;;  %v3189_v20 = vld [vmem:[%s5778_s6 + $0x640] sm:$0xff]  ;;  %v3187_v27 = vld [vmem:[%s5778_s6 + $0x630] sm:$0xff]  ;;  %v3186_v5 = vld [vmem:[%s5778_s6 + $0x628] sm:$0xff] }
 0xad2   :  { %v2046_v55 = vadd.f32 %v4024_v56, %v3983_v7  ;;  %v1945_v34 = vpop.f32.mrf.mxu0  ;;  %v3185_v7 = vld [vmem:[%s5778_s6 + $0x620] sm:$0xff] }
 0xad3   :  { %4383 = vpow2.f32 %v3146_v49  ;;  %v3149_v59 = vmul.f32 -1.442695, %v2074_v8  ;;  %v2073_v4 = vadd.f32 %v3145_v43, %v2062_v0  ;;  %v2041_v29 = vadd.f32 %v2040_v2, %v1945_v34  ;;  %v3184_v49 = vld [vmem:[%s5778_s6 + $0x618] sm:$0xff]  ;;  %v3182_v0 = vld [vmem:[%s5778_s6 + $0x608] sm:$0xff]  ;;  %v3179_v2 = vld [vmem:[%s5778_s6 + $0x5f0] sm:$0xff] }
 0xad4   :  { %v2065_v19 = vadd.f32 %v2059_v11, %v2046_v55  ;;  %v3180_v11 = vld [vmem:[%s5778_s6 + $0x5f8] sm:$0xff]  ;;  %v3178_v55 = vld [vmem:[%s5778_s6 + $0x5e8] sm:$0xff]  ;;  %v3177_v34 = vld [vmem:[%s5778_s6 + $0x5e0] sm:$0xff] }
 0xad5   :  { %4385 = vpow2.f32 %v3149_v59  ;;  %v3148_v31 = vmul.f32 -1.442695, %v2073_v4  ;;  %v2064_v37 = vadd.f32 %v2058_v1, %v2041_v29  ;;  %v3181_v1 = vld [vmem:[%s5778_s6 + $0x600] sm:$0xff]  ;;  %v3176_v59 = vld [vmem:[%s5778_s6 + $0x5d8] sm:$0xff] }
 0xad6   :  { %v2076_v13 = vadd.f32 %v3145_v43, %v2065_v19 }
 0xad7   :  { %4387 = vpow2.f32 %v3148_v31  ;;  %v2075_v33 = vadd.f32 %v3145_v43, %v2064_v37 }
 0xad8   :  { %v3151_v6 = vmul.f32 -1.442695, %v2076_v13 }
 0xad9   :  { %v3150_v32 = vmul.f32 -1.442695, %v2075_v33 }
 0xada   :  { %4389 = vpow2.f32 %v3151_v6 }
 0xadb   :  { %4391 = vpow2.f32 %v3150_v32 }
 0xade   :  { %v4382_v21 = vpop.eup %4381 }
 0xadf   :  { %v2096_v28 = vadd.f32 1.0, %v4382_v21 }
 0xae0   :  { %v4384_v36 = vpop.eup %4383 }
 0xae1   :  { %v2095_v12 = vadd.f32 1.0, %v4384_v36  ;;  %4393 = vrcp.f32 %v2096_v28 }
 0xae2   :  { %v4386_v62 = vpop.eup %4385 }
 0xae3   :  { %4395 = vrcp.f32 %v2095_v12  ;;  %v2098_v23 = vadd.f32 1.0, %v4386_v62 }
 0xae4   :  { %v4388_v26 = vpop.eup %4387 }
 0xae5   :  { %v2097_v39 = vadd.f32 1.0, %v4388_v26  ;;  %4397 = vrcp.f32 %v2098_v23 }
 0xae7   :  { %v4390_v40 = vpop.eup %4389  ;;  %4399 = vrcp.f32 %v2097_v39 }
 0xae8   :  { %v4392_v14 = vpop.eup %4391  ;;  %v2100_v25 = vadd.f32 1.0, %v4390_v40 }
 0xae9   :  { %v2099_v43 = vadd.f32 1.0, %v4392_v14 }
 0xaea   :  { %4401 = vrcp.f32 %v2100_v25 }
 0xaeb   :  { %4403 = vrcp.f32 %v2099_v43 }
 0xaee   :  { %v4394_v45 = vpop.eup %4393 }
 0xaef   :  { %v2114_v38 = vmul.f32 %v4394_v45, %v2072_v53  ;;  %v3190_v53 = vld [vmem:[%s5778_s6 + $0x648] sm:$0xff] }
 0xaf0   :  { %v4396_v46 = vpop.eup %4395  ;;  %4068 = vmatprep.subr.mxu1 %v3190_v53 }
 0xaf1   :  { %v2113_v48 = vmul.f32 %v4396_v46, %v2071_v24  ;;  %4069 = vmatpush3.msra.mxu1 %v3190_v53  ;;  %v3188_v24 = vld [vmem:[%s5778_s6 + $0x638] sm:$0xff] }
 0xaf2   :  { %v4398_v42 = vpop.eup %4397  ;;  %4070 = vmatprep.subr.mxu1 %v3189_v20 }
 0xaf3   :  { %4057 = vmatprep.mubr.f32.mxu0 %v2113_v48  ;;  %v2116_v30 = vmul.f32 %v4398_v42, %v2074_v8  ;;  %4071 = vmatpush3.msra.mxu1 %v3189_v20  ;;  %v3183_v8 = vld [vmem:[%s5778_s6 + $0x610] sm:$0xff] }
 0xaf4   :  { %v4400_v51 = vpop.eup %4399  ;;  %4058 = vmatmul.mubr.f32.vlgmr.msra.gmra.mxu0 %v2114_v38  ;;  %4072 = vmatprep.subr.mxu1 %v3188_v24 }
 0xaf5   :  { %v2115_v57 = vmul.f32 %v4400_v51, %v2073_v4  ;;  %4073 = vmatpush3.msra.mxu1 %v3188_v24  ;;  %v3169_v4 = vld [vmem:[%s5778_s6 + $0x5d0] ss:$0 sm:$0xff] }
 0xaf6   :  { %4074 = vmatprep.subr.mxu1 %v3187_v27 }
 0xaf7   :  { %v4402_v17 = vpop.eup %4401  ;;  %4060 = vmatprep.mubr.f32.mxu0 %v2115_v57  ;;  %4075 = vmatpush3.msra.mxu1 %v3187_v27 }
 0xaf8   :  { %v4404_v56 = vpop.eup %4403  ;;  %4061 = vmatmul.mubr.f32.gmra.mxu0 %v2116_v30  ;;  %v2118_v63 = vmul.f32 %v4402_v17, %v2076_v13  ;;  %4076 = vmatprep.subr.mxu1 %v3186_v5 }
 0xaf9   :  { %v2117_v60 = vmul.f32 %v4404_v56, %v2075_v33  ;;  %4077 = vmatpush3.msra.mxu1 %v3186_v5 }
 0xafa   :  { %4078 = vmatprep.subr.mxu1 %v3185_v7 }
 0xafb   :  { %4063 = vmatprep.mubr.f32.mxu0 %v2117_v60  ;;  %4079 = vmatpush3.msra.mxu1 %v3185_v7 }
 0xafc   :  { %4064 = vmatmul.mubr.f32.gmra.mxu0 %v2118_v63  ;;  %4080 = vmatprep.subr.mxu1 %v3184_v49 }
 0xafd   :  { %4081 = vmatpush3.msra.mxu1 %v3184_v49 }
 0xafe   :  { %4082 = vmatprep.subr.mxu1 %v3183_v8 }
 0xaff   :  { %4083 = vmatpush3.msra.mxu1 %v3183_v8 }
 0xb00   :  { %4084 = vmatprep.subr.mxu1 %v3182_v0 }
 0xb01   :  { %4085 = vmatpush3.msra.mxu1 %v3182_v0 }
 0xb02   :  { %4086 = vmatprep.subr.mxu1 %v3181_v1 }
 0xb03   :  { %4087 = vmatpush3.msra.mxu1 %v3181_v1  ;;  %v3215_v1 = vld [vmem:[%s5778_s6 + $0x6d8] sm:$0xff] }
 0xb04   :  { %4088 = vmatprep.subr.mxu1 %v3180_v11  ;;  %4107 = vmatprep.subr.mxu0 %v3215_v1 }
 0xb05   :  { %4089 = vmatpush3.msra.mxu1 %v3180_v11  ;;  %4108 = vmatpush3.msra.mxu0 %v3215_v1  ;;  %v3214_v11 = vld [vmem:[%s5778_s6 + $0x6d0] sm:$0xff] }
 0xb06   :  { %4090 = vmatprep.subr.mxu1 %v3179_v2  ;;  %4109 = vmatprep.subr.mxu0 %v3214_v11 }
 0xb07   :  { %4091 = vmatpush3.msra.mxu1 %v3179_v2  ;;  %4110 = vmatpush3.msra.mxu0 %v3214_v11  ;;  %v3213_v2 = vld [vmem:[%s5778_s6 + $0x6c8] sm:$0xff] }
 0xb08   :  { %4092 = vmatprep.subr.mxu1 %v3178_v55  ;;  %4111 = vmatprep.subr.mxu0 %v3213_v2 }
 0xb09   :  { %4093 = vmatpush3.msra.mxu1 %v3178_v55  ;;  %4112 = vmatpush3.msra.mxu0 %v3213_v2  ;;  %v3212_v55 = vld [vmem:[%s5778_s6 + $0x6c0] sm:$0xff] }
 0xb0a   :  { %4094 = vmatprep.subr.mxu1 %v3177_v34  ;;  %4113 = vmatprep.subr.mxu0 %v3212_v55 }
 0xb0b   :  { %4095 = vmatpush3.msra.mxu1 %v3177_v34  ;;  %4114 = vmatpush3.msra.mxu0 %v3212_v55  ;;  %v3211_v34 = vld [vmem:[%s5778_s6 + $0x6b8] sm:$0xff] }
 0xb0c   :  { %4096 = vmatprep.subr.mxu1 %v3176_v59  ;;  %4115 = vmatprep.subr.mxu0 %v3211_v34 }
 0xb0d   :  { %4097 = vmatpush3.msra.mxu1 %v3176_v59  ;;  %4116 = vmatpush3.msra.mxu0 %v3211_v34  ;;  %v3210_v59 = vld [vmem:[%s5778_s6 + $0x6b0] sm:$0xff] }
 0xb0e   :  { %4117 = vmatprep.subr.mxu0 %v3210_v59 }
 0xb0f   :  { %4118 = vmatpush3.msra.mxu0 %v3210_v59 }
 0xbb4   :  { %v4059_v29 = vpop.f32.mrf.mxu0 }
 0xbb5   :  { %v2212_v19 = vadd.f32 %v4059_v29, %v3169_v4  ;;  %v3208_v29 = vld [vmem:[%s5778_s6 + $0x6a0] sm:$0xff] }
 0xbb6   :  { %v2206_v31 = vpop.f32.mrf.mxu0 }
 0xbb7   :  { %v3171_v37 = vmul.f32 -1.442695, %v2212_v19  ;;  %v2207_v13 = vadd.f32 %v3169_v4, %v2206_v31  ;;  %v3206_v31 = vld [vmem:[%s5778_s6 + $0x690] sm:$0xff] }
 0xbb8   :  { %v4062_v33 = vpop.f32.mrf.mxu0 }
 0xbb9   :  { %4405 = vpow2.f32 %v3171_v37  ;;  %v3170_v6 = vmul.f32 -1.442695, %v2207_v13  ;;  %v2222_v32 = vadd.f32 %v4062_v33, %v3169_v4  ;;  %v3205_v37 = vld [vmem:[%s5778_s6 + $0x688] sm:$0xff]  ;;  %v3203_v33 = vld [vmem:[%s5778_s6 + $0x678] sm:$0xff] }
 0xbba   :  { %v2216_v21 = vpop.f32.mrf.mxu0 }
 0xbbb   :  { %4407 = vpow2.f32 %v3170_v6  ;;  %v3173_v28 = vmul.f32 -1.442695, %v2222_v32  ;;  %v2217_v36 = vadd.f32 %v3169_v4, %v2216_v21  ;;  %v3202_v6 = vld [vmem:[%s5778_s6 + $0x670] sm:$0xff]  ;;  %v3200_v21 = vld [vmem:[%s5778_s6 + $0x660] sm:$0xff] }
 0xbbc   :  { %v4065_v12 = vpop.f32.mrf.mxu0 }
 0xbbd   :  { %4409 = vpow2.f32 %v3173_v28  ;;  %v3172_v62 = vmul.f32 -1.442695, %v2217_v36  ;;  %v2232_v23 = vadd.f32 %v4065_v12, %v3169_v4  ;;  %v3243_v28 = vld [vmem:[%s5778_s6 + $0x768] sm:$0xff] }
 0xbbe   :  { %v2226_v26 = vpop.f32.mrf.mxu0 }
 0xbbf   :  { %4411 = vpow2.f32 %v3172_v62  ;;  %v3175_v39 = vmul.f32 -1.442695, %v2232_v23  ;;  %v2227_v40 = vadd.f32 %v3169_v4, %v2226_v26  ;;  %v3209_v4 = vld [vmem:[%s5778_s6 + $0x6a8] sm:$0xff] }
 0xbc0   :  { %4119 = vmatprep.subr.mxu0 %v3209_v4 }
 0xbc1   :  { %4413 = vpow2.f32 %v3175_v39  ;;  %v3174_v14 = vmul.f32 -1.442695, %v2227_v40  ;;  %4120 = vmatpush3.msra.mxu0 %v3209_v4 }
 0xbc2   :  { %4121 = vmatprep.subr.mxu0 %v3208_v29 }
 0xbc3   :  { %4415 = vpow2.f32 %v3174_v14  ;;  %4122 = vmatpush3.msra.mxu0 %v3208_v29 }
 0xbc6   :  { %v4406_v25 = vpop.eup %4405 }
 0xbc7   :  { %v2254_v43 = vadd.f32 1.0, %v4406_v25 }
 0xbc8   :  { %v4408_v45 = vpop.eup %4407 }
 0xbc9   :  { %v2253_v46 = vadd.f32 1.0, %v4408_v45  ;;  %4417 = vrcp.f32 %v2254_v43 }
 0xbca   :  { %v4410_v48 = vpop.eup %4409 }
 0xbcb   :  { %4419 = vrcp.f32 %v2253_v46  ;;  %v2256_v38 = vadd.f32 1.0, %v4410_v48 }
 0xbcc   :  { %v4412_v42 = vpop.eup %4411 }
 0xbcd   :  { %v2255_v51 = vadd.f32 1.0, %v4412_v42  ;;  %4421 = vrcp.f32 %v2256_v38 }
 0xbce   :  { %v4414_v57 = vpop.eup %4413 }
 0xbcf   :  { %4423 = vrcp.f32 %v2255_v51  ;;  %v2258_v30 = vadd.f32 1.0, %v4414_v57 }
 0xbd0   :  { %v4416_v17 = vpop.eup %4415 }
 0xbd1   :  { %4425 = vrcp.f32 %v2258_v30  ;;  %v2257_v56 = vadd.f32 1.0, %v4416_v17 }
 0xbd3   :  { %4427 = vrcp.f32 %v2257_v56 }
 0xbd6   :  { %v4418_v60 = vpop.eup %4417 }
 0xbd7   :  { %v5514_v53 = vmul.f32 %v4418_v60, %v2212_v19  ;;  %v3207_v19 = vld [vmem:[%s5778_s6 + $0x698] sm:$0xff] }
 0xbd8   :  { %v4420_v63 = vpop.eup %4419  ;;  %4123 = vmatprep.subr.mxu0 %v3207_v19 }
 0xbd9   :  { %v5512_v41 = vmul.f32 %v4420_v63, %v2207_v13  ;;  %4124 = vmatpush3.msra.mxu0 %v3207_v19  ;;  %v3204_v13 = vld [vmem:[%s5778_s6 + $0x680] sm:$0xff] }
 0xbda   :  { %v4422_v20 = vpop.eup %4421  ;;  %4125 = vmatprep.subr.mxu0 %v3206_v31 }
 0xbdb   :  { %4098 = vmatprep.mubr.f32.mxu1 %v5512_v41  ;;  %v5520_v7 = vmul.f32 %v4422_v20, %v2222_v32  ;;  %4126 = vmatpush3.msra.mxu0 %v3206_v31  ;;  %v3201_v32 = vld [vmem:[%s5778_s6 + $0x668] sm:$0xff]  ;;  %v3242_v31 = vld [vmem:[%s5778_s6 + $0x760] sm:$0xff] }
 0xbdc   :  { %v4424_v24 = vpop.eup %4423  ;;  %4099 = vmatmul.mubr.f32.vlgmr.msra.gmra.mxu1 %v5514_v53  ;;  %4127 = vmatprep.subr.mxu0 %v3205_v37 }
 0xbdd   :  { %v5518_v27 = vmul.f32 %v4424_v24, %v2217_v36  ;;  %4128 = vmatpush3.msra.mxu0 %v3205_v37  ;;  %v3193_v36 = vld [vmem:[%s5778_s6 + $0x658] ss:$0 sm:$0xff] }
 0xbde   :  { %v4426_v5 = vpop.eup %4425  ;;  %4129 = vmatprep.subr.mxu0 %v3204_v13 }
 0xbdf   :  { %v2276_v49 = vmul.f32 %v4426_v5, %v2232_v23  ;;  %4101 = vmatprep.mubr.f32.mxu1 %v5518_v27  ;;  %4130 = vmatpush3.msra.mxu0 %v3204_v13 }
 0xbe0   :  { %v4428_v8 = vpop.eup %4427  ;;  %4102 = vmatmul.mubr.f32.gmra.mxu1 %v5520_v7  ;;  %4131 = vmatprep.subr.mxu0 %v3203_v33 }
 0xbe1   :  { %v5524_v0 = vmul.f32 %v4428_v8, %v2227_v40  ;;  %2642 = vmatprep.subr.mxu1 %v2276_v49  ;;  %4132 = vmatpush3.msra.mxu0 %v3203_v33  ;;  %v3241_v33 = vld [vmem:[%s5778_s6 + $0x758] sm:$0xff] }
 0xbe2   :  { %4133 = vmatprep.subr.mxu0 %v3202_v6 }
 0xbe3   :  { %4104 = vmatprep.mubr.f32.mxu1 %v5524_v0  ;;  %4134 = vmatpush3.msra.mxu0 %v3202_v6 }
 0xbe4   :  { %4105 = vmatmul.mubr.f32.gmra.mxu1 %v2276_v49  ;;  %4135 = vmatprep.subr.mxu0 %v3201_v32 }
 0xbe5   :  { %2686 = vmatprep.mubr.f32.mxu1 %v4510_v16  ;;  %4136 = vmatpush3.msra.mxu0 %v3201_v32 }
 0xbe6   :  { %4137 = vmatprep.subr.mxu0 %v3200_v21 }
 0xbe7   :  { %4138 = vmatpush3.msra.mxu0 %v3200_v21  ;;  %v3240_v21 = vld [vmem:[%s5778_s6 + $0x750] sm:$0xff] }
 0xbe8   :  { %4183 = vmatprep.subr.mxu0 %v3243_v28 }
 0xc9c   :  { %v4100_v12 = vpop.f32.mrf.mxu1 }
 0xc9d   :  { %v2370_v62 = vadd.f32 %v4100_v12, %v3193_v36 }
 0xc9e   :  { %v2364_v23 = vpop.f32.mrf.mxu1 }
 0xc9f   :  { %v3195_v26 = vmul.f32 -1.442695, %v2370_v62  ;;  %v2365_v39 = vadd.f32 %v3193_v36, %v2364_v23  ;;  %v3238_v23 = vld [vmem:[%s5778_s6 + $0x740] sm:$0xff] }
 0xca0   :  { %v4103_v40 = vpop.f32.mrf.mxu1 }
 0xca1   :  { %4429 = vpow2.f32 %v3195_v26  ;;  %v3194_v14 = vmul.f32 -1.442695, %v2365_v39  ;;  %v2380_v25 = vadd.f32 %v4103_v40, %v3193_v36  ;;  %v3237_v26 = vld [vmem:[%s5778_s6 + $0x738] sm:$0xff]  ;;  %v3235_v40 = vld [vmem:[%s5778_s6 + $0x728] sm:$0xff] }
 0xca2   :  { %v2374_v43 = vpop.f32.mrf.mxu1 }
 0xca3   :  { %4431 = vpow2.f32 %v3194_v14  ;;  %v3197_v45 = vmul.f32 -1.442695, %v2380_v25  ;;  %v2375_v46 = vadd.f32 %v3193_v36, %v2374_v43  ;;  %v3234_v14 = vld [vmem:[%s5778_s6 + $0x720] sm:$0xff]  ;;  %v3232_v43 = vld [vmem:[%s5778_s6 + $0x710] sm:$0xff] }
 0xca4   :  { %v4106_v48 = vpop.f32.mrf.mxu1 }
 0xca5   :  { %4433 = vpow2.f32 %v3197_v45  ;;  %v3196_v38 = vmul.f32 -1.442695, %v2375_v46  ;;  %v2390_v42 = vadd.f32 %v4106_v48, %v3193_v36  ;;  %v3231_v45 = vld [vmem:[%s5778_s6 + $0x708] sm:$0xff]  ;;  %v3229_v48 = vld [vmem:[%s5778_s6 + $0x6f8] sm:$0xff] }
 0xca6   :  { %v2384_v51 = vpop.f32.mrf.mxu1 }
 0xca7   :  { %4435 = vpow2.f32 %v3196_v38  ;;  %v3199_v57 = vmul.f32 -1.442695, %v2390_v42  ;;  %v2385_v30 = vadd.f32 %v3193_v36, %v2384_v51  ;;  %v3228_v38 = vld [vmem:[%s5778_s6 + $0x6f0] sm:$0xff]  ;;  %v3217_v51 = vld [vmem:[%s5778_s6 + $0x6e0] ss:$0 sm:$0xff] }
 0xca9   :  { %4437 = vpow2.f32 %v3199_v57  ;;  %v3198_v17 = vmul.f32 -1.442695, %v2385_v30 }
 0xcab   :  { %4439 = vpow2.f32 %v3198_v17 }
 0xcae   :  { %v4430_v56 = vpop.eup %4429 }
 0xcaf   :  { %v2412_v60 = vadd.f32 1.0, %v4430_v56 }
 0xcb0   :  { %v4432_v63 = vpop.eup %4431 }
 0xcb1   :  { %v2411_v20 = vadd.f32 1.0, %v4432_v63  ;;  %4441 = vrcp.f32 %v2412_v60 }
 0xcb2   :  { %v4434_v24 = vpop.eup %4433 }
 0xcb3   :  { %4443 = vrcp.f32 %v2411_v20  ;;  %v2414_v5 = vadd.f32 1.0, %v4434_v24 }
 0xcb4   :  { %v4436_v49 = vpop.eup %4435 }
 0xcb5   :  { %v2413_v8 = vadd.f32 1.0, %v4436_v49  ;;  %4445 = vrcp.f32 %v2414_v5 }
 0xcb6   :  { %v4438_v1 = vpop.eup %4437 }
 0xcb7   :  { %4447 = vrcp.f32 %v2413_v8  ;;  %v2416_v11 = vadd.f32 1.0, %v4438_v1 }
 0xcb8   :  { %v4440_v2 = vpop.eup %4439 }
 0xcb9   :  { %v2415_v55 = vadd.f32 1.0, %v4440_v2  ;;  %4449 = vrcp.f32 %v2416_v11 }
 0xcbb   :  { %4451 = vrcp.f32 %v2415_v55 }
 0xcbe   :  { %v4442_v34 = vpop.eup %4441 }
 0xcbf   :  { %v2430_v29 = vmul.f32 %v4442_v34, %v2370_v62 }
 0xcc0   :  { %v4444_v59 = vpop.eup %4443 }
 0xcc1   :  { %v2429_v4 = vmul.f32 %v4444_v59, %v2365_v39  ;;  %v3236_v39 = vld [vmem:[%s5778_s6 + $0x730] sm:$0xff] }
 0xcc2   :  { %v4446_v19 = vpop.eup %4445 }
 0xcc3   :  { %4139 = vmatprep.mubr.f32.mxu0 %v2429_v4  ;;  %v2432_v6 = vmul.f32 %v4446_v19, %v2380_v25  ;;  %v3233_v25 = vld [vmem:[%s5778_s6 + $0x718] sm:$0xff] }
 0xcc4   :  { %v4448_v37 = vpop.eup %4447  ;;  %4140 = vmatmul.mubr.f32.vlgmr.msra.gmra.mxu0 %v2430_v29 }
 0xcc5   :  { %v2431_v13 = vmul.f32 %v4448_v37, %v2375_v46  ;;  %4184 = vmatpush3.msra.mxu0 %v3243_v28  ;;  %v3239_v28 = vld [vmem:[%s5778_s6 + $0x748] sm:$0xff]  ;;  %v3230_v46 = vld [vmem:[%s5778_s6 + $0x700] sm:$0xff] }
 0xcc6   :  { %4185 = vmatprep.subr.mxu0 %v3242_v31  ;;  %v4450_v32 = vpop.eup %4449 }
 0xcc7   :  { %4186 = vmatpush3.msra.mxu0 %v3242_v31  ;;  %4142 = vmatprep.mubr.f32.mxu0 %v2431_v13  ;;  %v2434_v62 = vmul.f32 %v4450_v32, %v2390_v42 }
 0xcc8   :  { %v4452_v36 = vpop.eup %4451  ;;  %4187 = vmatprep.subr.mxu0 %v3241_v33  ;;  %4143 = vmatmul.mubr.f32.gmra.mxu0 %v2432_v6 }
 0xcc9   :  { %v2433_v12 = vmul.f32 %v4452_v36, %v2385_v30  ;;  %4188 = vmatpush3.msra.mxu0 %v3241_v33 }
 0xcca   :  { %4189 = vmatprep.subr.mxu0 %v3240_v21 }
 0xccb   :  { %4190 = vmatpush3.msra.mxu0 %v3240_v21  ;;  %4145 = vmatprep.mubr.f32.mxu0 %v2433_v12 }
 0xccc   :  { %4191 = vmatprep.subr.mxu0 %v3239_v28  ;;  %4146 = vmatmul.mubr.f32.gmra.mxu0 %v2434_v62 }
 0xccd   :  { %4192 = vmatpush3.msra.mxu0 %v3239_v28  ;;  %4215 = vmatprep.mubr.f32.mxu0 %v5245_v61 }
 0xcce   :  { %4193 = vmatprep.subr.mxu0 %v3238_v23 }
 0xccf   :  { %4194 = vmatpush3.msra.mxu0 %v3238_v23 }
 0xcd0   :  { %4195 = vmatprep.subr.mxu0 %v3237_v26 }
 0xcd1   :  { %4196 = vmatpush3.msra.mxu0 %v3237_v26 }
 0xcd2   :  { %4197 = vmatprep.subr.mxu0 %v3236_v39 }
 0xcd3   :  { %4198 = vmatpush3.msra.mxu0 %v3236_v39 }
 0xcd4   :  { %4199 = vmatprep.subr.mxu0 %v3235_v40 }
 0xcd5   :  { %4200 = vmatpush3.msra.mxu0 %v3235_v40  ;;  %v3225_v40 = vld [vmem:[%s5778_s6 + $0x6e8] ss:$0 sm:$0xff] }
 0xcd6   :  { %4201 = vmatprep.subr.mxu0 %v3234_v14 }
 0xcd7   :  { %4202 = vmatpush3.msra.mxu0 %v3234_v14 }
 0xcd8   :  { %4203 = vmatprep.subr.mxu0 %v3233_v25 }
 0xcd9   :  { %4204 = vmatpush3.msra.mxu0 %v3233_v25 }
 0xcda   :  { %4205 = vmatprep.subr.mxu0 %v3232_v43 }
 0xcdb   :  { %4206 = vmatpush3.msra.mxu0 %v3232_v43 }
 0xcdc   :  { %4207 = vmatprep.subr.mxu0 %v3231_v45 }
 0xcdd   :  { %4208 = vmatpush3.msra.mxu0 %v3231_v45 }
 0xcde   :  { %4209 = vmatprep.subr.mxu0 %v3230_v46 }
 0xcdf   :  { %4210 = vmatpush3.msra.mxu0 %v3230_v46 }
 0xce0   :  { %4211 = vmatprep.subr.mxu0 %v3229_v48 }
 0xce1   :  { %4212 = vmatpush3.msra.mxu0 %v3229_v48 }
 0xce2   :  { %4213 = vmatprep.subr.mxu0 %v3228_v38 }
 0xce3   :  { %4214 = vmatpush3.msra.mxu0 %v3228_v38 }
 0xce4   :  { %4216 = vmatmul.mubr.f32.vlgmr.msra.gmra.mxu0 %v5241_v15 }
 0xd84   :  { %v4141_v42 = vpop.f32.mrf.mxu0 }
 0xd85   :  { %v2528_v30 = vadd.f32 %v4141_v42, %v3217_v51 }
 0xd86   :  { %v2522_v57 = vpop.f32.mrf.mxu0 }
 0xd87   :  { %v2523_v60 = vadd.f32 %v3217_v51, %v2522_v57  ;;  %v3219_v5 = vmul.f32 -1.442695, %v2528_v30 }
 0xd88   :  { %v4144_v17 = vpop.f32.mrf.mxu0 }
 0xd89   :  { %v2538_v56 = vadd.f32 %v4144_v17, %v3217_v51  ;;  %v3218_v11 = vmul.f32 -1.442695, %v2523_v60 }
 0xd8a   :  { %v2532_v63 = vpop.f32.mrf.mxu0 }
 0xd8b   :  { %v3221_v20 = vmul.f32 -1.442695, %v2538_v56  ;;  %v2533_v24 = vadd.f32 %v3217_v51, %v2532_v63 }
 0xd8c   :  { %v4147_v49 = vpop.f32.mrf.mxu0 }
 0xd8d   :  { %4453 = vpow2.f32 %v3221_v20  ;;  %v3220_v8 = vmul.f32 -1.442695, %v2533_v24  ;;  %v2548_v1 = vadd.f32 %v4147_v49, %v3217_v51 }
 0xd8e   :  { %v2542_v2 = vpop.f32.mrf.mxu0 }
 0xd8f   :  { %4455 = vpow2.f32 %v3220_v8  ;;  %v3223_v55 = vmul.f32 -1.442695, %v2548_v1  ;;  %v2543_v34 = vadd.f32 %v3217_v51, %v2542_v2  ;;  %v3248_v2 = vld [vmem:[%s5778_s6 + $0x790] sm:$0xff] }
 0xd90   :  { %4457 = vpow2.f32 %v3219_v5 }
 0xd91   :  { %4459 = vpow2.f32 %v3223_v55  ;;  %v3222_v59 = vmul.f32 -1.442695, %v2543_v34  ;;  %v3247_v55 = vld [vmem:[%s5778_s6 + $0x788] sm:$0xff] }
 0xd92   :  { %4461 = vpow2.f32 %v3218_v11 }
 0xd93   :  { %4463 = vpow2.f32 %v3222_v59  ;;  %v3245_v59 = vld [vmem:[%s5778_s6 + $0x778] sm:$0xff] }
 0xd9a   :  { %v4454_v4 = vpop.eup %4453 }
 0xd9b   :  { %v2572_v19 = vadd.f32 1.0, %v4454_v4  ;;  %v3244_v4 = vld [vmem:[%s5778_s6 + $0x770] sm:$0xff] }
 0xd9c   :  { %v4456_v29 = vpop.eup %4455 }
 0xd9d   :  { %v4458_v31 = vpop.eup %4457  ;;  %v2571_v13 = vadd.f32 1.0, %v4456_v29  ;;  %4465 = vrcp.f32 %v2572_v19 }
 0xd9e   :  { %v4460_v37 = vpop.eup %4459  ;;  %v2570_v21 = vadd.f32 1.0, %v4458_v31 }
 0xd9f   :  { %v4462_v33 = vpop.eup %4461  ;;  %v2574_v6 = vadd.f32 1.0, %v4460_v37 }
 0xda0   :  { %v4464_v32 = vpop.eup %4463  ;;  %v2569_v12 = vadd.f32 1.0, %v4462_v33 }
 0xda1   :  { %4467 = vrcp.f32 %v2574_v6  ;;  %v2573_v36 = vadd.f32 1.0, %v4464_v32 }
 0xda2   :  { %4469 = vrcp.f32 %v2571_v13 }
 0xda3   :  { %4471 = vrcp.f32 %v2573_v36  ;;  %v3274_v36 = vld [vmem:[%s5778_s6 + $0x848] sm:$0xff] }
 0xda4   :  { %4473 = vrcp.f32 %v2570_v21  ;;  %v3279_v21 = vld [vmem:[%s5778_s6 + $0x870] sm:$0xff] }
 0xda5   :  { %4475 = vrcp.f32 %v2569_v12  ;;  %v3273_v12 = vld [vmem:[%s5778_s6 + $0x840] sm:$0xff] }
 0xdaa   :  { %v4466_v28 = vpop.eup %4465 }
 0xdab   :  { %v2590_v14 = vmul.f32 %v4466_v28, %v2538_v56  ;;  %v3272_v28 = vld [vmem:[%s5778_s6 + $0x838] sm:$0xff] }
 0xdad   :  { %v2601_v51 = vmul.f32 %v3225_v40, %v2590_v14  ;;  %v3266_v14 = vld [vmem:[%s5778_s6 + $0x808] sm:$0xff] }
 0xdae   :  { %v4468_v62 = vpop.eup %4467 }
 0xdaf   :  { %v4470_v23 = vpop.eup %4469  ;;  %v2592_v26 = vmul.f32 %v4468_v62, %v2548_v1  ;;  %v3271_v62 = vld [vmem:[%s5778_s6 + $0x830] sm:$0xff] }
 0xdb0   :  { %v4472_v39 = vpop.eup %4471  ;;  %v2589_v46 = vmul.f32 %v4470_v23, %v2533_v24  ;;  %v3270_v23 = vld [vmem:[%s5778_s6 + $0x828] sm:$0xff] }
 0xdb1   :  { %v2591_v25 = vmul.f32 %v4472_v39, %v2543_v34  ;;  %v2603_v43 = vmul.f32 %v3225_v40, %v2592_v26  ;;  %v4474_v45 = vpop.eup %4473  ;;  %v3246_v34 = vld [vmem:[%s5778_s6 + $0x780] sm:$0xff]  ;;  %v3268_v39 = vld [vmem:[%s5778_s6 + $0x818] sm:$0xff] }
 0xdb2   :  { %v4476_v38 = vpop.eup %4475  ;;  %v2588_v42 = vmul.f32 %v4474_v45, %v2528_v30  ;;  %v2600_v17 = vmul.f32 %v3225_v40, %v2589_v46  ;;  %v3269_v26 = vld [vmem:[%s5778_s6 + $0x820] sm:$0xff]  ;;  %v4217_v45 = vpop.f32.mrf.mxu0 }
 0xdb3   :  { %2614 = vadd.xlane.f32.xlu1 %v2603_v43  ;;  %v2602_v48 = vmul.f32 %v3225_v40, %v2591_v25  ;;  %v2587_v57 = vmul.f32 %v4476_v38, %v2523_v60  ;;  %v3265_v25 = vld [vmem:[%s5778_s6 + $0x800] sm:$0xff]  ;;  %v3264_v43 = vld [vmem:[%s5778_s6 + $0x7f8] sm:$0xff] }
 0xdb4   :  { %v2599_v63 = vmul.f32 %v3225_v40, %v2588_v42  ;;  %v2876_v42 = vpop.f32.mrf.mxu0 }
 0xdb5   :  { %2612 = vadd.xlane.f32.xlu0 %v2602_v48  ;;  %v2598_v20 = vmul.f32 %v3225_v40, %v2587_v57  ;;  %v3267_v40 = vld [vmem:[%s5778_s6 + $0x810] sm:$0xff] }
 0xdb6   :  { %v3261_v48 = vld [vmem:[%s5778_s6 + $0x7f0] ss:$0 sm:$0xff] }
 0xdb7   :  { %2610 = vadd.xlane.f32.xlu1 %v2601_v51 }
 0xdb9   :  { %2608 = vadd.xlane.f32.xlu0 %v2600_v17 }
 0xdbb   :  { %2606 = vadd.xlane.f32.xlu1 %v2599_v63 }
 0xdbd   :  { %2604 = vadd.xlane.f32.xlu0 %v2598_v20 }
 0xe3c   :  { %v2615_v5 = vpop.xlane.xlu1 %2614 }
 0xe3d   :  { %v2621_v56 = vmul.f32 %v2615_v5, %v5401_v47 }
 0xe3e   :  { %v2613_v49 = vpop.xlane.xlu0 %2612 }
 0xe3f   :  { %v2620_v24 = vmul.f32 %v2613_v49, %v5387_v54  ;;  %2643 = vmatpush1.msra.mxu1 %v2621_v56 }
 0xe40   :  { %2644 = vmatprep.subr.mxu1 %v5524_v0  ;;  %v2611_v30 = vpop.xlane.xlu1 %2610 }
 0xe41   :  { %v2619_v8 = vmul.f32 %v2611_v30, %v5397_v3  ;;  %2645 = vmatpush1.msra.mxu1 %v2620_v24  ;;  %v3259_v3 = vld [vmem:[%s5778_s6 + $0x7e8] sm:$0xff] }
 0xe42   :  { %2646 = vmatprep.subr.mxu1 %v5520_v7  ;;  %v2609_v60 = vpop.xlane.xlu0 %2608  ;;  %v3249_v7 = vld [vmem:[%s5778_s6 + $0x798] sm:$0xff] }
 0xe43   :  { %v2618_v1 = vmul.f32 %v2609_v60, %v5383_v44  ;;  %2647 = vmatpush1.msra.mxu1 %v2619_v8  ;;  %v3258_v44 = vld [vmem:[%s5778_s6 + $0x7e0] sm:$0xff] }
 0xe44   :  { %v2607_v11 = vpop.xlane.xlu1 %2606  ;;  %2648 = vmatprep.subr.mxu1 %v5518_v27  ;;  %v3250_v27 = vld [vmem:[%s5778_s6 + $0x7a0] sm:$0xff] }
 0xe45   :  { %v2617_v47 = vmul.f32 %v2607_v11, %v5395_v22  ;;  %2649 = vmatpush1.msra.mxu1 %v2618_v1  ;;  %v3256_v22 = vld [vmem:[%s5778_s6 + $0x7d0] sm:$0xff] }
 0xe46   :  { %2650 = vmatprep.subr.mxu1 %v5514_v53  ;;  %v2605_v54 = vpop.xlane.xlu0 %2604  ;;  %v3251_v53 = vld [vmem:[%s5778_s6 + $0x7a8] sm:$0xff] }
 0xe47   :  { %v2616_v0 = vmul.f32 %v2605_v54, %v5391_v18  ;;  %2651 = vmatpush1.msra.mxu1 %v2617_v47  ;;  %v3257_v18 = vld [vmem:[%s5778_s6 + $0x7d8] sm:$0xff] }
 0xe48   :  { %2652 = vmatprep.subr.mxu1 %v5512_v41  ;;  %v3253_v41 = vld [vmem:[%s5778_s6 + $0x7b8] sm:$0xff] }
 0xe49   :  { %2653 = vmatpush1.msra.mxu1 %v2616_v0 }
 0xe4a   :  { %3226 = vmatmul.mubr.msk.f32.vlgmr.msra.gmra.mxu1 %vm202_vm15, %v4710_v9  ;;  %4148 = vmatprep.subr.mxu1 %v3259_v3  ;;  %v3254_v9 = vld [vmem:[%s5778_s6 + $0x7c0] sm:$0xff] }
 0xe4b   :  { %2692 = vmatprep.mubr.f32.mxu1 %v4510_v16  ;;  %4149 = vmatpush3.msra.mxu1 %v3259_v3  ;;  %v3255_v16 = vld [vmem:[%s5778_s6 + $0x7c8] sm:$0xff] }
 0xe4c   :  { %4150 = vmatprep.subr.mxu1 %v3258_v44 }
 0xe4d   :  { %4151 = vmatpush3.msra.mxu1 %v3258_v44 }
 0xe4e   :  { %3227 = vmatmul.mubr.msk.f32.gmra.mxu1 %vm202_vm15, %v4714_v10  ;;  %4152 = vmatprep.subr.mxu1 %v3257_v18  ;;  %v3252_v10 = vld [vmem:[%s5778_s6 + $0x7b0] sm:$0xff] }
 0xe4f   :  { %4153 = vmatpush3.msra.mxu1 %v3257_v18 }
 0xe50   :  { %4154 = vmatprep.subr.mxu1 %v3256_v22 }
 0xe51   :  { %4155 = vmatpush3.msra.mxu1 %v3256_v22 }
 0xe52   :  { %4156 = vmatprep.subr.mxu1 %v3255_v16 }
 0xe53   :  { %4157 = vmatpush3.msra.mxu1 %v3255_v16 }
 0xe54   :  { %4158 = vmatprep.subr.mxu1 %v3254_v9 }
 0xe55   :  { %4159 = vmatpush3.msra.mxu1 %v3254_v9 }
 0xe56   :  { %4160 = vmatprep.subr.mxu1 %v3253_v41 }
 0xe57   :  { %4161 = vmatpush3.msra.mxu1 %v3253_v41 }
 0xe58   :  { %4162 = vmatprep.subr.mxu1 %v3252_v10 }
 0xe59   :  { %4163 = vmatpush3.msra.mxu1 %v3252_v10 }
 0xe5a   :  { %4164 = vmatprep.subr.mxu1 %v3251_v53 }
 0xe5b   :  { %4165 = vmatpush3.msra.mxu1 %v3251_v53 }
 0xe5c   :  { %4166 = vmatprep.subr.mxu1 %v3250_v27 }
 0xe5d   :  { %4167 = vmatpush3.msra.mxu1 %v3250_v27 }
 0xe5e   :  { %4168 = vmatprep.subr.mxu1 %v3249_v7 }
 0xe5f   :  { %4169 = vmatpush3.msra.mxu1 %v3249_v7 }
 0xe60   :  { %4170 = vmatprep.subr.mxu1 %v3248_v2 }
 0xe61   :  { %4171 = vmatpush3.msra.mxu1 %v3248_v2 }
 0xe62   :  { %4172 = vmatprep.subr.mxu1 %v3247_v55 }
 0xe63   :  { %4173 = vmatpush3.msra.mxu1 %v3247_v55 }
 0xe64   :  { %4174 = vmatprep.subr.mxu1 %v3246_v34 }
 0xe65   :  { %4175 = vmatpush3.msra.mxu1 %v3246_v34 }
 0xe66   :  { %4176 = vmatprep.subr.mxu1 %v3245_v59 }
 0xe67   :  { %4177 = vmatpush3.msra.mxu1 %v3245_v59 }
 0xe68   :  { %4178 = vmatprep.subr.mxu1 %v3244_v4 }
 0xe69   :  { %4179 = vmatpush3.msra.mxu1 %v3244_v4 }
 0xe6a   :  { %4218 = vmatprep.subr.mxu1 %v3279_v21 }
 0xf0a   :  { %v2688_v29 = vpop.f32.mrf.mxu1 }
 0xf0b   :  { %v2699_v19 = vmul.f32 %v5231_v35, %v2688_v29  ;;  %v3278_v35 = vld [vmem:[%s5778_s6 + $0x868] sm:$0xff] }
 0xf0c   :  { %v2690_v31 = vpop.f32.mrf.mxu1 }
 0xf0d   :  { %v2701_v37 = vadd.f32 %v2699_v19, %v5243_v58  ;;  %4180 = vmatprep.mubr.f32.mxu1 %v2690_v31  ;;  %v3275_v58 = vld [vmem:[%s5778_s6 + $0x850] sm:$0xff] }
 0xf0e   :  { %v2694_v13 = vpop.f32.mrf.mxu1 }
 0xf0f   :  { %3006 = vst.msk [vmem:[#allocation2] sm:$0xff] %vm31_vm0, %v2701_v37  ;;  %v2700_v33 = vmul.f32 %v5169_v50, %v2694_v13  ;;  %v3277_v50 = vld [vmem:[%s5778_s6 + $0x860] sm:$0xff] }
 0xf10   :  { %v2696_v6 = vpop.f32.mrf.mxu1 }
 0xf11   :  { %v2702_v32 = vadd.f32 %v2700_v33, %v5177_v52  ;;  %4181 = vmatmul.mubr.f32.vlgmr.msra.gmra.mxu1 %v2696_v6  ;;  %v3276_v52 = vld [vmem:[%s5778_s6 + $0x858] sm:$0xff] }
 0xf12   :  { %4219 = vmatpush3.msra.mxu1 %v3279_v21 }
 0xf13   :  { %3007 = vst.msk [vmem:[#allocation2 + $0x8] sm:$0xff] %vm31_vm0, %v2702_v32  ;;  %4220 = vmatprep.subr.mxu1 %v3278_v35 }
 0xf14   :  { %4221 = vmatpush3.msra.mxu1 %v3278_v35 }
 0xf15   :  { %4222 = vmatprep.subr.mxu1 %v3277_v50 }
 0xf16   :  { %4223 = vmatpush3.msra.mxu1 %v3277_v50 }
 0xf17   :  { %4224 = vmatprep.subr.mxu1 %v3276_v52 }
 0xf18   :  { %4225 = vmatpush3.msra.mxu1 %v3276_v52 }
 0xf19   :  { %4226 = vmatprep.subr.mxu1 %v3275_v58 }
 0xf1a   :  { %4227 = vmatpush3.msra.mxu1 %v3275_v58 }
 0xf1b   :  { %4228 = vmatprep.subr.mxu1 %v3274_v36 }
 0xf1c   :  { %4229 = vmatpush3.msra.mxu1 %v3274_v36 }
 0xf1d   :  { %4230 = vmatprep.subr.mxu1 %v3273_v12 }
 0xf1e   :  { %4231 = vmatpush3.msra.mxu1 %v3273_v12 }
 0xf1f   :  { %4232 = vmatprep.subr.mxu1 %v3272_v28 }
 0xf20   :  { %4233 = vmatpush3.msra.mxu1 %v3272_v28 }
 0xf21   :  { %4234 = vmatprep.subr.mxu1 %v3271_v62 }
 0xf22   :  { %4235 = vmatpush3.msra.mxu1 %v3271_v62 }
 0xf23   :  { %4236 = vmatprep.subr.mxu1 %v3270_v23 }
 0xf24   :  { %4237 = vmatpush3.msra.mxu1 %v3270_v23 }
 0xf25   :  { %4238 = vmatprep.subr.mxu1 %v3269_v26 }
 0xf26   :  { %4239 = vmatpush3.msra.mxu1 %v3269_v26 }
 0xf27   :  { %4240 = vmatprep.subr.mxu1 %v3268_v39 }
 0xf28   :  { %4241 = vmatpush3.msra.mxu1 %v3268_v39 }
 0xf29   :  { %4242 = vmatprep.subr.mxu1 %v3267_v40 }
 0xf2a   :  { %4243 = vmatpush3.msra.mxu1 %v3267_v40 }
 0xf2b   :  { %4244 = vmatprep.subr.mxu1 %v3266_v14 }
 0xf2c   :  { %4245 = vmatpush3.msra.mxu1 %v3266_v14 }
 0xf2d   :  { %4246 = vmatprep.subr.mxu1 %v3265_v25 }
 0xf2e   :  { %4247 = vmatpush3.msra.mxu1 %v3265_v25 }
 0xf2f   :  { %4248 = vmatprep.subr.mxu1 %v3264_v43 }
 0xf30   :  { %4249 = vmatpush3.msra.mxu1 %v3264_v43 }
 0xfd1   :  { %v4182_v46 = vpop.f32.mrf.mxu1 }
 0xfd2   :  { %v2882_v38 = vadd.f32 %v4217_v45, %v4182_v46 }
 0xfd3   :  { %v2801_v51 = vpop.f32.mrf.mxu1 }
 0xfd4   :  { %v2891_v57 = vadd.f32 %v3261_v48, %v2882_v38  ;;  %v2877_v17 = vadd.f32 %v2876_v42, %v2801_v51 }
 0xfd6   :  { %v3263_v63 = vmul.f32 -1.442695, %v2891_v57  ;;  %v2890_v20 = vadd.f32 %v3261_v48, %v2877_v17 }
 0xfd8   :  { %4477 = vpow2.f32 %v3263_v63  ;;  %v3262_v5 = vmul.f32 -1.442695, %v2890_v20 }
 0xfda   :  { %4479 = vpow2.f32 %v3262_v5 }
 0xfe5   :  { %v4478_v56 = vpop.eup %4477 }
 0xfe6   :  { %v2899_v49 = vadd.f32 1.0, %v4478_v56 }
 0xfe7   :  { %v4480_v24 = vpop.eup %4479 }
 0xfe8   :  { %v2898_v30 = vadd.f32 1.0, %v4480_v24  ;;  %4481 = vrcp.f32 %v2899_v49 }
 0xfea   :  { %4483 = vrcp.f32 %v2898_v30 }
 0xff5   :  { %v4482_v8 = vpop.eup %4481 }
 0xff6   :  { %v2905_v11 = vmul.f32 %v4482_v8, %v2891_v57 }
 0xff7   :  { %v4484_v60 = vpop.eup %4483 }
 0xff8   :  { %v2904_v1 = vmul.f32 %v4484_v60, %v2890_v20 }
 0xffa   :  { %4250 = vmatprep.mubr.f32.mxu1 %v2904_v1 }
 0xffb   :  { %4251 = vmatmul.mubr.f32.vlgmr.msra.gmra.mxu1 %v2905_v11 }
 0xffc   :  { %4498 = shalt.err (!%p4495_p4)
}
 0xffd   :  { %s4513_s4 = smov 128   ;;  %s4514_s2 = smov 8   ;;  %v3281_v47 = vld [vmem:[%s5778_s6 + $0x878] ss:$0 sm:$0xff] }
 0xffe   :  { %3021 = dma.vmem_to_hbm [thread:$0]  %s3016_s12, 256, %s5780_s8, [#allocation3], %s4513_s4, %s4513_s4, %s4514_s2  }
0x10bb   :  { %v4252_v54 = vpop.f32.mrf.mxu1 }
0x10bc   :  { %v2999_v0 = vadd.f32 %v4252_v54, %v3281_v47 }
0x10bd   :  { %v2993_v3 = vpop.f32.mrf.mxu1 }
0x10be   :  { %v3003_v44 = vadd.f32 %v2999_v0, %v5241_v15  ;;  %v2994_v18 = vadd.f32 %v3281_v47, %v2993_v3 }
0x10c0   :  { %3005 = vst.msk [vmem:[%s5779_s7 + $0x8] sm:$0xff] %vm79_vm7, %v3003_v44  ;;  %v3002_v22 = vadd.f32 %v2994_v18, %v5245_v61 }
0x10c2   :  { %3004 = vst.msk [vmem:[%s5779_s7] sm:$0xff] %vm79_vm7, %v3002_v22 }
0x10c3   :  { %4507 = dma.done.wait [#allocation3], 256  }
0x10c4   :  { %4508 = vsyncadd [#allocation3], 4294967040 }
0x10c5   :  { %3027 = vsyncpa [#allocation3], 1 }

</bundles_post_ra>
